<compile_context>
chip_gen: v5e
topology: v5e:2x2
jax: 0.10.0
libtpu: 0.0.40
codegen_flags: <defaults>
</compile_context>

<pallas_src>
import numpy as np
import jax
import jax.numpy as jnp
from jax import lax
from jax.experimental import pallas as pl
from jax.experimental.pallas import tpu as pltpu

_BN_EPS = 1e-5
_VMEM_LIMIT = 48 * 1024 * 1024       # safe on v5e/v6e (128 MiB) and v7x (64 MiB)
_TILE_BUDGET = 12 * 1024 * 1024      # row-dependent VMEM budget (A + y tiles, 2x buffered)


def _round_up(x, m):
    return (x + m - 1) // m * m


# ----------------------------- Pallas kernels -----------------------------

def _deconv_bn_stats_kernel(a_ref, b_ref, o_ref, psum_ref, psumsq_ref):
    """bf16 MXU matmul with f32 accumulation; bf16 y writeback plus partial
    per-column BatchNorm statistics computed from the f32 accumulator while
    the output tile is resident in VMEM."""
    acc = jnp.dot(a_ref[0], b_ref[0], preferred_element_type=jnp.float32)
    o_ref[0] = acc.astype(o_ref.dtype)                      # bf16 y
    psum_ref[0, 0] = jnp.sum(acc, axis=0, keepdims=True)    # (1, C)
    psumsq_ref[0, 0] = jnp.sum(acc * acc, axis=0, keepdims=True)


def _deconv_tanh_kernel(a_ref, b_ref, o_ref):
    """Final layer: bf16 MXU matmul, fused tanh, only the true Cout columns."""
    acc = jnp.dot(a_ref[0], b_ref[0], preferred_element_type=jnp.float32)
    o_ref[0] = jnp.tanh(acc)


# ----------------------------- Pallas wrappers -----------------------------

def _pick_row_tile(m_rows, k, c):
    """Largest row tile (multiple of 8, <= 2048, divides m_rows) whose
    double-buffered A / y tiles stay inside the per-layer VMEM budget."""
    per_row = 4 * k + 8 * c + 32      # 2x bf16 A + bf16 y + f32 acc slack
    cap = max(8, min(2048, _TILE_BUDGET // per_row))
    tm = max(8, (min(m_rows, cap) // 8) * 8)
    while m_rows % tm:                # 8 divides m_rows, so this terminates
        tm -= 8
    return tm


def _matmul_call(a, b, *, with_stats):
    """Per-phase matmul on the MXU.

    a: (P, M, K), b: (P, K, C).  Returns (y, stats):
      y: (P, Mp, C) bf16 pre-BN output (stats mode) or f32 with tanh applied
         (tanh mode);
      stats: (col_sum, col_sumsq) f32 vectors of length C summed over all
         phases and row tiles, or None in tanh mode.
    """
    P, M, K = a.shape
    C = b.shape[2]
    Mp = _round_up(M, 8)

    a = a.astype(jnp.bfloat16)
    b = b.astype(jnp.bfloat16)
    if Mp != M:                       # only layer 1 (M = batch) needs this
        a = jnp.pad(a, ((0, 0), (0, Mp - M), (0, 0)))

    tm = _pick_row_tile(Mp, K, C)
    nm = Mp // tm

    a_spec = pl.BlockSpec((1, tm, K), lambda p, m: (p, m, 0))
    b_spec = pl.BlockSpec((1, K, C), lambda p, m: (p, 0, 0))
    o_spec = pl.BlockSpec((1, tm, C), lambda p, m: (p, m, 0))
    cparams = pltpu.CompilerParams(
        dimension_semantics=("parallel", "parallel"),
        vmem_limit_bytes=_VMEM_LIMIT)

    if with_stats:
        stats_spec = pl.BlockSpec((1, 1, 1, C), lambda p, m: (p, m, 0, 0))
        y, psum, psumsq = pl.pallas_call(
            _deconv_bn_stats_kernel,
            out_shape=(jax.ShapeDtypeStruct((P, Mp, C), jnp.bfloat16),
                       jax.ShapeDtypeStruct((P, nm, 1, C), jnp.float32),
                       jax.ShapeDtypeStruct((P, nm, 1, C), jnp.float32)),
            grid=(P, nm),
            in_specs=[a_spec, b_spec],
            out_specs=(o_spec, stats_spec, stats_spec),
            compiler_params=cparams,
        )(a, b)
        return y, (psum.sum(axis=(0, 1, 2)), psumsq.sum(axis=(0, 1, 2)))

    y = pl.pallas_call(
        _deconv_tanh_kernel,
        out_shape=jax.ShapeDtypeStruct((P, Mp, C), jnp.float32),
        grid=(P, nm),
        in_specs=[a_spec, b_spec],
        out_specs=o_spec,
        compiler_params=cparams,
    )(a, b)
    return y, None


# --------------------- deconv phase decomposition (glue) --------------------

def _phase_operands(x, w):
    """Sub-pixel phase decomposition of ConvTranspose2d(k=4, stride=2, pad=1).

    x: (N, H, W, Cin) channels-last bf16 activations; w: (Cin, Cout, 4, 4)
    (PyTorch ConvTranspose2d layout).  Output pixel (2h+pa, 2w+pb) only sees a
    2x2 window of x, so each phase p = 2*pa+pb is an independent stride-1
    matmul:  A[p]: (N*H*W, 4*Cin),  B[p]: (4*Cin, Cout).
    """
    N, H, W, Cin = x.shape
    Cout = w.shape[1]
    xp = jnp.pad(x, ((0, 0), (1, 1), (1, 1), (0, 0)))
    a_list, b_list = [], []
    for pa in range(2):
        for pb in range(2):
            taps = [xp[:, pa + dy:pa + dy + H, pb + dx:pb + dx + W, :]
                    for dy in range(2) for dx in range(2)]
            a_list.append(
                jnp.concatenate(taps, axis=-1).reshape(N * H * W, 4 * Cin))
            # weight tap for (dy, dx) is w[..., 3-pa-2*dy, 3-pb-2*dx]
            w_sub = w[:, :, [3 - pa, 1 - pa], :][:, :, :, [3 - pb, 1 - pb]]
            b_list.append(
                jnp.transpose(w_sub, (2, 3, 0, 1)).reshape(4 * Cin, Cout))
    return jnp.stack(a_list, axis=0), jnp.stack(b_list, axis=0)


def _bn_scale_shift(ch_sum, ch_sumsq, count, gamma, beta, eps=_BN_EPS):
    mean = ch_sum / count
    var = jnp.maximum(ch_sumsq / count - mean * mean, 0.0)
    inv_std = lax.rsqrt(var + eps)
    scale = gamma * inv_std
    shift = beta - mean * scale
    return scale, shift


def _bn_relu_interleave(y, scale, shift, N, H, W, C):
    """(4, Mp, C) bf16 pre-BN phase outputs -> (N, 2H, 2W, C) bf16 activations.
    Per-channel scale/shift + ReLU is applied inside the phase-interleave
    transpose that XLA performs anyway (replaces the old standalone apply
    kernel, per the perf review)."""
    M = N * H * W
    act = jnp.maximum(y[:, :M, :].astype(jnp.float32) * scale + shift, 0.0)
    act = act.astype(jnp.bfloat16).reshape(2, 2, N, H, W, C)
    return jnp.transpose(act, (2, 3, 0, 4, 1, 5)).reshape(N, 2 * H, 2 * W, C)


# ------------------------------- Generator ---------------------------------

def generator_forward(z, params):
    N, numz = z.shape[0], z.shape[1]

    # ---- layer 1: ConvTranspose2d(numz, ngf*8, 4, s=1, p=0) + BN + ReLU.
    # 1x1 input -> plain matmul (N, numz) @ (numz, 4*4*Cout).
    w1 = params["w"][0]
    C1 = w1.shape[1]
    a = z.reshape(N, numz).astype(jnp.bfloat16)[None]              # (1, N, numz)
    bmat = jnp.transpose(w1, (0, 2, 3, 1)).reshape(numz, 16 * C1)[None]
    y, (s1, s2) = _matmul_call(a, bmat, with_stats=True)
    ch_sum = s1.reshape(16, C1).sum(axis=0)
    ch_sumsq = s2.reshape(16, C1).sum(axis=0)
    scale, shift = _bn_scale_shift(ch_sum, ch_sumsq, float(N * 16),
                                   params["gamma"][0], params["beta"][0])
    y1 = y[0, :N, :].astype(jnp.float32).reshape(N, 4, 4, C1)      # channels-last
    x = jnp.maximum(y1 * scale + shift, 0.0).astype(jnp.bfloat16)

    # ---- layers 2-4: ConvTranspose2d(k=4, s=2, p=1) + BN + ReLU.
    for li in range(1, 4):
        w = params["w"][li]
        Cout = w.shape[1]
        H, W = x.shape[1], x.shape[2]
        A, B = _phase_operands(x, w)
        y, (s1, s2) = _matmul_call(A, B, with_stats=True)
        scale, shift = _bn_scale_shift(s1, s2, float(4 * N * H * W),
                                       params["gamma"][li], params["beta"][li])
        x = _bn_relu_interleave(y, scale, shift, N, H, W, Cout)

    # ---- layer 5: ConvTranspose2d(k=4, s=2, p=1) + tanh (fused epilogue,
    # only the 3 real output columns are computed/stored).
    w = params["w"][4]
    H, W = x.shape[1], x.shape[2]
    M = N * H * W
    A, B = _phase_operands(x, w)
    y, _ = _matmul_call(A, B, with_stats=False)                    # (4, M, 3) f32
    out = y[:, :M, :].reshape(2, 2, N, H, W, 3)
    # phase interleave + NHWC->NCHW folded into one transpose
    return jnp.transpose(out, (2, 5, 3, 0, 4, 1)).reshape(N, 3, 2 * H, 2 * W)


def init_params(key, numz, ngf):
    shapes = [
        (numz, ngf * 8, 4, 4),
        (ngf * 8, ngf * 4, 4, 4),
        (ngf * 4, ngf * 2, 4, 4),
        (ngf * 2, ngf, 4, 4),
        (ngf, 3, 4, 4),
    ]
    bn_ch = [ngf * 8, ngf * 4, ngf * 2, ngf]
    keys = jax.random.split(key, len(shapes) + 2 * len(bn_ch))
    ws = [0.02 * jax.random.normal(keys[i], s, jnp.float32)
          for i, s in enumerate(shapes)]
    gammas = [1.0 + 0.1 * jax.random.normal(keys[len(shapes) + i], (c,), jnp.float32)
              for i, c in enumerate(bn_ch)]
    betas = [0.1 * jax.random.normal(keys[len(shapes) + len(bn_ch) + i], (c,), jnp.float32)
             for i, c in enumerate(bn_ch)]
    return {"w": ws, "gamma": gammas, "beta": betas}


# --------------------------- pure-JAX reference -----------------------------

_LAYER_CFG = [(1, 0), (2, 1), (2, 1), (2, 1), (2, 1)]  # (stride, padding)


def _conv_transpose_ref(x, w, stride, padding):
    k = w.shape[2]
    wt = jnp.flip(w, axis=(2, 3)).transpose(1, 0, 2, 3)  # (Cout, Cin, k, k)
    p = k - 1 - padding
    return lax.conv_general_dilated(
        x, wt, window_strides=(1, 1), padding=[(p, p), (p, p)],
        lhs_dilation=(stride, stride),
        dimension_numbers=("NCHW", "OIHW", "NCHW"),
        precision=lax.Precision.HIGHEST)


def _bn_relu_ref(x, gamma, beta, eps=_BN_EPS):
    mean = x.mean(axis=(0, 2, 3), keepdims=True)
    var = ((x - mean) ** 2).mean(axis=(0, 2, 3), keepdims=True)
    xn = (x - mean) / jnp.sqrt(var + eps)
    xn = xn * gamma[None, :, None, None] + beta[None, :, None, None]
    return jnp.maximum(xn, 0.0)


def generator_ref(z, params):
    x = z
    for li, (stride, padding) in enumerate(_LAYER_CFG):
        x = _conv_transpose_ref(x, params["w"][li], stride, padding)
        if li < 4:
            x = _bn_relu_ref(x, params["gamma"][li], params["beta"][li])
        else:
            x = jnp.tanh(x)
    return x


# ----------------------------------- main -----------------------------------

if __name__ == "__main__":
    # small shapes consistent with the module: z is (N, numz, 1, 1)
    numz, ngf, batch = 32, 16, 2
    key = jax.random.PRNGKey(0)
    params = init_params(key, numz, ngf)
    z = jax.random.normal(jax.random.fold_in(key, 999),
                          (batch, numz, 1, 1), dtype=jnp.float32)

    fwd = jax.jit(generator_forward)
    out = jax.block_until_ready(fwd(z, params))
    assert out.shape == (batch, 3, 64, 64), out.shape

    ref = jax.block_until_ready(generator_ref(z, params))
    # bf16 MXU operands + bf16 y writeback (per the perf review) vs. an
    # f32 Precision.HIGHEST reference -> slightly looser tolerance.
    np.testing.assert_allclose(np.asarray(out), np.asarray(ref),
                               rtol=3e-2, atol=3e-2)
    print("KERNEL_OK")
</pallas_src>

<mosaic_0001>
module attributes {stable_mosaic.version = 11 : i64} {
  func.func @_deconv_bn_stats_kernel(%arg0: i32, %arg1: i32, %arg2: memref<1x8x32xbf16, #tpu.memory_space<vmem>>, %arg3: memref<1x32x2048xbf16, #tpu.memory_space<vmem>>, %arg4: memref<1x8x2048xbf16, #tpu.memory_space<vmem>>, %arg5: memref<1x1x1x2048xf32, #tpu.memory_space<vmem>>, %arg6: memref<1x1x1x2048xf32, #tpu.memory_space<vmem>>) attributes {dimension_semantics = [#tpu.dimension_semantics<parallel>, #tpu.dimension_semantics<parallel>], iteration_bounds = array<i64: 1, 1>, scalar_prefetch = 0 : i64, scratch_operands = 0 : i64, tpu.core_type = #tpu.core_type<tc>, window_params = [{transform_indices = @transform_0, window_bounds = array<i64: 1, 8, 32>}, {transform_indices = @transform_1, window_bounds = array<i64: 1, 32, 2048>}, {transform_indices = @transform_2, window_bounds = array<i64: 1, 8, 2048>}, {transform_indices = @transform_3, window_bounds = array<i64: 1, 1, 1, 2048>}, {transform_indices = @transform_4, window_bounds = array<i64: 1, 1, 1, 2048>}]} {
    %c0 = arith.constant 0 : index
    %c0_0 = arith.constant 0 : index
    %c0_1 = arith.constant 0 : index
    %0 = vector.load %arg2[%c0, %c0_0, %c0_1] : memref<1x8x32xbf16, #tpu.memory_space<vmem>>, vector<1x8x32xbf16>
    %1 = vector.shape_cast %0 : vector<1x8x32xbf16> to vector<8x32xbf16>
    %c0_2 = arith.constant 0 : index
    %c0_3 = arith.constant 0 : index
    %c0_4 = arith.constant 0 : index
    %2 = vector.load %arg3[%c0_2, %c0_3, %c0_4] : memref<1x32x2048xbf16, #tpu.memory_space<vmem>>, vector<1x32x2048xbf16>
    %3 = vector.shape_cast %2 : vector<1x32x2048xbf16> to vector<32x2048xbf16>
    %cst = arith.constant dense<0.000000e+00> : vector<8x2048xf32>
    %4 = tpu.matmul %1, %3, %cst {dimension_numbers = #tpu.dot_dimension_numbers<[1], [0], [0], [1], [0, 0, 1, 1], [], []>} : vector<8x32xbf16>, vector<32x2048xbf16>, vector<8x2048xf32> -> vector<8x2048xf32>
    %5 = arith.truncf %4 : vector<8x2048xf32> to vector<8x2048xbf16>
    %c0_5 = arith.constant 0 : index
    %c0_6 = arith.constant 0 : index
    %c0_7 = arith.constant 0 : index
    %6 = vector.load %arg4[%c0_5, %c0_6, %c0_7] : memref<1x8x2048xbf16, #tpu.memory_space<vmem>>, vector<1x8x2048xbf16>
    %7 = vector.shape_cast %6 : vector<1x8x2048xbf16> to vector<8x2048xbf16>
    %8 = vector.shape_cast %5 : vector<8x2048xbf16> to vector<1x8x2048xbf16>
    tpu.vector_store %arg4[%c0_5, %c0_6, %c0_7], %8 {strides = array<i32>} : memref<1x8x2048xbf16, #tpu.memory_space<vmem>>, vector<1x8x2048xbf16>,
    %cst_8 = arith.constant dense<0.000000e+00> : vector<2048xf32>
    %9 = vector.multi_reduction <add>, %4, %cst_8 [0] : vector<8x2048xf32> to vector<2048xf32>
    %10 = vector.shape_cast %9 : vector<2048xf32> to vector<1x2048xf32>
    %c0_9 = arith.constant 0 : index
    %c0_10 = arith.constant 0 : index
    %c0_11 = arith.constant 0 : index
    %c0_12 = arith.constant 0 : index
    %11 = vector.load %arg5[%c0_9, %c0_10, %c0_11, %c0_12] : memref<1x1x1x2048xf32, #tpu.memory_space<vmem>>, vector<1x1x1x2048xf32>
    %12 = vector.shape_cast %11 : vector<1x1x1x2048xf32> to vector<1x2048xf32>
    %13 = vector.shape_cast %10 : vector<1x2048xf32> to vector<1x1x1x2048xf32>
    tpu.vector_store %arg5[%c0_9, %c0_10, %c0_11, %c0_12], %13 {strides = array<i32>} : memref<1x1x1x2048xf32, #tpu.memory_space<vmem>>, vector<1x1x1x2048xf32>,
    %14 = arith.mulf %4, %4 : vector<8x2048xf32>
    %cst_13 = arith.constant dense<0.000000e+00> : vector<2048xf32>
    %15 = vector.multi_reduction <add>, %14, %cst_13 [0] : vector<8x2048xf32> to vector<2048xf32>
    %16 = vector.shape_cast %15 : vector<2048xf32> to vector<1x2048xf32>
    %c0_14 = arith.constant 0 : index
    %c0_15 = arith.constant 0 : index
    %c0_16 = arith.constant 0 : index
    %c0_17 = arith.constant 0 : index
    %17 = vector.load %arg6[%c0_14, %c0_15, %c0_16, %c0_17] : memref<1x1x1x2048xf32, #tpu.memory_space<vmem>>, vector<1x1x1x2048xf32>
    %18 = vector.shape_cast %17 : vector<1x1x1x2048xf32> to vector<1x2048xf32>
    %19 = vector.shape_cast %16 : vector<1x2048xf32> to vector<1x1x1x2048xf32>
    tpu.vector_store %arg6[%c0_14, %c0_15, %c0_16, %c0_17], %19 {strides = array<i32>} : memref<1x1x1x2048xf32, #tpu.memory_space<vmem>>, vector<1x1x1x2048xf32>,
    return
  }
  func.func @transform_0(%arg0: i32, %arg1: i32) -> (i32, i32, i32) {
    %c0_i32 = arith.constant 0 : i32
    %c0_i32_0 = arith.constant 0 : i32
    return %arg0, %arg1, %c0_i32 : i32, i32, i32
  }
  func.func @transform_1(%arg0: i32, %arg1: i32) -> (i32, i32, i32) {
    %c0_i32 = arith.constant 0 : i32
    %c0_i32_0 = arith.constant 0 : i32
    %c0_i32_1 = arith.constant 0 : i32
    return %arg0, %c0_i32, %c0_i32_0 : i32, i32, i32
  }
  func.func @transform_2(%arg0: i32, %arg1: i32) -> (i32, i32, i32) {
    %c0_i32 = arith.constant 0 : i32
    %c0_i32_0 = arith.constant 0 : i32
    return %arg0, %arg1, %c0_i32 : i32, i32, i32
  }
  func.func @transform_3(%arg0: i32, %arg1: i32) -> (i32, i32, i32, i32) {
    %c0_i32 = arith.constant 0 : i32
    %c0_i32_0 = arith.constant 0 : i32
    %c0_i32_1 = arith.constant 0 : i32
    return %arg0, %arg1, %c0_i32, %c0_i32_0 : i32, i32, i32, i32
  }
  func.func @transform_4(%arg0: i32, %arg1: i32) -> (i32, i32, i32, i32) {
    %c0_i32 = arith.constant 0 : i32
    %c0_i32_0 = arith.constant 0 : i32
    %c0_i32_1 = arith.constant 0 : i32
    return %arg0, %arg1, %c0_i32, %c0_i32_0 : i32, i32, i32, i32
  }
}

module attributes {stable_mosaic.version = 11 : i64} {
  func.func @_deconv_bn_stats_kernel(%arg0: i32, %arg1: i32, %arg2: memref<1x32x512xbf16, #tpu.memory_space<vmem>>, %arg3: memref<1x512x64xbf16, #tpu.memory_space<vmem>>, %arg4: memref<1x32x64xbf16, #tpu.memory_space<vmem>>, %arg5: memref<1x1x1x64xf32, #tpu.memory_space<vmem>>, %arg6: memref<1x1x1x64xf32, #tpu.memory_space<vmem>>) attributes {dimension_semantics = [#tpu.dimension_semantics<parallel>, #tpu.dimension_semantics<parallel>], iteration_bounds = array<i64: 4, 1>, scalar_prefetch = 0 : i64, scratch_operands = 0 : i64, tpu.core_type = #tpu.core_type<tc>, window_params = [{transform_indices = @transform_0, window_bounds = array<i64: 1, 32, 512>}, {transform_indices = @transform_1, window_bounds = array<i64: 1, 512, 64>}, {transform_indices = @transform_2, window_bounds = array<i64: 1, 32, 64>}, {transform_indices = @transform_3, window_bounds = array<i64: 1, 1, 1, 64>}, {transform_indices = @transform_4, window_bounds = array<i64: 1, 1, 1, 64>}]} {
    %c0 = arith.constant 0 : index
    %c0_0 = arith.constant 0 : index
    %c0_1 = arith.constant 0 : index
    %0 = vector.load %arg2[%c0, %c0_0, %c0_1] : memref<1x32x512xbf16, #tpu.memory_space<vmem>>, vector<1x32x512xbf16>
    %1 = vector.shape_cast %0 : vector<1x32x512xbf16> to vector<32x512xbf16>
    %c0_2 = arith.constant 0 : index
    %c0_3 = arith.constant 0 : index
    %c0_4 = arith.constant 0 : index
    %2 = vector.load %arg3[%c0_2, %c0_3, %c0_4] : memref<1x512x64xbf16, #tpu.memory_space<vmem>>, vector<1x512x64xbf16>
    %3 = vector.shape_cast %2 : vector<1x512x64xbf16> to vector<512x64xbf16>
    %cst = arith.constant dense<0.000000e+00> : vector<32x64xf32>
    %4 = tpu.matmul %1, %3, %cst {dimension_numbers = #tpu.dot_dimension_numbers<[1], [0], [0], [1], [0, 0, 1, 1], [], []>} : vector<32x512xbf16>, vector<512x64xbf16>, vector<32x64xf32> -> vector<32x64xf32>
    %5 = arith.truncf %4 : vector<32x64xf32> to vector<32x64xbf16>
    %c0_5 = arith.constant 0 : index
    %c0_6 = arith.constant 0 : index
    %c0_7 = arith.constant 0 : index
    %6 = vector.load %arg4[%c0_5, %c0_6, %c0_7] : memref<1x32x64xbf16, #tpu.memory_space<vmem>>, vector<1x32x64xbf16>
    %7 = vector.shape_cast %6 : vector<1x32x64xbf16> to vector<32x64xbf16>
    %8 = vector.shape_cast %5 : vector<32x64xbf16> to vector<1x32x64xbf16>
    tpu.vector_store %arg4[%c0_5, %c0_6, %c0_7], %8 {strides = array<i32>} : memref<1x32x64xbf16, #tpu.memory_space<vmem>>, vector<1x32x64xbf16>,
    %cst_8 = arith.constant dense<0.000000e+00> : vector<64xf32>
    %9 = vector.multi_reduction <add>, %4, %cst_8 [0] : vector<32x64xf32> to vector<64xf32>
    %10 = vector.shape_cast %9 : vector<64xf32> to vector<1x64xf32>
    %c0_9 = arith.constant 0 : index
    %c0_10 = arith.constant 0 : index
    %c0_11 = arith.constant 0 : index
    %c0_12 = arith.constant 0 : index
    %11 = vector.load %arg5[%c0_9, %c0_10, %c0_11, %c0_12] : memref<1x1x1x64xf32, #tpu.memory_space<vmem>>, vector<1x1x1x64xf32>
    %12 = vector.shape_cast %11 : vector<1x1x1x64xf32> to vector<1x64xf32>
    %13 = vector.shape_cast %10 : vector<1x64xf32> to vector<1x1x1x64xf32>
    tpu.vector_store %arg5[%c0_9, %c0_10, %c0_11, %c0_12], %13 {strides = array<i32>} : memref<1x1x1x64xf32, #tpu.memory_space<vmem>>, vector<1x1x1x64xf32>,
    %14 = arith.mulf %4, %4 : vector<32x64xf32>
    %cst_13 = arith.constant dense<0.000000e+00> : vector<64xf32>
    %15 = vector.multi_reduction <add>, %14, %cst_13 [0] : vector<32x64xf32> to vector<64xf32>
    %16 = vector.shape_cast %15 : vector<64xf32> to vector<1x64xf32>
    %c0_14 = arith.constant 0 : index
    %c0_15 = arith.constant 0 : index
    %c0_16 = arith.constant 0 : index
    %c0_17 = arith.constant 0 : index
    %17 = vector.load %arg6[%c0_14, %c0_15, %c0_16, %c0_17] : memref<1x1x1x64xf32, #tpu.memory_space<vmem>>, vector<1x1x1x64xf32>
    %18 = vector.shape_cast %17 : vector<1x1x1x64xf32> to vector<1x64xf32>
    %19 = vector.shape_cast %16 : vector<1x64xf32> to vector<1x1x1x64xf32>
    tpu.vector_store %arg6[%c0_14, %c0_15, %c0_16, %c0_17], %19 {strides = array<i32>} : memref<1x1x1x64xf32, #tpu.memory_space<vmem>>, vector<1x1x1x64xf32>,
    return
  }
  func.func @transform_0(%arg0: i32, %arg1: i32) -> (i32, i32, i32) {
    %c0_i32 = arith.constant 0 : i32
    %c0_i32_0 = arith.constant 0 : i32
    return %arg0, %arg1, %c0_i32 : i32, i32, i32
  }
  func.func @transform_1(%arg0: i32, %arg1: i32) -> (i32, i32, i32) {
    %c0_i32 = arith.constant 0 : i32
    %c0_i32_0 = arith.constant 0 : i32
    %c0_i32_1 = arith.constant 0 : i32
    return %arg0, %c0_i32, %c0_i32_0 : i32, i32, i32
  }
  func.func @transform_2(%arg0: i32, %arg1: i32) -> (i32, i32, i32) {
    %c0_i32 = arith.constant 0 : i32
    %c0_i32_0 = arith.constant 0 : i32
    return %arg0, %arg1, %c0_i32 : i32, i32, i32
  }
  func.func @transform_3(%arg0: i32, %arg1: i32) -> (i32, i32, i32, i32) {
    %c0_i32 = arith.constant 0 : i32
    %c0_i32_0 = arith.constant 0 : i32
    %c0_i32_1 = arith.constant 0 : i32
    return %arg0, %arg1, %c0_i32, %c0_i32_0 : i32, i32, i32, i32
  }
  func.func @transform_4(%arg0: i32, %arg1: i32) -> (i32, i32, i32, i32) {
    %c0_i32 = arith.constant 0 : i32
    %c0_i32_0 = arith.constant 0 : i32
    %c0_i32_1 = arith.constant 0 : i32
    return %arg0, %arg1, %c0_i32, %c0_i32_0 : i32, i32, i32, i32
  }
}

module attributes {stable_mosaic.version = 11 : i64} {
  func.func @_deconv_bn_stats_kernel(%arg0: i32, %arg1: i32, %arg2: memref<1x128x256xbf16, #tpu.memory_space<vmem>>, %arg3: memref<1x256x32xbf16, #tpu.memory_space<vmem>>, %arg4: memref<1x128x32xbf16, #tpu.memory_space<vmem>>, %arg5: memref<1x1x1x32xf32, #tpu.memory_space<vmem>>, %arg6: memref<1x1x1x32xf32, #tpu.memory_space<vmem>>) attributes {dimension_semantics = [#tpu.dimension_semantics<parallel>, #tpu.dimension_semantics<parallel>], iteration_bounds = array<i64: 4, 1>, scalar_prefetch = 0 : i64, scratch_operands = 0 : i64, tpu.core_type = #tpu.core_type<tc>, window_params = [{transform_indices = @transform_0, window_bounds = array<i64: 1, 128, 256>}, {transform_indices = @transform_1, window_bounds = array<i64: 1, 256, 32>}, {transform_indices = @transform_2, window_bounds = array<i64: 1, 128, 32>}, {transform_indices = @transform_3, window_bounds = array<i64: 1, 1, 1, 32>}, {transform_indices = @transform_4, window_bounds = array<i64: 1, 1, 1, 32>}]} {
    %c0 = arith.constant 0 : index
    %c0_0 = arith.constant 0 : index
    %c0_1 = arith.constant 0 : index
    %0 = vector.load %arg2[%c0, %c0_0, %c0_1] : memref<1x128x256xbf16, #tpu.memory_space<vmem>>, vector<1x128x256xbf16>
    %1 = vector.shape_cast %0 : vector<1x128x256xbf16> to vector<128x256xbf16>
    %c0_2 = arith.constant 0 : index
    %c0_3 = arith.constant 0 : index
    %c0_4 = arith.constant 0 : index
    %2 = vector.load %arg3[%c0_2, %c0_3, %c0_4] : memref<1x256x32xbf16, #tpu.memory_space<vmem>>, vector<1x256x32xbf16>
    %3 = vector.shape_cast %2 : vector<1x256x32xbf16> to vector<256x32xbf16>
    %cst = arith.constant dense<0.000000e+00> : vector<128x32xf32>
    %4 = tpu.matmul %1, %3, %cst {dimension_numbers = #tpu.dot_dimension_numbers<[1], [0], [0], [1], [0, 0, 1, 1], [], []>} : vector<128x256xbf16>, vector<256x32xbf16>, vector<128x32xf32> -> vector<128x32xf32>
    %5 = arith.truncf %4 : vector<128x32xf32> to vector<128x32xbf16>
    %c0_5 = arith.constant 0 : index
    %c0_6 = arith.constant 0 : index
    %c0_7 = arith.constant 0 : index
    %6 = vector.load %arg4[%c0_5, %c0_6, %c0_7] : memref<1x128x32xbf16, #tpu.memory_space<vmem>>, vector<1x128x32xbf16>
    %7 = vector.shape_cast %6 : vector<1x128x32xbf16> to vector<128x32xbf16>
    %8 = vector.shape_cast %5 : vector<128x32xbf16> to vector<1x128x32xbf16>
    tpu.vector_store %arg4[%c0_5, %c0_6, %c0_7], %8 {strides = array<i32>} : memref<1x128x32xbf16, #tpu.memory_space<vmem>>, vector<1x128x32xbf16>,
    %cst_8 = arith.constant dense<0.000000e+00> : vector<32xf32>
    %9 = vector.multi_reduction <add>, %4, %cst_8 [0] : vector<128x32xf32> to vector<32xf32>
    %10 = vector.shape_cast %9 : vector<32xf32> to vector<1x32xf32>
    %c0_9 = arith.constant 0 : index
    %c0_10 = arith.constant 0 : index
    %c0_11 = arith.constant 0 : index
    %c0_12 = arith.constant 0 : index
    %11 = vector.load %arg5[%c0_9, %c0_10, %c0_11, %c0_12] : memref<1x1x1x32xf32, #tpu.memory_space<vmem>>, vector<1x1x1x32xf32>
    %12 = vector.shape_cast %11 : vector<1x1x1x32xf32> to vector<1x32xf32>
    %13 = vector.shape_cast %10 : vector<1x32xf32> to vector<1x1x1x32xf32>
    tpu.vector_store %arg5[%c0_9, %c0_10, %c0_11, %c0_12], %13 {strides = array<i32>} : memref<1x1x1x32xf32, #tpu.memory_space<vmem>>, vector<1x1x1x32xf32>,
    %14 = arith.mulf %4, %4 : vector<128x32xf32>
    %cst_13 = arith.constant dense<0.000000e+00> : vector<32xf32>
    %15 = vector.multi_reduction <add>, %14, %cst_13 [0] : vector<128x32xf32> to vector<32xf32>
    %16 = vector.shape_cast %15 : vector<32xf32> to vector<1x32xf32>
    %c0_14 = arith.constant 0 : index
    %c0_15 = arith.constant 0 : index
    %c0_16 = arith.constant 0 : index
    %c0_17 = arith.constant 0 : index
    %17 = vector.load %arg6[%c0_14, %c0_15, %c0_16, %c0_17] : memref<1x1x1x32xf32, #tpu.memory_space<vmem>>, vector<1x1x1x32xf32>
    %18 = vector.shape_cast %17 : vector<1x1x1x32xf32> to vector<1x32xf32>
    %19 = vector.shape_cast %16 : vector<1x32xf32> to vector<1x1x1x32xf32>
    tpu.vector_store %arg6[%c0_14, %c0_15, %c0_16, %c0_17], %19 {strides = array<i32>} : memref<1x1x1x32xf32, #tpu.memory_space<vmem>>, vector<1x1x1x32xf32>,
    return
  }
  func.func @transform_0(%arg0: i32, %arg1: i32) -> (i32, i32, i32) {
    %c0_i32 = arith.constant 0 : i32
    %c0_i32_0 = arith.constant 0 : i32
    return %arg0, %arg1, %c0_i32 : i32, i32, i32
  }
  func.func @transform_1(%arg0: i32, %arg1: i32) -> (i32, i32, i32) {
    %c0_i32 = arith.constant 0 : i32
    %c0_i32_0 = arith.constant 0 : i32
    %c0_i32_1 = arith.constant 0 : i32
    return %arg0, %c0_i32, %c0_i32_0 : i32, i32, i32
  }
  func.func @transform_2(%arg0: i32, %arg1: i32) -> (i32, i32, i32) {
    %c0_i32 = arith.constant 0 : i32
    %c0_i32_0 = arith.constant 0 : i32
    return %arg0, %arg1, %c0_i32 : i32, i32, i32
  }
  func.func @transform_3(%arg0: i32, %arg1: i32) -> (i32, i32, i32, i32) {
    %c0_i32 = arith.constant 0 : i32
    %c0_i32_0 = arith.constant 0 : i32
    %c0_i32_1 = arith.constant 0 : i32
    return %arg0, %arg1, %c0_i32, %c0_i32_0 : i32, i32, i32, i32
  }
  func.func @transform_4(%arg0: i32, %arg1: i32) -> (i32, i32, i32, i32) {
    %c0_i32 = arith.constant 0 : i32
    %c0_i32_0 = arith.constant 0 : i32
    %c0_i32_1 = arith.constant 0 : i32
    return %arg0, %arg1, %c0_i32, %c0_i32_0 : i32, i32, i32, i32
  }
}

module attributes {stable_mosaic.version = 11 : i64} {
  func.func @_deconv_bn_stats_kernel(%arg0: i32, %arg1: i32, %arg2: memref<1x512x128xbf16, #tpu.memory_space<vmem>>, %arg3: memref<1x128x16xbf16, #tpu.memory_space<vmem>>, %arg4: memref<1x512x16xbf16, #tpu.memory_space<vmem>>, %arg5: memref<1x1x1x16xf32, #tpu.memory_space<vmem>>, %arg6: memref<1x1x1x16xf32, #tpu.memory_space<vmem>>) attributes {dimension_semantics = [#tpu.dimension_semantics<parallel>, #tpu.dimension_semantics<parallel>], iteration_bounds = array<i64: 4, 1>, scalar_prefetch = 0 : i64, scratch_operands = 0 : i64, tpu.core_type = #tpu.core_type<tc>, window_params = [{transform_indices = @transform_0, window_bounds = array<i64: 1, 512, 128>}, {transform_indices = @transform_1, window_bounds = array<i64: 1, 128, 16>}, {transform_indices = @transform_2, window_bounds = array<i64: 1, 512, 16>}, {transform_indices = @transform_3, window_bounds = array<i64: 1, 1, 1, 16>}, {transform_indices = @transform_4, window_bounds = array<i64: 1, 1, 1, 16>}]} {
    %c0 = arith.constant 0 : index
    %c0_0 = arith.constant 0 : index
    %c0_1 = arith.constant 0 : index
    %0 = vector.load %arg2[%c0, %c0_0, %c0_1] : memref<1x512x128xbf16, #tpu.memory_space<vmem>>, vector<1x512x128xbf16>
    %1 = vector.shape_cast %0 : vector<1x512x128xbf16> to vector<512x128xbf16>
    %c0_2 = arith.constant 0 : index
    %c0_3 = arith.constant 0 : index
    %c0_4 = arith.constant 0 : index
    %2 = vector.load %arg3[%c0_2, %c0_3, %c0_4] : memref<1x128x16xbf16, #tpu.memory_space<vmem>>, vector<1x128x16xbf16>
    %3 = vector.shape_cast %2 : vector<1x128x16xbf16> to vector<128x16xbf16>
    %cst = arith.constant dense<0.000000e+00> : vector<512x16xf32>
    %4 = tpu.matmul %1, %3, %cst {dimension_numbers = #tpu.dot_dimension_numbers<[1], [0], [0], [1], [0, 0, 1, 1], [], []>} : vector<512x128xbf16>, vector<128x16xbf16>, vector<512x16xf32> -> vector<512x16xf32>
    %5 = arith.truncf %4 : vector<512x16xf32> to vector<512x16xbf16>
    %c0_5 = arith.constant 0 : index
    %c0_6 = arith.constant 0 : index
    %c0_7 = arith.constant 0 : index
    %6 = vector.load %arg4[%c0_5, %c0_6, %c0_7] : memref<1x512x16xbf16, #tpu.memory_space<vmem>>, vector<1x512x16xbf16>
    %7 = vector.shape_cast %6 : vector<1x512x16xbf16> to vector<512x16xbf16>
    %8 = vector.shape_cast %5 : vector<512x16xbf16> to vector<1x512x16xbf16>
    tpu.vector_store %arg4[%c0_5, %c0_6, %c0_7], %8 {strides = array<i32>} : memref<1x512x16xbf16, #tpu.memory_space<vmem>>, vector<1x512x16xbf16>,
    %cst_8 = arith.constant dense<0.000000e+00> : vector<16xf32>
    %9 = vector.multi_reduction <add>, %4, %cst_8 [0] : vector<512x16xf32> to vector<16xf32>
    %10 = vector.shape_cast %9 : vector<16xf32> to vector<1x16xf32>
    %c0_9 = arith.constant 0 : index
    %c0_10 = arith.constant 0 : index
    %c0_11 = arith.constant 0 : index
    %c0_12 = arith.constant 0 : index
    %11 = vector.load %arg5[%c0_9, %c0_10, %c0_11, %c0_12] : memref<1x1x1x16xf32, #tpu.memory_space<vmem>>, vector<1x1x1x16xf32>
    %12 = vector.shape_cast %11 : vector<1x1x1x16xf32> to vector<1x16xf32>
    %13 = vector.shape_cast %10 : vector<1x16xf32> to vector<1x1x1x16xf32>
    tpu.vector_store %arg5[%c0_9, %c0_10, %c0_11, %c0_12], %13 {strides = array<i32>} : memref<1x1x1x16xf32, #tpu.memory_space<vmem>>, vector<1x1x1x16xf32>,
    %14 = arith.mulf %4, %4 : vector<512x16xf32>
    %cst_13 = arith.constant dense<0.000000e+00> : vector<16xf32>
    %15 = vector.multi_reduction <add>, %14, %cst_13 [0] : vector<512x16xf32> to vector<16xf32>
    %16 = vector.shape_cast %15 : vector<16xf32> to vector<1x16xf32>
    %c0_14 = arith.constant 0 : index
    %c0_15 = arith.constant 0 : index
    %c0_16 = arith.constant 0 : index
    %c0_17 = arith.constant 0 : index
    %17 = vector.load %arg6[%c0_14, %c0_15, %c0_16, %c0_17] : memref<1x1x1x16xf32, #tpu.memory_space<vmem>>, vector<1x1x1x16xf32>
    %18 = vector.shape_cast %17 : vector<1x1x1x16xf32> to vector<1x16xf32>
    %19 = vector.shape_cast %16 : vector<1x16xf32> to vector<1x1x1x16xf32>
    tpu.vector_store %arg6[%c0_14, %c0_15, %c0_16, %c0_17], %19 {strides = array<i32>} : memref<1x1x1x16xf32, #tpu.memory_space<vmem>>, vector<1x1x1x16xf32>,
    return
  }
  func.func @transform_0(%arg0: i32, %arg1: i32) -> (i32, i32, i32) {
    %c0_i32 = arith.constant 0 : i32
    %c0_i32_0 = arith.constant 0 : i32
    return %arg0, %arg1, %c0_i32 : i32, i32, i32
  }
  func.func @transform_1(%arg0: i32, %arg1: i32) -> (i32, i32, i32) {
    %c0_i32 = arith.constant 0 : i32
    %c0_i32_0 = arith.constant 0 : i32
    %c0_i32_1 = arith.constant 0 : i32
    return %arg0, %c0_i32, %c0_i32_0 : i32, i32, i32
  }
  func.func @transform_2(%arg0: i32, %arg1: i32) -> (i32, i32, i32) {
    %c0_i32 = arith.constant 0 : i32
    %c0_i32_0 = arith.constant 0 : i32
    return %arg0, %arg1, %c0_i32 : i32, i32, i32
  }
  func.func @transform_3(%arg0: i32, %arg1: i32) -> (i32, i32, i32, i32) {
    %c0_i32 = arith.constant 0 : i32
    %c0_i32_0 = arith.constant 0 : i32
    %c0_i32_1 = arith.constant 0 : i32
    return %arg0, %arg1, %c0_i32, %c0_i32_0 : i32, i32, i32, i32
  }
  func.func @transform_4(%arg0: i32, %arg1: i32) -> (i32, i32, i32, i32) {
    %c0_i32 = arith.constant 0 : i32
    %c0_i32_0 = arith.constant 0 : i32
    %c0_i32_1 = arith.constant 0 : i32
    return %arg0, %arg1, %c0_i32, %c0_i32_0 : i32, i32, i32, i32
  }
}

module attributes {stable_mosaic.version = 11 : i64} {
  func.func @_deconv_tanh_kernel(%arg0: i32, %arg1: i32, %arg2: memref<1x2048x64xbf16, #tpu.memory_space<vmem>>, %arg3: memref<1x64x3xbf16, #tpu.memory_space<vmem>>, %arg4: memref<1x2048x3xf32, #tpu.memory_space<vmem>>) attributes {dimension_semantics = [#tpu.dimension_semantics<parallel>, #tpu.dimension_semantics<parallel>], iteration_bounds = array<i64: 4, 1>, scalar_prefetch = 0 : i64, scratch_operands = 0 : i64, tpu.core_type = #tpu.core_type<tc>, window_params = [{transform_indices = @transform_0, window_bounds = array<i64: 1, 2048, 64>}, {transform_indices = @transform_1, window_bounds = array<i64: 1, 64, 3>}, {transform_indices = @transform_2, window_bounds = array<i64: 1, 2048, 3>}]} {
    %c0 = arith.constant 0 : index
    %c0_0 = arith.constant 0 : index
    %c0_1 = arith.constant 0 : index
    %0 = vector.load %arg2[%c0, %c0_0, %c0_1] : memref<1x2048x64xbf16, #tpu.memory_space<vmem>>, vector<1x2048x64xbf16>
    %1 = vector.shape_cast %0 : vector<1x2048x64xbf16> to vector<2048x64xbf16>
    %c0_2 = arith.constant 0 : index
    %c0_3 = arith.constant 0 : index
    %c0_4 = arith.constant 0 : index
    %2 = vector.load %arg3[%c0_2, %c0_3, %c0_4] : memref<1x64x3xbf16, #tpu.memory_space<vmem>>, vector<1x64x3xbf16>
    %3 = vector.shape_cast %2 : vector<1x64x3xbf16> to vector<64x3xbf16>
    %cst = arith.constant dense<0.000000e+00> : vector<2048x3xf32>
    %4 = tpu.matmul %1, %3, %cst {dimension_numbers = #tpu.dot_dimension_numbers<[1], [0], [0], [1], [0, 0, 1, 1], [], []>} : vector<2048x64xbf16>, vector<64x3xbf16>, vector<2048x3xf32> -> vector<2048x3xf32>
    %5 = math.tanh %4 : vector<2048x3xf32>
    %c0_5 = arith.constant 0 : index
    %c0_6 = arith.constant 0 : index
    %c0_7 = arith.constant 0 : index
    %6 = vector.load %arg4[%c0_5, %c0_6, %c0_7] : memref<1x2048x3xf32, #tpu.memory_space<vmem>>, vector<1x2048x3xf32>
    %7 = vector.shape_cast %6 : vector<1x2048x3xf32> to vector<2048x3xf32>
    %8 = vector.shape_cast %5 : vector<2048x3xf32> to vector<1x2048x3xf32>
    tpu.vector_store %arg4[%c0_5, %c0_6, %c0_7], %8 {strides = array<i32>} : memref<1x2048x3xf32, #tpu.memory_space<vmem>>, vector<1x2048x3xf32>,
    return
  }
  func.func @transform_0(%arg0: i32, %arg1: i32) -> (i32, i32, i32) {
    %c0_i32 = arith.constant 0 : i32
    %c0_i32_0 = arith.constant 0 : i32
    return %arg0, %arg1, %c0_i32 : i32, i32, i32
  }
  func.func @transform_1(%arg0: i32, %arg1: i32) -> (i32, i32, i32) {
    %c0_i32 = arith.constant 0 : i32
    %c0_i32_0 = arith.constant 0 : i32
    %c0_i32_1 = arith.constant 0 : i32
    return %arg0, %c0_i32, %c0_i32_0 : i32, i32, i32
  }
  func.func @transform_2(%arg0: i32, %arg1: i32) -> (i32, i32, i32) {
    %c0_i32 = arith.constant 0 : i32
    %c0_i32_0 = arith.constant 0 : i32
    return %arg0, %arg1, %c0_i32 : i32, i32, i32
  }
}

</mosaic_0001>

<bundles_post_ra>
// kernel: generator_forward.5
= control target key start
LH: loop header
LB: loop body
LE: loop exit
PB: predicated region body
PF: predicated region fallthrough
CT: control target
= control target key end

     0   :  { %vm208_vm0 = vcmask 261120   ;;  %vm564_vm1 = vcmask 1042434   ;;  %vm562_vm2 = vcmask 1040384   ;;  %vm568_vm3 = vcmask 1044484   ;;  %s1284_s1 = inlined_call_operand.vmem [shape: bf16[1,32,2048], index: 1, kind: input, shape index: {}]   ;;  %s1285_s0 = inlined_call_operand.vmem [shape: bf16[1,8,32], index: 0, kind: input, shape index: {}]   ;;  %s1286_s2 = inlined_call_operand.vmem [shape: bf16[1,8,2048], index: 2, kind: output, shape index: {0}]   ;;  %s1287_s3 = inlined_call_operand.vmem [shape: f32[1,1,1,2048], index: 3, kind: output, shape index: {1}]   ;;  %s1288_s4 = inlined_call_operand.vmem [shape: f32[1,1,1,2048], index: 4, kind: output, shape index: {2}]  }
   0x1   :  { %v825_v0 = vld [vmem:[%s1284_s1 + $0x80] sm:$0xf]  ;;  %v919_v2 = vld [vmem:[%s1284_s1 + $0x84] sm:$0xf]  ;;  %v833_v5 = vld [vmem:[%s1284_s1 + $0x88] sm:$0xf] }
   0x2   :  { %v927_v1 = vld [vmem:[%s1284_s1 + $0xbc] sm:$0xf0]  ;;  %v827_v4 = vld [vmem:[%s1284_s1 + $0xc0] sm:$0xf0]  ;;  %v928_v6 = vld [vmem:[%s1284_s1 + $0xc4] sm:$0xf0] }
   0x3   :  { %v826_v3 = vor.u32 %v927_v1, %v825_v0  ;;  %v830_v7 = vor.u32 %v919_v2, %v827_v4  ;;  %v834_v8 = vor.u32 %v928_v6, %v833_v5  ;;  %v920_v9 = vld [vmem:[%s1284_s1 + $0x8c] sm:$0xf]  ;;  %v761_v11 = vld [vmem:[%s1284_s1] sm:$0xf]  ;;  %v903_v14 = vld [vmem:[%s1284_s1 + $0x4] sm:$0xf] }
   0x4   :  { %v835_v10 = vld [vmem:[%s1284_s1 + $0xc8] sm:$0xf0]  ;;  %v911_v13 = vld [vmem:[%s1284_s1 + $0x3c] sm:$0xf0]  ;;  %v763_v15 = vld [vmem:[%s1284_s1 + $0x40] sm:$0xf0] }
   0x5   :  { %218 = vmatpush.bf16.msra.mxu0 %v826_v3  ;;  %v838_v12 = vor.u32 %v920_v9, %v835_v10  ;;  %231 = vmatpush.bf16.msra.mxu1 %v830_v7  ;;  %v762_v16 = vor.u32 %v911_v13, %v761_v11  ;;  %v766_v17 = vor.u32 %v903_v14, %v763_v15  ;;  %v769_v18 = vld [vmem:[%s1284_s1 + $0x8] sm:$0xf]  ;;  %v904_v20 = vld [vmem:[%s1284_s1 + $0xc] sm:$0xf]  ;;  %v1011_v23 = vld [vmem:[%s1285_s0] sm:$0xf] }
   0x6   :  { %244 = vmatpush.bf16.msra.mxu2 %v834_v8  ;;  %v912_v19 = vld [vmem:[%s1284_s1 + $0x44] sm:$0xf0]  ;;  %v771_v22 = vld [vmem:[%s1284_s1 + $0x48] sm:$0xf0]  ;;  %v849_v24 = vld [vmem:[%s1284_s1 + $0x98] sm:$0xf] }
   0x7   :  { %257 = vmatpush.bf16.msra.mxu3 %v838_v12  ;;  %v770_v21 = vor.u32 %v912_v19, %v769_v18  ;;  %v774_v25 = vor.u32 %v904_v20, %v771_v22  ;;  %v930_v26 = vld [vmem:[%s1284_s1 + $0xd4] sm:$0xf0]  ;;  %v922_v27 = vld [vmem:[%s1284_s1 + $0x9c] sm:$0xf]  ;;  %v841_v31 = vld [vmem:[%s1284_s1 + $0x90] sm:$0xf] }
   0x8   :  { %v851_v28 = vld [vmem:[%s1284_s1 + $0xd8] sm:$0xf0]  ;;  %v850_v29 = vor.u32 %v930_v26, %v849_v24  ;;  %v929_v32 = vld [vmem:[%s1284_s1 + $0xcc] sm:$0xf0]  ;;  %v921_v33 = vld [vmem:[%s1284_s1 + $0x94] sm:$0xf] }
   0x9   :  { %219 = vmatpush.bf16.msra.mxu0 %v762_v16  ;;  %v854_v30 = vor.u32 %v922_v27, %v851_v28  ;;  %232 = vmatpush.bf16.msra.mxu1 %v766_v17  ;;  %v842_v34 = vor.u32 %v929_v32, %v841_v31  ;;  %v843_v35 = vld [vmem:[%s1284_s1 + $0xd0] sm:$0xf0]  ;;  %v785_v36 = vld [vmem:[%s1284_s1 + $0x18] sm:$0xf]  ;;  %v906_v40 = vld [vmem:[%s1284_s1 + $0x1c] sm:$0xf] }
   0xa   :  { %245 = vmatpush.bf16.msra.mxu2 %v770_v21  ;;  %v914_v37 = vld [vmem:[%s1284_s1 + $0x54] sm:$0xf0]  ;;  %v846_v38 = vor.u32 %v921_v33, %v843_v35  ;;  %v787_v41 = vld [vmem:[%s1284_s1 + $0x58] sm:$0xf0]  ;;  %v777_v42 = vld [vmem:[%s1284_s1 + $0x10] sm:$0xf] }
   0xb   :  { %258 = vmatpush.bf16.msra.mxu3 %v774_v25  ;;  %v786_v39 = vor.u32 %v914_v37, %v785_v36  ;;  %v790_v43 = vor.u32 %v906_v40, %v787_v41  ;;  %v913_v44 = vld [vmem:[%s1284_s1 + $0x4c] sm:$0xf0]  ;;  %v905_v45 = vld [vmem:[%s1284_s1 + $0x14] sm:$0xf]  ;;  %v865_v47 = vld [vmem:[%s1284_s1 + $0xa8] sm:$0xf] }
   0xc   :  { %887 = vmatmul.msk.bf16.vlgmr.msra.gmra.mxu0 %vm208_vm0, %v1011_v23  ;;  %v779_v46 = vld [vmem:[%s1284_s1 + $0x50] sm:$0xf0]  ;;  %888 = vmatmul.msk.bf16.vlgmr.msra.gmra.mxu1 %vm208_vm0, %v1011_v23  ;;  %v932_v48 = vld [vmem:[%s1284_s1 + $0xe4] sm:$0xf0]  ;;  %v924_v49 = vld [vmem:[%s1284_s1 + $0xac] sm:$0xf]  ;;  %v778_v50 = vor.u32 %v913_v44, %v777_v42 }
   0xd   :  { %889 = vmatmul.msk.bf16.vlgmr.msra.gmra.mxu2 %vm208_vm0, %v1011_v23  ;;  %270 = vmatpush.bf16.msrb.mxu0 %v842_v34  ;;  %v866_v51 = vor.u32 %v932_v48, %v865_v47  ;;  %v867_v52 = vld [vmem:[%s1284_s1 + $0xe8] sm:$0xf0]  ;;  %v857_v53 = vld [vmem:[%s1284_s1 + $0xa0] sm:$0xf]  ;;  %v782_v55 = vor.u32 %v905_v45, %v779_v46  ;;  %v923_v58 = vld [vmem:[%s1284_s1 + $0xa4] sm:$0xf] }
   0xe   :  { %296 = vmatpush.bf16.msrb.mxu2 %v850_v29  ;;  %890 = vmatmul.msk.bf16.vlgmr.msra.gmra.mxu3 %vm208_vm0, %v1011_v23  ;;  %v931_v54 = vld [vmem:[%s1284_s1 + $0xdc] sm:$0xf0]  ;;  %v870_v56 = vor.u32 %v924_v49, %v867_v52  ;;  %v859_v59 = vld [vmem:[%s1284_s1 + $0xe0] sm:$0xf0]  ;;  %v801_v60 = vld [vmem:[%s1284_s1 + $0x28] sm:$0xf] }
   0xf   :  { %309 = vmatpush.bf16.msrb.mxu3 %v854_v30  ;;  %283 = vmatpush.bf16.msrb.mxu1 %v846_v38  ;;  %v858_v57 = vor.u32 %v931_v54, %v857_v53  ;;  %v862_v61 = vor.u32 %v923_v58, %v859_v59  ;;  %v916_v62 = vld [vmem:[%s1284_s1 + $0x64] sm:$0xf0]  ;;  %v908_v63 = vld [vmem:[%s1284_s1 + $0x2c] sm:$0xf]  ;;  %v793_v3 = vld [vmem:[%s1284_s1 + $0x20] sm:$0xf] }
  0x10   :  { %v803_v0 = vld [vmem:[%s1284_s1 + $0x68] sm:$0xf0]  ;;  %v802_v1 = vor.u32 %v916_v62, %v801_v60  ;;  %v915_v4 = vld [vmem:[%s1284_s1 + $0x5c] sm:$0xf0]  ;;  %v907_v5 = vld [vmem:[%s1284_s1 + $0x24] sm:$0xf] }
  0x11   :  { %v806_v2 = vor.u32 %v908_v63, %v803_v0  ;;  %271 = vmatpush.bf16.msrb.mxu0 %v778_v50  ;;  %v795_v6 = vld [vmem:[%s1284_s1 + $0x60] sm:$0xf0]  ;;  %v794_v7 = vor.u32 %v915_v4, %v793_v3  ;;  %v881_v9 = vld [vmem:[%s1284_s1 + $0xb8] sm:$0xf]  ;;  %v926_v11 = vld [vmem:[%s1284_s1 + $0xbc] sm:$0xf] }
  0x12   :  { %297 = vmatpush.bf16.msrb.mxu2 %v786_v39  ;;  %v798_v8 = vor.u32 %v907_v5, %v795_v6  ;;  %v934_v10 = vld [vmem:[%s1284_s1 + $0xf4] sm:$0xf0]  ;;  %v883_v12 = vld [vmem:[%s1284_s1 + $0xf8] sm:$0xf0]  ;;  %v873_v13 = vld [vmem:[%s1284_s1 + $0xb0] sm:$0xf] }
  0x13   :  { %310 = vmatpush.bf16.msrb.mxu3 %v790_v43  ;;  %284 = vmatpush.bf16.msrb.mxu1 %v782_v55  ;;  %v933_v14 = vld [vmem:[%s1284_s1 + $0xec] sm:$0xf0]  ;;  %v925_v15 = vld [vmem:[%s1284_s1 + $0xb4] sm:$0xf]  ;;  %v882_v17 = vor.u32 %v934_v10, %v881_v9  ;;  %v886_v18 = vor.u32 %v926_v11, %v883_v12  ;;  %v817_v20 = vld [vmem:[%s1284_s1 + $0x38] sm:$0xf] }
  0x14   :  { %v875_v16 = vld [vmem:[%s1284_s1 + $0xf0] sm:$0xf0]  ;;  %v874_v19 = vor.u32 %v933_v14, %v873_v13  ;;  %v918_v21 = vld [vmem:[%s1284_s1 + $0x74] sm:$0xf0]  ;;  %v910_v22 = vld [vmem:[%s1284_s1 + $0x3c] sm:$0xf] }
  0x15   :  { %322 = vmatpush.bf16.msra.mxu0 %v858_v57  ;;  %v878_v24 = vor.u32 %v925_v15, %v875_v16  ;;  %v819_v25 = vld [vmem:[%s1284_s1 + $0x78] sm:$0xf0]  ;;  %v809_v26 = vld [vmem:[%s1284_s1 + $0x30] sm:$0xf]  ;;  %v909_v28 = vld [vmem:[%s1284_s1 + $0x34] sm:$0xf]  ;;  %v818_v30 = vor.u32 %v918_v21, %v817_v20 }
  0x16   :  { %348 = vmatpush.bf16.msra.mxu2 %v866_v51  ;;  %v917_v27 = vld [vmem:[%s1284_s1 + $0x6c] sm:$0xf0]  ;;  %v811_v29 = vld [vmem:[%s1284_s1 + $0x70] sm:$0xf0]  ;;  %v822_v31 = vor.u32 %v910_v22, %v819_v25  ;;  %vm570_vm4 = vcmask 1046534   ;;  %vm566_vm5 = vcmask 1041408  }
  0x17   :  { %361 = vmatpush.bf16.msra.mxu3 %v870_v56  ;;  %335 = vmatpush.bf16.msra.mxu1 %v862_v61  ;;  %v810_v32 = vor.u32 %v917_v27, %v809_v26  ;;  %v814_v33 = vor.u32 %v909_v28, %v811_v29  ;;  %vm572_vm6 = vcmask 1045508   ;;  %vm574_vm7 = vcmask 1043456  }
  0x19   :  { %323 = vmatpush.bf16.msra.mxu0 %v794_v7 }
  0x1a   :  { %349 = vmatpush.bf16.msra.mxu2 %v802_v1 }
  0x1b   :  { %362 = vmatpush.bf16.msra.mxu3 %v806_v2  ;;  %336 = vmatpush.bf16.msra.mxu1 %v798_v8 }
  0x1c   :  { %891 = vmatmul.msk.bf16.vlgmr.msrb.gmra.mxu0 %vm208_vm0, %v1011_v23  ;;  %892 = vmatmul.msk.bf16.vlgmr.msrb.gmra.mxu1 %vm208_vm0, %v1011_v23 }
  0x1d   :  { %893 = vmatmul.msk.bf16.vlgmr.msrb.gmra.mxu2 %vm208_vm0, %v1011_v23  ;;  %374 = vmatpush.bf16.msrb.mxu0 %v874_v19 }
  0x1e   :  { %894 = vmatmul.msk.bf16.vlgmr.msrb.gmra.mxu3 %vm208_vm0, %v1011_v23  ;;  %400 = vmatpush.bf16.msrb.mxu2 %v882_v17 }
  0x1f   :  { %413 = vmatpush.bf16.msrb.mxu3 %v886_v18  ;;  %387 = vmatpush.bf16.msrb.mxu1 %v878_v24 }
  0x21   :  { %375 = vmatpush.bf16.msrb.mxu0 %v810_v32 }
  0x22   :  { %401 = vmatpush.bf16.msrb.mxu2 %v818_v30 }
  0x23   :  { %414 = vmatpush.bf16.msrb.mxu3 %v822_v31  ;;  %388 = vmatpush.bf16.msrb.mxu1 %v814_v33 }
  0x2c   :  { %895 = vmatmul.msk.bf16.vlgmr.msra.gmra.mxu0 %vm208_vm0, %v1011_v23  ;;  %896 = vmatmul.msk.bf16.vlgmr.msra.gmra.mxu1 %vm208_vm0, %v1011_v23 }
  0x2d   :  { %897 = vmatmul.msk.bf16.vlgmr.msra.gmra.mxu2 %vm208_vm0, %v1011_v23 }
  0x2e   :  { %898 = vmatmul.msk.bf16.vlgmr.msra.gmra.mxu3 %vm208_vm0, %v1011_v23 }
  0x3c   :  { %899 = vmatmul.msk.bf16.vlgmr.msrb.gmra.mxu0 %vm208_vm0, %v1011_v23  ;;  %900 = vmatmul.msk.bf16.vlgmr.msrb.gmra.mxu1 %vm208_vm0, %v1011_v23 }
  0x3d   :  { %901 = vmatmul.msk.bf16.vlgmr.msrb.gmra.mxu2 %vm208_vm0, %v1011_v23 }
  0x3e   :  { %902 = vmatmul.msk.bf16.vlgmr.msrb.gmra.mxu3 %vm208_vm0, %v1011_v23 }
  0x89   :  { %v221_v34 = vpop.f32.mrf.mxu0  ;;  %v234_v35 = vpop.f32.mrf.mxu1 }
  0x8a   :  { %v436_v36 = vrot.slane %v221_v34, 4  ;;  %v587_v37 = vmul.f32 %v221_v34, %v221_v34  ;;  %v420_v38 = vpack.c.bf16 %v234_v35, %v221_v34  ;;  %v442_v39 = vrot.slane %v234_v35, 4 }
  0x8b   :  { %v588_v40 = vmul.f32 %v234_v35, %v234_v35 }
  0x8c   :  { %428 = vst [vmem:[%s1286_s2] sm:$0xff] %v420_v38  ;;  %v437_v41 = vadd.f32 %v436_v36, %v221_v34  ;;  %v603_v42 = vrot.slane %v587_v37, 4  ;;  %v443_v43 = vadd.f32 %v442_v39, %v234_v35 }
  0x8d   :  { %v609_v48 = vrot.slane %v588_v40, 4 }
  0x8e   :  { %v438_v50 = vrot.slane %v437_v41, 2  ;;  %v604_v51 = vadd.f32 %v603_v42, %v587_v37  ;;  %v444_v52 = vrot.slane %v443_v43, 2 }
  0x8f   :  { %v610_v57 = vadd.f32 %v609_v48, %v588_v40 }
  0x90   :  { %v247_v44 = vpop.f32.mrf.mxu2  ;;  %v439_v59 = vadd.f32 %v438_v50, %v437_v41  ;;  %v605_v60 = vrot.slane %v604_v51, 2  ;;  %v445_v61 = vadd.f32 %v444_v52, %v443_v43 }
  0x91   :  { %v589_v45 = vmul.f32 %v247_v44, %v247_v44  ;;  %v260_v46 = vpop.f32.mrf.mxu3  ;;  %v223_v47 = vpop.f32.mrf.mxu0  ;;  %v448_v53 = vrot.slane %v247_v44, 4  ;;  %v611_v4 = vrot.slane %v610_v57, 2 }
  0x92   :  { %v421_v23 = vpack.c.bf16 %v260_v46, %v247_v44  ;;  %v236_v49 = vpop.f32.mrf.mxu1  ;;  %v454_v54 = vrot.slane %v260_v46, 4  ;;  %v590_v55 = vmul.f32 %v260_v46, %v260_v46  ;;  %v440_v9 = vrot.slane %v439_v59, 1 }
  0x93   :  { %v615_v56 = vrot.slane %v589_v45, 4  ;;  %v449_v62 = vadd.f32 %v448_v53, %v247_v44  ;;  %v606_v10 = vadd.f32 %v605_v60, %v604_v51  ;;  %v446_v11 = vrot.slane %v445_v61, 1 }
  0x94   :  { %429 = vst [vmem:[%s1286_s2 + $0x8] sm:$0xff] %v421_v23  ;;  %v621_v58 = vrot.slane %v590_v55, 4  ;;  %v455_v63 = vadd.f32 %v454_v54, %v260_v46  ;;  %v612_v20 = vadd.f32 %v611_v4, %v610_v57  ;;  %v1198_v24 = vadd.f32 %v440_v9, %v439_v59 }
  0x95   :  { %v616_v1 = vadd.f32 %v615_v56, %v589_v45  ;;  %v450_v13 = vrot.slane %v449_v62, 2  ;;  %v607_v28 = vrot.slane %v606_v10, 1  ;;  %v1200_v29 = vadd.f32 %v446_v11, %v445_v61 }
  0x96   :  { %v622_v5 = vadd.f32 %v621_v58, %v590_v55  ;;  %v456_v14 = vrot.slane %v455_v63, 2  ;;  %v613_v39 = vrot.slane %v612_v20, 1 }
  0x97   :  { %v617_v17 = vrot.slane %v616_v1, 2  ;;  %v451_v30 = vadd.f32 %v450_v13, %v449_v62  ;;  %v1202_v48 = vadd.f32 %v607_v28, %v606_v10  ;;  %v548_v23 = vrot.slane %v1200_v29, 7 }
  0x98   :  { %v249_v0 = vpop.f32.mrf.mxu2  ;;  %v623_v21 = vrot.slane %v622_v5, 2  ;;  %v457_v31 = vadd.f32 %v456_v14, %v455_v63  ;;  %v1208_v63 = vadd.f32 %v613_v39, %v612_v20 }
  0x99   :  { %v262_v2 = vpop.f32.mrf.mxu3  ;;  %v273_v3 = vpop.f32.mrf.mxu0  ;;  %v618_v33 = vadd.f32 %v617_v17, %v616_v1  ;;  %v452_v51 = vrot.slane %v451_v30, 1 }
  0x9a   :  { %v460_v6 = vrot.slane %v273_v3, 4  ;;  %v591_v7 = vmul.f32 %v273_v3, %v273_v3  ;;  %v286_v8 = vpop.f32.mrf.mxu1  ;;  %v624_v40 = vadd.f32 %v623_v21, %v622_v5  ;;  %v458_v53 = vrot.slane %v457_v31, 1 }
  0x9b   :  { %v422_v12 = vpack.c.bf16 %v286_v8, %v273_v3  ;;  %v466_v18 = vrot.slane %v286_v8, 4  ;;  %v592_v19 = vmul.f32 %v286_v8, %v286_v8  ;;  %v619_v52 = vrot.slane %v618_v33, 1 }
  0x9c   :  { %v461_v15 = vadd.f32 %v460_v6, %v273_v3  ;;  %v627_v16 = vrot.slane %v591_v7, 4  ;;  %v625_v59 = vrot.slane %v624_v40, 1  ;;  %v453_v4 = vadd.f32 %v452_v51, %v451_v30 }
  0x9d   :  { %430 = vst [vmem:[%s1286_s2 + $0x10] sm:$0xff] %v422_v12  ;;  %v467_v26 = vadd.f32 %v466_v18, %v286_v8  ;;  %v633_v27 = vrot.slane %v592_v19, 4  ;;  %v459_v5 = vadd.f32 %v458_v53, %v457_v31  ;;  %v563_v53 = vsel %vm562_vm2, %v1198_v24, %v548_v23 }
  0x9e   :  { %v628_v22 = vadd.f32 %v627_v16, %v591_v7  ;;  %v462_v25 = vrot.slane %v461_v15, 2  ;;  %v626_v16 = vadd.f32 %v625_v59, %v624_v40 }
  0x9f   :  { %v468_v34 = vrot.slane %v467_v26, 2  ;;  %v634_v35 = vadd.f32 %v633_v27, %v592_v19 }
  0xa0   :  { %v299_v32 = vpop.f32.mrf.mxu2  ;;  %v629_v41 = vrot.slane %v628_v22, 2  ;;  %v463_v44 = vadd.f32 %v462_v25, %v461_v15  ;;  %v620_v15 = vadd.f32 %v619_v52, %v618_v33  ;;  %v549_v25 = vrot.slane %v453_v4, 6 }
  0xa1   :  { %v472_v36 = vrot.slane %v299_v32, 4  ;;  %v312_v37 = vpop.f32.mrf.mxu3  ;;  %v275_v38 = vpop.f32.mrf.mxu0  ;;  %v593_v42 = vmul.f32 %v299_v32, %v299_v32  ;;  %v635_v45 = vrot.slane %v634_v35, 2  ;;  %v469_v49 = vadd.f32 %v468_v34, %v467_v26 }
  0xa2   :  { %v288_v43 = vpop.f32.mrf.mxu1  ;;  %v423_v47 = vpack.c.bf16 %v312_v37, %v299_v32  ;;  %v630_v55 = vadd.f32 %v629_v41, %v628_v22  ;;  %v478_v58 = vrot.slane %v312_v37, 4  ;;  %v464_v60 = vrot.slane %v463_v44, 1 }
  0xa3   :  { %v473_v46 = vadd.f32 %v472_v36, %v299_v32  ;;  %v639_v50 = vrot.slane %v593_v42, 4  ;;  %v636_v56 = vadd.f32 %v635_v45, %v634_v35  ;;  %v594_v62 = vmul.f32 %v312_v37, %v312_v37 }
  0xa4   :  { %431 = vst [vmem:[%s1286_s2 + $0x18] sm:$0xff] %v423_v47  ;;  %v470_v0 = vrot.slane %v469_v49, 1  ;;  %v479_v2 = vadd.f32 %v478_v58, %v312_v37  ;;  %v631_v10 = vrot.slane %v630_v55, 1  ;;  %v465_v17 = vadd.f32 %v464_v60, %v463_v44 }
  0xa5   :  { %v474_v54 = vrot.slane %v473_v46, 2  ;;  %v640_v57 = vadd.f32 %v639_v50, %v593_v42  ;;  %v645_v7 = vrot.slane %v594_v62, 4  ;;  %v637_v11 = vrot.slane %v636_v56, 1 }
  0xa6   :  { %v480_v13 = vrot.slane %v479_v2, 2  ;;  %v471_v19 = vadd.f32 %v470_v0, %v469_v49  ;;  %v550_v26 = vrot.slane %v459_v5, 5  ;;  %v632_v30 = vadd.f32 %v631_v10, %v630_v55 }
  0xa7   :  { %v475_v61 = vadd.f32 %v474_v54, %v473_v46  ;;  %v641_v1 = vrot.slane %v640_v57, 2  ;;  %v646_v18 = vadd.f32 %v645_v7, %v594_v62  ;;  %v638_v31 = vadd.f32 %v637_v11, %v636_v56 }
  0xa8   :  { %v301_v3 = vpop.f32.mrf.mxu2  ;;  %v481_v22 = vadd.f32 %v480_v13, %v479_v2  ;;  %v716_v34 = vrot.slane %v620_v15, 6  ;;  %v717_v35 = vrot.slane %v626_v16, 5  ;;  %v551_v37 = vrot.slane %v465_v17, 4 }
  0xa9   :  { %v476_v6 = vrot.slane %v475_v61, 1  ;;  %v314_v8 = vpop.f32.mrf.mxu3  ;;  %v325_v9 = vpop.f32.mrf.mxu0  ;;  %v642_v12 = vadd.f32 %v641_v1, %v640_v57  ;;  %v647_v27 = vrot.slane %v646_v18, 2  ;;  %v552_v38 = vrot.slane %v471_v19, 3 }
  0xaa   :  { %v1210_v14 = vpop.f32.mrf.mxu1  ;;  %v482_v32 = vrot.slane %v481_v22, 1  ;;  %v715_v42 = vrot.slane %v1208_v63, 7  ;;  %v565_v43 = vsel %vm564_vm1, %v549_v25, %v550_v26  ;;  %v718_v47 = vrot.slane %v632_v30, 4 }
  0xab   :  { %v477_v20 = vadd.f32 %v476_v6, %v475_v61  ;;  %v643_v21 = vrot.slane %v642_v12, 1  ;;  %v424_v28 = vpack.c.bf16 %v1210_v14, %v325_v9  ;;  %v648_v33 = vadd.f32 %v647_v27, %v646_v18 }
  0xac   :  { %v483_v40 = vadd.f32 %v482_v32, %v481_v22  ;;  %v719_v49 = vrot.slane %v638_v31, 3  ;;  %v484_v51 = vrot.slane %v325_v9, 4  ;;  %v730_v54 = vsel %vm564_vm1, %v716_v34, %v717_v35 }
  0xad   :  { %v644_v36 = vadd.f32 %v643_v21, %v642_v12  ;;  %432 = vst [vmem:[%s1286_s2 + $0x20] sm:$0xff] %v424_v28  ;;  %v553_v39 = vrot.slane %v477_v20, 2  ;;  %v649_v44 = vrot.slane %v648_v33, 1  ;;  %v569_v57 = vsel %vm568_vm3, %v551_v37, %v552_v38 }
  0xae   :  { %v554_v50 = vrot.slane %v483_v40, 1  ;;  %v595_v59 = vmul.f32 %v325_v9, %v325_v9  ;;  %v490_v60 = vrot.slane %v1210_v14, 4  ;;  %v729_v61 = vsel %vm562_vm2, %v1202_v48, %v715_v42 }
  0xaf   :  { %v720_v55 = vrot.slane %v644_v36, 2  ;;  %v650_v56 = vadd.f32 %v649_v44, %v648_v33  ;;  %v567_v62 = vsel %vm566_vm5, %v563_v53, %v565_v43  ;;  %v731_v24 = vsel %vm566_vm5, %v729_v61, %v730_v54 }
  0xb0   :  { %v351_v41 = vpop.f32.mrf.mxu2  ;;  %v571_v58 = vsel %vm570_vm4, %v553_v39, %v554_v50  ;;  %v732_v23 = vsel %vm568_vm3, %v718_v47, %v719_v49  ;;  %v485_v1 = vadd.f32 %v484_v51, %v325_v9  ;;  %v596_v48 = vmul.f32 %v1210_v14, %v1210_v14 }
  0xb1   :  { %v364_v45 = vpop.f32.mrf.mxu3  ;;  %v327_v46 = vpop.f32.mrf.mxu0  ;;  %v573_v29 = vsel %vm572_vm6, %v569_v57, %v571_v58  ;;  %v721_v63 = vrot.slane %v650_v56, 1  ;;  %v496_v3 = vrot.slane %v351_v41, 4  ;;  %v651_v6 = vrot.slane %v595_v59, 4 }
  0xb2   :  { %v340_v52 = vpop.f32.mrf.mxu1  ;;  %v575_v0 = vsel %vm574_vm7, %v567_v62, %v573_v29  ;;  %v425_v4 = vpack.c.bf16 %v364_v45, %v351_v41  ;;  %v491_v7 = vadd.f32 %v490_v60, %v1210_v14  ;;  %v597_v8 = vmul.f32 %v351_v41, %v351_v41 }
  0xb3   :  { %585 = vst [vmem:[%s1287_s3] sm:$0xff] %v575_v0  ;;  %v733_v2 = vsel %vm570_vm4, %v720_v55, %v721_v63  ;;  %v502_v11 = vrot.slane %v364_v45, 4  ;;  %v598_v12 = vmul.f32 %v364_v45, %v364_v45  ;;  %v486_v18 = vrot.slane %v485_v1, 2 }
  0xb4   :  { %v734_v5 = vsel %vm572_vm6, %v732_v23, %v733_v2  ;;  %433 = vst [vmem:[%s1286_s2 + $0x28] sm:$0xff] %v425_v4  ;;  %v657_v14 = vrot.slane %v596_v48, 4  ;;  %v497_v19 = vadd.f32 %v496_v3, %v351_v41  ;;  %v652_v21 = vadd.f32 %v651_v6, %v595_v59 }
  0xb5   :  { %v735_v9 = vsel %vm574_vm7, %v731_v24, %v734_v5  ;;  %v492_v22 = vrot.slane %v491_v7, 2  ;;  %v663_v25 = vrot.slane %v597_v8, 4  ;;  %v503_v26 = vadd.f32 %v502_v11, %v364_v45 }
  0xb6   :  { %745 = vst [vmem:[%s1288_s4] sm:$0xff] %v735_v9  ;;  %v669_v27 = vrot.slane %v598_v12, 4  ;;  %v1248_v31 = vadd.f32 %v486_v18, %v485_v1  ;;  %v658_v32 = vadd.f32 %v657_v14, %v596_v48  ;;  %v498_v34 = vrot.slane %v497_v19, 2 }
  0xb7   :  { %v653_v36 = vrot.slane %v652_v21, 2  ;;  %v493_v33 = vadd.f32 %v492_v22, %v491_v7  ;;  %v664_v37 = vadd.f32 %v663_v25, %v597_v8  ;;  %v504_v40 = vrot.slane %v503_v26, 2 }
  0xb8   :  { %v353_v10 = vpop.f32.mrf.mxu2  ;;  %v670_v41 = vadd.f32 %v669_v27, %v598_v12  ;;  %v659_v52 = vrot.slane %v658_v32, 2  ;;  %v499_v53 = vadd.f32 %v498_v34, %v497_v19  ;;  %v488_v56 = vrot.slane %v1248_v31, 1 }
  0xb9   :  { %v366_v13 = vpop.f32.mrf.mxu3  ;;  %v377_v15 = vpop.f32.mrf.mxu0  ;;  %v665_v57 = vrot.slane %v664_v37, 2  ;;  %v505_v60 = vadd.f32 %v504_v40, %v503_v26  ;;  %v494_v1 = vrot.slane %v493_v33, 1  ;;  %v1254_v10 = vadd.f32 %v653_v36, %v652_v21 }
  0xba   :  { %v508_v16 = vrot.slane %v377_v15, 4  ;;  %v390_v17 = vpop.f32.mrf.mxu1  ;;  %v599_v20 = vmul.f32 %v377_v15, %v377_v15  ;;  %v671_v61 = vrot.slane %v670_v41, 2  ;;  %v660_v2 = vadd.f32 %v659_v52, %v658_v32 }
  0xbb   :  { %v426_v35 = vpack.c.bf16 %v390_v17, %v377_v15  ;;  %v514_v38 = vrot.slane %v390_v17, 4  ;;  %v600_v42 = vmul.f32 %v390_v17, %v390_v17  ;;  %v500_v48 = vrot.slane %v499_v53, 1 }
  0xbc   :  { %v509_v28 = vadd.f32 %v508_v16, %v377_v15  ;;  %v675_v30 = vrot.slane %v599_v20, 4  ;;  %v666_v4 = vadd.f32 %v665_v57, %v664_v37  ;;  %v506_v9 = vrot.slane %v505_v60, 1 }
  0xbd   :  { %434 = vst [vmem:[%s1286_s2 + $0x30] sm:$0xff] %v426_v35  ;;  %v515_v49 = vadd.f32 %v514_v38, %v390_v17  ;;  %v681_v54 = vrot.slane %v600_v42, 4  ;;  %v672_v11 = vadd.f32 %v671_v61, %v670_v41  ;;  %v495_v25 = vadd.f32 %v494_v1, %v493_v33 }
  0xbe   :  { %v510_v46 = vrot.slane %v509_v28, 2  ;;  %v676_v47 = vadd.f32 %v675_v30, %v599_v20  ;;  %v661_v26 = vrot.slane %v660_v2, 1  ;;  %v501_v21 = vadd.f32 %v500_v48, %v499_v53 }
  0xbf   :  { %v516_v58 = vrot.slane %v515_v49, 2  ;;  %v682_v62 = vadd.f32 %v681_v54, %v600_v42  ;;  %v667_v27 = vrot.slane %v666_v4, 1  ;;  %v673_v30 = vrot.slane %v672_v11, 1 }
  0xc0   :  { %v403_v39 = vpop.f32.mrf.mxu2  ;;  %v511_v63 = vadd.f32 %v510_v46, %v509_v28  ;;  %v677_v24 = vrot.slane %v676_v47, 2  ;;  %v507_v28 = vadd.f32 %v506_v9, %v505_v60  ;;  %v556_v46 = vrot.slane %v501_v21, 6 }
  0xc1   :  { %v520_v43 = vrot.slane %v403_v39, 4  ;;  %v416_v44 = vpop.f32.mrf.mxu3  ;;  %v379_v45 = vpop.f32.mrf.mxu0  ;;  %v601_v50 = vmul.f32 %v403_v39, %v403_v39  ;;  %v517_v23 = vadd.f32 %v516_v58, %v515_v49  ;;  %v683_v3 = vrot.slane %v682_v62, 2 }
  0xc2   :  { %v392_v51 = vpop.f32.mrf.mxu1  ;;  %v427_v7 = vpack.c.bf16 %v416_v44, %v403_v39  ;;  %v526_v12 = vrot.slane %v416_v44, 4  ;;  %v512_v15 = vrot.slane %v511_v63, 1  ;;  %v678_v16 = vadd.f32 %v677_v24, %v676_v47 }
  0xc3   :  { %v521_v55 = vadd.f32 %v520_v43, %v403_v39  ;;  %v687_v59 = vrot.slane %v601_v50, 4  ;;  %v518_v17 = vrot.slane %v517_v23, 1  ;;  %v684_v18 = vadd.f32 %v683_v3, %v682_v62 }
  0xc4   :  { %435 = vst [vmem:[%s1286_s2 + $0x38] sm:$0xff] %v427_v7  ;;  %v527_v20 = vadd.f32 %v526_v12, %v416_v44  ;;  %v602_v22 = vmul.f32 %v416_v44, %v416_v44  ;;  %v513_v35 = vadd.f32 %v512_v15, %v511_v63  ;;  %v679_v36 = vrot.slane %v678_v16, 1 }
  0xc5   :  { %v522_v29 = vrot.slane %v521_v55, 2  ;;  %v688_v0 = vadd.f32 %v687_v59, %v601_v50  ;;  %v519_v37 = vadd.f32 %v518_v17, %v517_v23  ;;  %v685_v38 = vrot.slane %v684_v18, 1 }
  0xc6   :  { %v528_v32 = vrot.slane %v527_v20, 2  ;;  %v693_v34 = vrot.slane %v602_v22, 4  ;;  %v555_v43 = vrot.slane %v495_v25, 7  ;;  %v662_v45 = vadd.f32 %v661_v26, %v660_v2 }
  0xc7   :  { %v523_v5 = vadd.f32 %v522_v29, %v521_v55  ;;  %v689_v6 = vrot.slane %v688_v0, 2  ;;  %v668_v44 = vadd.f32 %v667_v27, %v666_v4  ;;  %v557_v33 = vrot.slane %v507_v28, 5 }
  0xc8   :  { %v405_v8 = vpop.f32.mrf.mxu2  ;;  %v529_v41 = vadd.f32 %v528_v32, %v527_v20  ;;  %v694_v42 = vadd.f32 %v693_v34, %v602_v22  ;;  %v674_v47 = vadd.f32 %v673_v30, %v672_v11  ;;  %v558_v51 = vrot.slane %v513_v35, 4 }
  0xc9   :  { %v418_v13 = vpop.f32.mrf.mxu3  ;;  %v524_v14 = vrot.slane %v523_v5, 1  ;;  %v690_v19 = vadd.f32 %v689_v6, %v688_v0  ;;  %v680_v52 = vadd.f32 %v679_v36, %v678_v16  ;;  %v559_v53 = vrot.slane %v519_v37, 3 }
  0xca   :  { %v530_v49 = vrot.slane %v529_v41, 1  ;;  %v695_v50 = vrot.slane %v694_v42, 2  ;;  %v686_v54 = vadd.f32 %v685_v38, %v684_v18  ;;  %v489_v60 = vadd.f32 %v488_v56, %v1248_v31 }
  0xcb   :  { %v525_v39 = vadd.f32 %v524_v14, %v523_v5  ;;  %v691_v40 = vrot.slane %v690_v19, 1  ;;  %v655_v61 = vrot.slane %v1254_v10, 1  ;;  %v723_v62 = vrot.slane %v668_v44, 6 }
  0xcc   :  { %v531_v58 = vadd.f32 %v530_v49, %v529_v41  ;;  %v696_v59 = vadd.f32 %v695_v50, %v694_v42  ;;  %v577_v29 = vsel %vm564_vm1, %v556_v46, %v557_v33  ;;  %v724_v63 = vrot.slane %v674_v47, 5 }
  0xcd   :  { %v560_v55 = vrot.slane %v525_v39, 2  ;;  %v692_v57 = vadd.f32 %v691_v40, %v690_v19  ;;  %v576_v0 = vsel %vm562_vm2, %v489_v60, %v555_v43  ;;  %v722_v1 = vrot.slane %v662_v45, 7 }
  0xce   :  { %v561_v24 = vrot.slane %v531_v58, 1  ;;  %v697_v23 = vrot.slane %v696_v59, 1  ;;  %v725_v2 = vrot.slane %v680_v52, 4  ;;  %v579_v48 = vsel %vm568_vm3, %v558_v51, %v559_v53 }
  0xcf   :  { %v726_v3 = vrot.slane %v686_v54, 3  ;;  %v727_v4 = vrot.slane %v692_v57, 2  ;;  %v578_v31 = vsel %vm566_vm5, %v576_v0, %v577_v29  ;;  %v656_v7 = vadd.f32 %v655_v61, %v1254_v10 }
  0xd0   :  { %v580_v5 = vsel %vm570_vm4, %v560_v55, %v561_v24  ;;  %v698_v6 = vadd.f32 %v697_v23, %v696_v59  ;;  %v737_v8 = vsel %vm564_vm1, %v723_v62, %v724_v63 }
  0xd1   :  { %v581_v56 = vsel %vm572_vm6, %v579_v48, %v580_v5  ;;  %v736_v12 = vsel %vm562_vm2, %v656_v7, %v722_v1  ;;  %v739_v13 = vsel %vm568_vm3, %v725_v2, %v726_v3 }
  0xd2   :  { %v582_v9 = vsel %vm574_vm7, %v578_v31, %v581_v56  ;;  %v728_v11 = vrot.slane %v698_v6, 1  ;;  %v738_v16 = vsel %vm566_vm5, %v736_v12, %v737_v8 }
  0xd3   :  { %586 = vst [vmem:[%s1287_s3 + $0x8] sm:$0xff] %v582_v9 }
  0xd4   :  { %v740_v15 = vsel %vm570_vm4, %v727_v4, %v728_v11 }
  0xd5   :  { %v741_v17 = vsel %vm572_vm6, %v739_v13, %v740_v15 }
  0xd6   :  { %v742_v10 = vsel %vm574_vm7, %v738_v16, %v741_v17 }
  0xd7   :  { %746 = vst [vmem:[%s1288_s4 + $0x8] sm:$0xff] %v742_v10 }

// kernel: generator_forward.6
= control target key start
LH: loop header
LB: loop body
LE: loop exit
PB: predicated region body
PF: predicated region fallthrough
CT: control target
= control target key end

     0   :  { %s1177_s15 = smov 0   ;;  %s1179_s16 = smov 0   ;;  %s1296_s0 = inlined_call_operand.vmem [shape: bf16[4,32,512], index: 0, kind: input, shape index: {}]   ;;  %s1297_s1 = inlined_call_operand.vmem [shape: bf16[4,512,64], index: 1, kind: input, shape index: {}]   ;;  %s1298_s2 = inlined_call_operand.vmem [shape: bf16[4,32,64], index: 2, kind: output, shape index: {0}]   ;;  %s1299_s3 = inlined_call_operand.vmem [shape: f32[4,1,1,64], index: 3, kind: output, shape index: {1}]   ;;  %s1300_s4 = inlined_call_operand.vmem [shape: f32[4,1,1,64], index: 4, kind: output, shape index: {2}]  }
   0x1   :  { %s1181_s17 = smov 0  }
   0x2 LB: > { %s27_s18 = sadd.s32 1, %s1146_s16  ;;  %p892_p0 = scmp.ge.s32.totalorder %s1150_s17, 1  ;;  %s1150_s17 = sphi %s1181_s17, %s15_s17   ;;  %s1146_s16 = sphi %s1179_s16, %s1302_s16   ;;  %s1142_s15 = sphi %s1177_s15, %s1301_s15  }
   0x3   : > { %p29_p1 = scmp.ge.s32.totalorder %s27_s18, 4  ;;  %p203_p2 = scmp.lt.s32.totalorder %s1150_s17, 5 }
   0x5   : > { %s1304_s18 = smov (%p29_p1, %s27_s18), 0  ;;  %p204_p3 = pnand %p892_p0, %p203_p2 }
   0x6   : > { %p256_p4 = scmp.lt.s32.totalorder (!%p204_p3), %s1142_s15, 3 }
   0x7   : > { %207 = sbr.rel (%p204_p3) target bundleno = 227 (0xe3), region = 28 }
   0xc   : > { %s1306_s15 = smov (!%p256_p4, %s1142_s15), 3  ;;  %vm677_vm0 = vcmask 519168   ;;  %vm682_vm1 = vcmask 523264   ;;  %vm696_vm2 = vcmask 516096  }
   0xd   : > { %s1062_s19 = sshll.u32 %s1306_s15, 8  ;;  %s1061_s23 = sshll.u32 %s1306_s15, 6 }
   0xe   : > { %s1201_s22 = scalar_lea.vmem %s1297_s1, %s1062_s19  ;;  %s1233_s26 = scalar_lea.vmem %s1296_s0, %s1061_s23 }
   0xf   : > { %v1079_v0 = vld [vmem:[%s1201_s22 + $0x38] sm:$0xff]  ;;  %v1078_v4 = vld [vmem:[%s1201_s22 + $0x30] sm:$0xff]  ;;  %v1077_v8 = vld [vmem:[%s1201_s22 + $0x28] sm:$0xff]  ;;  %s1063_s27 = sshll.u32 %s1306_s15, 4  ;;  %s286_s7 = scalar_lea.vmem %s1299_s3, %s1306_s15 }
  0x10   : > { %v1087_v1 = vld [vmem:[%s1201_s22 + $0x78] sm:$0xff]  ;;  %597 = vmatpush.bf16.msra.mxu0 %v1079_v0  ;;  %v1086_v5 = vld [vmem:[%s1201_s22 + $0x70] sm:$0xff]  ;;  %v1085_v9 = vld [vmem:[%s1201_s22 + $0x68] sm:$0xff]  ;;  %s1261_s30 = scalar_lea.vmem %s1298_s2, %s1063_s27  ;;  %s292_s10 = scalar_lea.vmem %s1300_s4, %s1306_s15 }
  0x11   : > { %v1095_v2 = vld [vmem:[%s1201_s22 + $0xb8] sm:$0xff]  ;;  %616 = vmatpush.bf16.msra.mxu1 %v1087_v1  ;;  %v1094_v6 = vld [vmem:[%s1201_s22 + $0xb0] sm:$0xff]  ;;  %v1093_v10 = vld [vmem:[%s1201_s22 + $0xa8] sm:$0xff] }
  0x12   : > { %v1103_v3 = vld [vmem:[%s1201_s22 + $0xf8] sm:$0xff]  ;;  %635 = vmatpush.bf16.msra.mxu2 %v1095_v2  ;;  %v1102_v7 = vld [vmem:[%s1201_s22 + $0xf0] sm:$0xff]  ;;  %v1101_v11 = vld [vmem:[%s1201_s22 + $0xe8] sm:$0xff] }
  0x13   : > { %654 = vmatpush.bf16.msra.mxu3 %v1103_v3  ;;  %v1076_v12 = vld [vmem:[%s1201_s22 + $0x20] sm:$0xff]  ;;  %v1075_v16 = vld [vmem:[%s1201_s22 + $0x18] sm:$0xff]  ;;  %v1074_v20 = vld [vmem:[%s1201_s22 + $0x10] sm:$0xff] }
  0x14   : > { %598 = vmatpush.bf16.msra.mxu0 %v1078_v4  ;;  %v1084_v13 = vld [vmem:[%s1201_s22 + $0x60] sm:$0xff]  ;;  %v1083_v17 = vld [vmem:[%s1201_s22 + $0x58] sm:$0xff]  ;;  %v1082_v21 = vld [vmem:[%s1201_s22 + $0x50] sm:$0xff] }
  0x15   : > { %617 = vmatpush.bf16.msra.mxu1 %v1086_v5  ;;  %v1092_v14 = vld [vmem:[%s1201_s22 + $0xa0] sm:$0xff]  ;;  %v1091_v18 = vld [vmem:[%s1201_s22 + $0x98] sm:$0xff]  ;;  %v1090_v22 = vld [vmem:[%s1201_s22 + $0x90] sm:$0xff] }
  0x16   : > { %636 = vmatpush.bf16.msra.mxu2 %v1094_v6  ;;  %v1100_v15 = vld [vmem:[%s1201_s22 + $0xe0] sm:$0xff]  ;;  %v1099_v19 = vld [vmem:[%s1201_s22 + $0xd8] sm:$0xff]  ;;  %v1098_v23 = vld [vmem:[%s1201_s22 + $0xd0] sm:$0xff] }
  0x17   : > { %655 = vmatpush.bf16.msra.mxu3 %v1102_v7  ;;  %v1073_v24 = vld [vmem:[%s1201_s22 + $0x8] sm:$0xff]  ;;  %v1072_v28 = vld [vmem:[%s1201_s22] sm:$0xff]  ;;  %v1066_v33 = vld [vmem:[%s1233_s26 + $0xc] sm:$0xf0] }
  0x18   : > { %599 = vmatpush.bf16.msra.mxu0 %v1077_v8  ;;  %v1081_v25 = vld [vmem:[%s1201_s22 + $0x48] sm:$0xff]  ;;  %v1080_v29 = vld [vmem:[%s1201_s22 + $0x40] sm:$0xff]  ;;  %v903_v35 = vld [vmem:[%s1233_s26 + $0x10] sm:$0xf0] }
  0x19   : > { %618 = vmatpush.bf16.msra.mxu1 %v1085_v9  ;;  %v1089_v26 = vld [vmem:[%s1201_s22 + $0x88] sm:$0xff]  ;;  %v1088_v30 = vld [vmem:[%s1201_s22 + $0x80] sm:$0xff]  ;;  %v1067_v37 = vld [vmem:[%s1233_s26 + $0x14] sm:$0xf0] }
  0x1a   : > { %637 = vmatpush.bf16.msra.mxu2 %v1093_v10  ;;  %v1097_v27 = vld [vmem:[%s1201_s22 + $0xc8] sm:$0xff]  ;;  %v1096_v31 = vld [vmem:[%s1201_s22 + $0xc0] sm:$0xff]  ;;  %v911_v39 = vld [vmem:[%s1233_s26 + $0x18] sm:$0xf0] }
  0x1b   : > { %656 = vmatpush.bf16.msra.mxu3 %v1101_v11  ;;  %v901_v32 = vld [vmem:[%s1233_s26] sm:$0xf]  ;;  %v1064_v34 = vld [vmem:[%s1233_s26 + $0x4] sm:$0xf]  ;;  %v909_v36 = vld [vmem:[%s1233_s26 + $0x8] sm:$0xf] }
  0x1c   : > { %600 = vmatpush.bf16.msra.mxu0 %v1076_v12  ;;  %v1065_v38 = vld [vmem:[%s1233_s26 + $0xc] sm:$0xf]  ;;  %v902_v40 = vor.u32 %v1066_v33, %v901_v32  ;;  %v906_v41 = vor.u32 %v1064_v34, %v903_v35  ;;  %v910_v42 = vor.u32 %v1067_v37, %v909_v36  ;;  %v917_v44 = vld [vmem:[%s1233_s26 + $0x20] sm:$0xf]  ;;  %v1070_v45 = vld [vmem:[%s1233_s26 + $0x2c] sm:$0xf0] }
  0x1d   : > { %619 = vmatpush.bf16.msra.mxu1 %v1084_v13  ;;  %v914_v43 = vor.u32 %v1065_v38, %v911_v39  ;;  %v1068_v46 = vld [vmem:[%s1233_s26 + $0x24] sm:$0xf]  ;;  %v919_v47 = vld [vmem:[%s1233_s26 + $0x30] sm:$0xf0]  ;;  %v925_v48 = vld [vmem:[%s1233_s26 + $0x28] sm:$0xf]  ;;  %v918_v52 = vor.u32 %v1070_v45, %v917_v44 }
  0x1e   : > { %638 = vmatpush.bf16.msra.mxu2 %v1092_v14  ;;  %v1071_v49 = vld [vmem:[%s1233_s26 + $0x34] sm:$0xf0]  ;;  %v1069_v50 = vld [vmem:[%s1233_s26 + $0x2c] sm:$0xf]  ;;  %v927_v51 = vld [vmem:[%s1233_s26 + $0x38] sm:$0xf0]  ;;  %v922_v53 = vor.u32 %v1068_v46, %v919_v47 }
  0x1f   : > { %657 = vmatpush.bf16.msra.mxu3 %v1100_v15  ;;  %v926_v54 = vor.u32 %v1071_v49, %v925_v48  ;;  %v930_v55 = vor.u32 %v1069_v50, %v927_v51 }
  0x20   : > { %601 = vmatpush.bf16.msra.mxu0 %v1075_v16 }
  0x21   : > { %620 = vmatpush.bf16.msra.mxu1 %v1083_v17 }
  0x22   : > { %639 = vmatpush.bf16.msra.mxu2 %v1091_v18 }
  0x23   : > { %658 = vmatpush.bf16.msra.mxu3 %v1099_v19 }
  0x24   : > { %602 = vmatpush.bf16.msra.mxu0 %v1074_v20 }
  0x25   : > { %621 = vmatpush.bf16.msra.mxu1 %v1082_v21 }
  0x26   : > { %640 = vmatpush.bf16.msra.mxu2 %v1090_v22 }
  0x27   : > { %659 = vmatpush.bf16.msra.mxu3 %v1098_v23 }
  0x28   : > { %603 = vmatpush.bf16.msra.mxu0 %v1073_v24 }
  0x29   : > { %622 = vmatpush.bf16.msra.mxu1 %v1081_v25 }
  0x2a   : > { %641 = vmatpush.bf16.msra.mxu2 %v1089_v26 }
  0x2b   : > { %660 = vmatpush.bf16.msra.mxu3 %v1097_v27 }
  0x2c   : > { %604 = vmatpush.bf16.msra.mxu0 %v1072_v28 }
  0x2d   : > { %623 = vmatpush.bf16.msra.mxu1 %v1080_v29 }
  0x2e   : > { %642 = vmatpush.bf16.msra.mxu2 %v1088_v30 }
  0x2f   : > { %661 = vmatpush.bf16.msra.mxu3 %v1096_v31  ;;  %605 = vmatmul.bf16.vlgmr.msra.gmra.mxu0 %v902_v40 }
  0x30   : > { %624 = vmatmul.bf16.vlgmr.msra.gmra.mxu1 %v906_v41 }
  0x31   : > { %643 = vmatmul.bf16.vlgmr.msra.gmra.mxu2 %v910_v42 }
  0x32   : > { %662 = vmatmul.bf16.vlgmr.msra.gmra.mxu3 %v914_v43 }
  0x3f   : > { %610 = vmatmul.bf16.gmra.mxu0 %v918_v52 }
  0x40   : > { %629 = vmatmul.bf16.gmra.mxu1 %v922_v53 }
  0x41   : > { %648 = vmatmul.bf16.gmra.mxu2 %v926_v54 }
  0x42   : > { %667 = vmatmul.bf16.gmra.mxu3 %v930_v55 }
  0xac   : > { %v606_v56 = vpop.f32.mrf.mxu0 }
  0xad   : > { %v625_v57 = vpop.f32.mrf.mxu1 }
  0xae   : > { %v626_v58 = vadd.f32 %v625_v57, %v606_v56 }
  0xb4   : > { %v644_v59 = vpop.f32.mrf.mxu2  ;;  %v608_v62 = vpop.f32.mrf.mxu0 }
  0xb5   : > { %v663_v60 = vpop.f32.mrf.mxu3  ;;  %v645_v61 = vadd.f32 %v644_v59, %v626_v58  ;;  %v627_v63 = vpop.f32.mrf.mxu1 }
  0xb6   : > { %v628_v2 = vadd.f32 %v627_v63, %v608_v62 }
  0xb7   : > { %v664_v0 = vadd.f32 %v663_v60, %v645_v61 }
  0xb9   : > { %v673_v1 = vpack.c.bf16 %v664_v0, %v664_v0  ;;  %v698_v19 = vmul.f32 %v664_v0, %v664_v0  ;;  %v683_v24 = vsel %vm682_vm1, %v664_v0, 0.0 }
  0xbb   : > { %678 = vst.msk [vmem:[%s1261_s30] sm:$0xf] %vm677_vm0, %v673_v1  ;;  %v702_v30 = vsel %vm682_vm1, %v698_v19, 0.0 }
  0xbc   : > { %v646_v3 = vpop.f32.mrf.mxu2  ;;  %v611_v6 = vpop.f32.mrf.mxu0 }
  0xbd   : > { %v665_v4 = vpop.f32.mrf.mxu3  ;;  %v647_v5 = vadd.f32 %v646_v3, %v628_v2  ;;  %v630_v7 = vpop.f32.mrf.mxu1 }
  0xbe   : > { %v631_v10 = vadd.f32 %v630_v7, %v611_v6 }
  0xbf   : > { %v666_v8 = vadd.f32 %v665_v4, %v647_v5 }
  0xc1   : > { %v674_v9 = vpack.c.bf16 %v666_v8, %v666_v8  ;;  %v699_v17 = vmul.f32 %v666_v8, %v666_v8  ;;  %v684_v20 = vsel %vm682_vm1, %v666_v8, 0.0 }
  0xc2   : > { %v685_v28 = vadd.f32 %v684_v20, %v683_v24 }
  0xc3   : > { %679 = vst.msk [vmem:[%s1261_s30 + $0x4] sm:$0xf] %vm677_vm0, %v674_v9  ;;  %v703_v25 = vsel %vm682_vm1, %v699_v17, 0.0 }
  0xc4   : > { %v649_v11 = vpop.f32.mrf.mxu2  ;;  %v613_v15 = vpop.f32.mrf.mxu0  ;;  %v704_v33 = vadd.f32 %v703_v25, %v702_v30 }
  0xc5   : > { %v668_v12 = vpop.f32.mrf.mxu3  ;;  %v650_v13 = vadd.f32 %v649_v11, %v631_v10  ;;  %v632_v16 = vpop.f32.mrf.mxu1 }
  0xc6   : > { %v633_v22 = vadd.f32 %v632_v16, %v613_v15 }
  0xc7   : > { %v669_v14 = vadd.f32 %v668_v12, %v650_v13 }
  0xc9   : > { %v675_v18 = vpack.c.bf16 %v669_v14, %v669_v14  ;;  %v700_v21 = vmul.f32 %v669_v14, %v669_v14  ;;  %v686_v26 = vsel %vm682_vm1, %v669_v14, 0.0 }
  0xca   : > { %v687_v34 = vadd.f32 %v686_v26, %v685_v28 }
  0xcb   : > { %680 = vst.msk [vmem:[%s1261_s30 + $0x8] sm:$0xf] %vm677_vm0, %v675_v18  ;;  %v705_v31 = vsel %vm682_vm1, %v700_v21, 0.0 }
  0xcc   : > { %v651_v23 = vpop.f32.mrf.mxu2  ;;  %v706_v38 = vadd.f32 %v705_v31, %v704_v33 }
  0xcd   : > { %v652_v27 = vadd.f32 %v651_v23, %v633_v22  ;;  %v670_v29 = vpop.f32.mrf.mxu3 }
  0xcf   : > { %v671_v32 = vadd.f32 %v670_v29, %v652_v27 }
  0xd1   : > { %v676_v35 = vpack.c.bf16 %v671_v32, %v671_v32  ;;  %v688_v36 = vsel %vm682_vm1, %v671_v32, 0.0  ;;  %v701_v37 = vmul.f32 %v671_v32, %v671_v32 }
  0xd2   : > { %v689_v39 = vadd.f32 %v688_v36, %v687_v34 }
  0xd3   : > { %681 = vst.msk [vmem:[%s1261_s30 + $0xc] sm:$0xf] %vm677_vm0, %v676_v35  ;;  %v707_v40 = vsel %vm682_vm1, %v701_v37, 0.0 }
  0xd4   : > { %v690_v41 = vrot.slane %v689_v39, 4  ;;  %v708_v42 = vadd.f32 %v707_v40, %v706_v38 }
  0xd6   : > { %v691_v43 = vadd.f32 %v690_v41, %v689_v39  ;;  %v709_v44 = vrot.slane %v708_v42, 4 }
  0xd8   : > { %v692_v45 = vrot.slane %v691_v43, 2  ;;  %v710_v46 = vadd.f32 %v709_v44, %v708_v42 }
  0xda   : > { %v693_v47 = vadd.f32 %v692_v45, %v691_v43  ;;  %v711_v48 = vrot.slane %v710_v46, 2 }
  0xdc   : > { %v694_v49 = vrot.slane %v693_v47, 1  ;;  %v712_v50 = vadd.f32 %v711_v48, %v710_v46 }
  0xde   : > { %v695_v51 = vadd.f32 %v694_v49, %v693_v47  ;;  %v713_v52 = vrot.slane %v712_v50, 1 }
  0xe0   : > { %697 = vst.msk [vmem:[%s286_s7] sm:$0x1] %vm696_vm2, %v695_v51  ;;  %v714_v53 = vadd.f32 %v713_v52, %v712_v50 }
  0xe2   : > { %715 = vst.msk [vmem:[%s292_s10] sm:$0x1] %vm696_vm2, %v714_v53 }
  0xe3 PF: > { %s15_s17 = sadd.s32 1, %s1150_s17   ;;  %s1301_s15 = smov %s1146_s16 }
  0xe4   : > { %p12_p5 = scmp.ge.s32.totalorder %s15_s17, 6   ;;  %s1302_s16 = smov %s1304_s18 }
  0xe6   :  { %14 = sbr.rel (!%p12_p5) target bundleno = 2 (0x2), region = 85 }

// kernel: generator_forward.7
= control target key start
LH: loop header
LB: loop body
LE: loop exit
PB: predicated region body
PF: predicated region fallthrough
CT: control target
= control target key end

     0   :  { %s1179_s15 = smov 0   ;;  %s1181_s16 = smov 0   ;;  %s1391_s0 = inlined_call_operand.vmem [shape: bf16[4,128,256], index: 0, kind: input, shape index: {}]   ;;  %s1392_s1 = inlined_call_operand.vmem [shape: bf16[4,256,32], index: 1, kind: input, shape index: {}]   ;;  %s1393_s2 = inlined_call_operand.vmem [shape: bf16[4,128,32], index: 2, kind: output, shape index: {0}]   ;;  %s1394_s3 = inlined_call_operand.vmem [shape: f32[4,1,1,32], index: 3, kind: output, shape index: {1}]   ;;  %s1395_s4 = inlined_call_operand.vmem [shape: f32[4,1,1,32], index: 4, kind: output, shape index: {2}]  }
   0x1   :  { %s1183_s17 = smov 0  }
   0x2 LB: > { %s27_s18 = sadd.s32 1, %s1148_s16  ;;  %p918_p0 = scmp.ge.s32.totalorder %s1152_s17, 1  ;;  %s1152_s17 = sphi %s1183_s17, %s15_s17   ;;  %s1148_s16 = sphi %s1181_s16, %s1397_s16   ;;  %s1144_s15 = sphi %s1179_s15, %s1396_s15  }
   0x3   : > { %p29_p1 = scmp.ge.s32.totalorder %s27_s18, 4  ;;  %p203_p2 = scmp.lt.s32.totalorder %s1152_s17, 5 }
   0x5   : > { %s1399_s18 = smov (%p29_p1, %s27_s18), 0  ;;  %p204_p3 = pnand %p918_p0, %p203_p2 }
   0x6   : > { %p256_p4 = scmp.lt.s32.totalorder (!%p204_p3), %s1144_s15, 3 }
   0x7   : > { %207 = sbr.rel (%p204_p3) target bundleno = 266 (0x10a), region = 28 }
   0xc   : > { %s1401_s15 = smov (!%p256_p4, %s1144_s15), 3  ;;  %vm631_vm0 = vcmask 257024   ;;  %vm648_vm1 = vcmask 261120   ;;  %vm686_vm2 = vcmask 253952  }
   0xd   : > { %s1055_s19 = sshll.u32 %s1401_s15, 7  ;;  %s1057_s26 = sshll.u32 %s1401_s15, 6 }
   0xe   : > { %s1205_s22 = scalar_lea.vmem %s1392_s1, %s1055_s19  ;;  %s1226_s25 = scalar_lea.vmem %s1391_s0, %s1055_s19 }
   0xf   : > { %v1081_v0 = vld [vmem:[%s1205_s22 + $0x38] sm:$0xff]  ;;  %v1080_v2 = vld [vmem:[%s1205_s22 + $0x30] sm:$0xff]  ;;  %v1079_v4 = vld [vmem:[%s1205_s22 + $0x28] sm:$0xff]  ;;  %s1266_s29 = scalar_lea.vmem %s1393_s2, %s1057_s26  ;;  %s286_s6 = scalar_lea.vmem %s1394_s3, %s1401_s15 }
  0x10   : > { %v1089_v1 = vld [vmem:[%s1205_s22 + $0x78] sm:$0xff]  ;;  %517 = vmatpush.bf16.msra.mxu0 %v1081_v0  ;;  %v1088_v3 = vld [vmem:[%s1205_s22 + $0x70] sm:$0xff]  ;;  %1090 = vmatpush.bf16.msra.mxu2 %v1081_v0  ;;  %v1087_v5 = vld [vmem:[%s1205_s22 + $0x68] sm:$0xff]  ;;  %s292_s9 = scalar_lea.vmem %s1395_s4, %s1401_s15 }
  0x11   : > { %566 = vmatpush.bf16.msra.mxu1 %v1089_v1  ;;  %1098 = vmatpush.bf16.msra.mxu3 %v1089_v1  ;;  %v1078_v6 = vld [vmem:[%s1205_s22 + $0x20] sm:$0xff]  ;;  %v1077_v8 = vld [vmem:[%s1205_s22 + $0x18] sm:$0xff]  ;;  %v1076_v10 = vld [vmem:[%s1205_s22 + $0x10] sm:$0xff] }
  0x12   : > { %v1086_v7 = vld [vmem:[%s1205_s22 + $0x60] sm:$0xff]  ;;  %v1085_v9 = vld [vmem:[%s1205_s22 + $0x58] sm:$0xff]  ;;  %v1084_v11 = vld [vmem:[%s1205_s22 + $0x50] sm:$0xff] }
  0x13   : > { %v1075_v12 = vld [vmem:[%s1205_s22 + $0x8] sm:$0xff]  ;;  %v1074_v14 = vld [vmem:[%s1205_s22] sm:$0xff]  ;;  %v935_v28 = vld [vmem:[%s1226_s25 + $0x10] sm:$0xf] }
  0x14   : > { %518 = vmatpush.bf16.msra.mxu0 %v1080_v2  ;;  %1091 = vmatpush.bf16.msra.mxu2 %v1080_v2  ;;  %v1083_v13 = vld [vmem:[%s1205_s22 + $0x48] sm:$0xff]  ;;  %v1082_v15 = vld [vmem:[%s1205_s22 + $0x40] sm:$0xff]  ;;  %v1061_v29 = vld [vmem:[%s1226_s25 + $0x14] sm:$0xf0] }
  0x15   : > { %567 = vmatpush.bf16.msra.mxu1 %v1088_v3  ;;  %1099 = vmatpush.bf16.msra.mxu3 %v1088_v3  ;;  %v927_v16 = vld [vmem:[%s1226_s25] sm:$0xf]  ;;  %v1059_v17 = vld [vmem:[%s1226_s25 + $0x4] sm:$0xf0]  ;;  %v1058_v18 = vld [vmem:[%s1226_s25 + $0x4] sm:$0xf]  ;;  %v936_v36 = vor.u32 %v1061_v29, %v935_v28 }
  0x16   : > { %v929_v19 = vld [vmem:[%s1226_s25 + $0x8] sm:$0xf0]  ;;  %v959_v20 = vld [vmem:[%s1226_s25 + $0x40] sm:$0xf]  ;;  %v1067_v21 = vld [vmem:[%s1226_s25 + $0x44] sm:$0xf0]  ;;  %v928_v24 = vor.u32 %v1059_v17, %v927_v16 }
  0x17   : > { %v1066_v22 = vld [vmem:[%s1226_s25 + $0x44] sm:$0xf]  ;;  %v961_v23 = vld [vmem:[%s1226_s25 + $0x48] sm:$0xf0]  ;;  %v932_v25 = vor.u32 %v1058_v18, %v929_v19  ;;  %v960_v26 = vor.u32 %v1067_v21, %v959_v20  ;;  %v1060_v30 = vld [vmem:[%s1226_s25 + $0x14] sm:$0xf] }
  0x18   : > { %519 = vmatpush.bf16.msra.mxu0 %v1079_v4  ;;  %1092 = vmatpush.bf16.msra.mxu2 %v1079_v4  ;;  %v964_v27 = vor.u32 %v1066_v22, %v961_v23  ;;  %v937_v31 = vld [vmem:[%s1226_s25 + $0x18] sm:$0xf0]  ;;  %v967_v32 = vld [vmem:[%s1226_s25 + $0x50] sm:$0xf]  ;;  %v1069_v33 = vld [vmem:[%s1226_s25 + $0x54] sm:$0xf0] }
  0x19   : > { %568 = vmatpush.bf16.msra.mxu1 %v1087_v5  ;;  %1100 = vmatpush.bf16.msra.mxu3 %v1087_v5  ;;  %v1068_v34 = vld [vmem:[%s1226_s25 + $0x54] sm:$0xf]  ;;  %v969_v35 = vld [vmem:[%s1226_s25 + $0x58] sm:$0xf0]  ;;  %v940_v37 = vor.u32 %v1060_v30, %v937_v31  ;;  %v968_v38 = vor.u32 %v1069_v33, %v967_v32  ;;  %v943_v40 = vld [vmem:[%s1226_s25 + $0x20] sm:$0xf] }
  0x1a   : > { %v972_v39 = vor.u32 %v1068_v34, %v969_v35  ;;  %v1063_v41 = vld [vmem:[%s1226_s25 + $0x24] sm:$0xf0]  ;;  %v1062_v42 = vld [vmem:[%s1226_s25 + $0x24] sm:$0xf]  ;;  %v945_v43 = vld [vmem:[%s1226_s25 + $0x28] sm:$0xf0] }
  0x1b   : > { %v975_v44 = vld [vmem:[%s1226_s25 + $0x60] sm:$0xf]  ;;  %v1071_v45 = vld [vmem:[%s1226_s25 + $0x64] sm:$0xf0]  ;;  %v1070_v46 = vld [vmem:[%s1226_s25 + $0x64] sm:$0xf]  ;;  %v944_v48 = vor.u32 %v1063_v41, %v943_v40  ;;  %v948_v49 = vor.u32 %v1062_v42, %v945_v43 }
  0x1c   : > { %520 = vmatpush.bf16.msra.mxu0 %v1078_v6  ;;  %1093 = vmatpush.bf16.msra.mxu2 %v1078_v6  ;;  %v977_v47 = vld [vmem:[%s1226_s25 + $0x68] sm:$0xf0]  ;;  %v976_v50 = vor.u32 %v1071_v45, %v975_v44  ;;  %v951_v52 = vld [vmem:[%s1226_s25 + $0x30] sm:$0xf]  ;;  %v1065_v53 = vld [vmem:[%s1226_s25 + $0x34] sm:$0xf0] }
  0x1d   : > { %569 = vmatpush.bf16.msra.mxu1 %v1086_v7  ;;  %1101 = vmatpush.bf16.msra.mxu3 %v1086_v7  ;;  %v980_v51 = vor.u32 %v1070_v46, %v977_v47  ;;  %v1064_v54 = vld [vmem:[%s1226_s25 + $0x34] sm:$0xf]  ;;  %v953_v55 = vld [vmem:[%s1226_s25 + $0x38] sm:$0xf0]  ;;  %v983_v56 = vld [vmem:[%s1226_s25 + $0x70] sm:$0xf]  ;;  %v952_v60 = vor.u32 %v1065_v53, %v951_v52 }
  0x1e   : > { %v1073_v57 = vld [vmem:[%s1226_s25 + $0x74] sm:$0xf0]  ;;  %v1072_v58 = vld [vmem:[%s1226_s25 + $0x74] sm:$0xf]  ;;  %v985_v59 = vld [vmem:[%s1226_s25 + $0x78] sm:$0xf0]  ;;  %v956_v61 = vor.u32 %v1064_v54, %v953_v55 }
  0x1f   : > { %v984_v62 = vor.u32 %v1073_v57, %v983_v56  ;;  %v988_v63 = vor.u32 %v1072_v58, %v985_v59 }
  0x20   : > { %521 = vmatpush.bf16.msra.mxu0 %v1077_v8  ;;  %1094 = vmatpush.bf16.msra.mxu2 %v1077_v8 }
  0x21   : > { %570 = vmatpush.bf16.msra.mxu1 %v1085_v9  ;;  %1102 = vmatpush.bf16.msra.mxu3 %v1085_v9 }
  0x24   : > { %522 = vmatpush.bf16.msra.mxu0 %v1076_v10  ;;  %1095 = vmatpush.bf16.msra.mxu2 %v1076_v10 }
  0x25   : > { %571 = vmatpush.bf16.msra.mxu1 %v1084_v11  ;;  %1103 = vmatpush.bf16.msra.mxu3 %v1084_v11 }
  0x28   : > { %523 = vmatpush.bf16.msra.mxu0 %v1075_v12  ;;  %1096 = vmatpush.bf16.msra.mxu2 %v1075_v12 }
  0x29   : > { %572 = vmatpush.bf16.msra.mxu1 %v1083_v13  ;;  %1104 = vmatpush.bf16.msra.mxu3 %v1083_v13 }
  0x2c   : > { %524 = vmatpush.bf16.msra.mxu0 %v1074_v14  ;;  %1097 = vmatpush.bf16.msra.mxu2 %v1074_v14 }
  0x2d   : > { %573 = vmatpush.bf16.msra.mxu1 %v1082_v15  ;;  %1105 = vmatpush.bf16.msra.mxu3 %v1082_v15 }
  0x2f   : > { %525 = vmatmul.bf16.vlgmr.msra.gmra.mxu0 %v928_v24  ;;  %545 = vmatmul.bf16.vlgmr.msra.gmra.mxu2 %v960_v26 }
  0x30   : > { %574 = vmatmul.bf16.vlgmr.msra.gmra.mxu1 %v932_v25  ;;  %594 = vmatmul.bf16.vlgmr.msra.gmra.mxu3 %v964_v27 }
  0x3f   : > { %530 = vmatmul.bf16.gmra.mxu0 %v936_v36  ;;  %550 = vmatmul.bf16.gmra.mxu2 %v968_v38 }
  0x40   : > { %579 = vmatmul.bf16.gmra.mxu1 %v940_v37  ;;  %599 = vmatmul.bf16.gmra.mxu3 %v972_v39 }
  0x4f   : > { %535 = vmatmul.bf16.gmra.mxu0 %v944_v48  ;;  %555 = vmatmul.bf16.gmra.mxu2 %v976_v50 }
  0x50   : > { %584 = vmatmul.bf16.gmra.mxu1 %v948_v49  ;;  %604 = vmatmul.bf16.gmra.mxu3 %v980_v51 }
  0x5f   : > { %540 = vmatmul.bf16.gmra.mxu0 %v952_v60  ;;  %560 = vmatmul.bf16.gmra.mxu2 %v984_v62 }
  0x60   : > { %589 = vmatmul.bf16.gmra.mxu1 %v956_v61  ;;  %609 = vmatmul.bf16.gmra.mxu3 %v988_v63 }
  0xac   : > { %v526_v0 = vpop.f32.mrf.mxu0 }
  0xad   : > { %v575_v1 = vpop.f32.mrf.mxu1 }
  0xae   : > { %v576_v2 = vadd.f32 %v575_v1, %v526_v0 }
  0xb0   : > { %v615_v3 = vpack.c.bf16 %v576_v2, %v576_v2  ;;  %v688_v45 = vmul.f32 %v576_v2, %v576_v2  ;;  %v649_v48 = vsel %vm648_vm1, %v576_v2, 0.0 }
  0xb2   : > { %632 = vst.msk [vmem:[%s1266_s29] sm:$0xf] %vm631_vm0, %v615_v3  ;;  %v546_v4 = vpop.f32.mrf.mxu2  ;;  %v704_v54 = vsel %vm648_vm1, %v688_v45, 0.0 }
  0xb3   : > { %v595_v5 = vpop.f32.mrf.mxu3 }
  0xb4   : > { %v528_v6 = vpop.f32.mrf.mxu0  ;;  %v1270_v8 = vadd.f32 %v595_v5, %v546_v4 }
  0xb5   : > { %v577_v7 = vpop.f32.mrf.mxu1 }
  0xb6   : > { %v578_v9 = vadd.f32 %v577_v7, %v528_v6  ;;  %v623_v10 = vpack.c.bf16 %v1270_v8, %v1270_v8 }
  0xb8   : > { %v616_v11 = vpack.c.bf16 %v578_v9, %v578_v9  ;;  %640 = vst.msk [vmem:[%s1266_s29 + $0x20] sm:$0xf] %vm631_vm0, %v623_v10  ;;  %v689_v43 = vmul.f32 %v578_v9, %v578_v9  ;;  %v650_v46 = vsel %vm648_vm1, %v578_v9, 0.0 }
  0xb9   : > { %v651_v55 = vadd.f32 %v650_v46, %v649_v48 }
  0xba   : > { %633 = vst.msk [vmem:[%s1266_s29 + $0x4] sm:$0xf] %vm631_vm0, %v616_v11  ;;  %v548_v12 = vpop.f32.mrf.mxu2  ;;  %v705_v49 = vsel %vm648_vm1, %v689_v43, 0.0 }
  0xbb   : > { %v597_v13 = vpop.f32.mrf.mxu3  ;;  %v706_v63 = vadd.f32 %v705_v49, %v704_v54 }
  0xbc   : > { %v531_v14 = vpop.f32.mrf.mxu0  ;;  %v1278_v16 = vadd.f32 %v597_v13, %v548_v12 }
  0xbd   : > { %v580_v15 = vpop.f32.mrf.mxu1 }
  0xbe   : > { %v581_v17 = vadd.f32 %v580_v15, %v531_v14  ;;  %v624_v18 = vpack.c.bf16 %v1278_v16, %v1278_v16 }
  0xc0   : > { %v617_v19 = vpack.c.bf16 %v581_v17, %v581_v17  ;;  %641 = vst.msk [vmem:[%s1266_s29 + $0x24] sm:$0xf] %vm631_vm0, %v624_v18  ;;  %v690_v47 = vmul.f32 %v581_v17, %v581_v17  ;;  %v652_v50 = vsel %vm648_vm1, %v581_v17, 0.0 }
  0xc1   : > { %v653_v0 = vadd.f32 %v652_v50, %v651_v55 }
  0xc2   : > { %634 = vst.msk [vmem:[%s1266_s29 + $0x8] sm:$0xf] %vm631_vm0, %v617_v19  ;;  %v551_v20 = vpop.f32.mrf.mxu2  ;;  %v707_v59 = vsel %vm648_vm1, %v690_v47, 0.0 }
  0xc3   : > { %v600_v21 = vpop.f32.mrf.mxu3  ;;  %v708_v6 = vadd.f32 %v707_v59, %v706_v63 }
  0xc4   : > { %v533_v22 = vpop.f32.mrf.mxu0  ;;  %v1286_v24 = vadd.f32 %v600_v21, %v551_v20 }
  0xc5   : > { %v582_v23 = vpop.f32.mrf.mxu1 }
  0xc6   : > { %v583_v25 = vadd.f32 %v582_v23, %v533_v22  ;;  %v625_v26 = vpack.c.bf16 %v1286_v24, %v1286_v24  ;;  %v698_v45 = vmul.f32 %v1286_v24, %v1286_v24 }
  0xc8   : > { %v618_v27 = vpack.c.bf16 %v583_v25, %v583_v25  ;;  %642 = vst.msk [vmem:[%s1266_s29 + $0x28] sm:$0xf] %vm631_vm0, %v625_v26  ;;  %v691_v51 = vmul.f32 %v583_v25, %v583_v25  ;;  %v654_v60 = vsel %vm648_vm1, %v583_v25, 0.0  ;;  %v723_v55 = vsel %vm648_vm1, %v698_v45, 0.0 }
  0xc9   : > { %v655_v7 = vadd.f32 %v654_v60, %v653_v0 }
  0xca   : > { %635 = vst.msk [vmem:[%s1266_s29 + $0xc] sm:$0xf] %vm631_vm0, %v618_v27  ;;  %v553_v28 = vpop.f32.mrf.mxu2  ;;  %v709_v2 = vsel %vm648_vm1, %v691_v51, 0.0  ;;  %v668_v51 = vsel %vm648_vm1, %v1286_v24, 0.0 }
  0xcb   : > { %v602_v29 = vpop.f32.mrf.mxu3  ;;  %v710_v12 = vadd.f32 %v709_v2, %v708_v6 }
  0xcc   : > { %v536_v30 = vpop.f32.mrf.mxu0  ;;  %v1294_v32 = vadd.f32 %v602_v29, %v553_v28 }
  0xcd   : > { %v585_v31 = vpop.f32.mrf.mxu1 }
  0xce   : > { %v586_v33 = vadd.f32 %v585_v31, %v536_v30  ;;  %v626_v34 = vpack.c.bf16 %v1294_v32, %v1294_v32  ;;  %v696_v30 = vmul.f32 %v1270_v8, %v1270_v8 }
  0xd0   : > { %v619_v35 = vpack.c.bf16 %v586_v33, %v586_v33  ;;  %643 = vst.msk [vmem:[%s1266_s29 + $0x2c] sm:$0xf] %vm631_vm0, %v626_v34  ;;  %v692_v61 = vmul.f32 %v586_v33, %v586_v33  ;;  %v656_v3 = vsel %vm648_vm1, %v586_v33, 0.0  ;;  %v719_v43 = vsel %vm648_vm1, %v696_v30, 0.0 }
  0xd1   : > { %v657_v13 = vadd.f32 %v656_v3, %v655_v7 }
  0xd2   : > { %636 = vst.msk [vmem:[%s1266_s29 + $0x10] sm:$0xf] %vm631_vm0, %v619_v35  ;;  %v556_v36 = vpop.f32.mrf.mxu2  ;;  %v711_v9 = vsel %vm648_vm1, %v692_v61, 0.0 }
  0xd3   : > { %v605_v37 = vpop.f32.mrf.mxu3  ;;  %v712_v19 = vadd.f32 %v711_v9, %v710_v12 }
  0xd4   : > { %v538_v38 = vpop.f32.mrf.mxu0  ;;  %v1302_v40 = vadd.f32 %v605_v37, %v556_v36  ;;  %v664_v37 = vsel %vm648_vm1, %v1270_v8, 0.0 }
  0xd5   : > { %v587_v39 = vpop.f32.mrf.mxu1 }
  0xd6   : > { %v588_v41 = vadd.f32 %v587_v39, %v538_v38  ;;  %v627_v42 = vpack.c.bf16 %v1302_v40, %v1302_v40  ;;  %v697_v38 = vmul.f32 %v1278_v16, %v1278_v16  ;;  %v672_v61 = vsel %vm648_vm1, %v1302_v40, 0.0 }
  0xd8   : > { %v620_v44 = vpack.c.bf16 %v588_v41, %v588_v41  ;;  %644 = vst.msk [vmem:[%s1266_s29 + $0x30] sm:$0xf] %vm631_vm0, %v627_v42  ;;  %v693_v4 = vmul.f32 %v588_v41, %v588_v41  ;;  %v658_v10 = vsel %vm648_vm1, %v588_v41, 0.0  ;;  %v721_v50 = vsel %vm648_vm1, %v697_v38, 0.0 }
  0xd9   : > { %v659_v20 = vadd.f32 %v658_v10, %v657_v13 }
  0xda   : > { %637 = vst.msk [vmem:[%s1266_s29 + $0x14] sm:$0xf] %vm631_vm0, %v620_v44  ;;  %v558_v52 = vpop.f32.mrf.mxu2  ;;  %v713_v14 = vsel %vm648_vm1, %v693_v4, 0.0  ;;  %v666_v44 = vsel %vm648_vm1, %v1278_v16, 0.0 }
  0xdb   : > { %v607_v53 = vpop.f32.mrf.mxu3  ;;  %v714_v27 = vadd.f32 %v713_v14, %v712_v19 }
  0xdc   : > { %v541_v56 = vpop.f32.mrf.mxu0  ;;  %v1315_v58 = vadd.f32 %v607_v53, %v558_v52  ;;  %v699_v52 = vmul.f32 %v1294_v32, %v1294_v32 }
  0xdd   : > { %v590_v57 = vpop.f32.mrf.mxu1 }
  0xde   : > { %v591_v62 = vadd.f32 %v590_v57, %v541_v56  ;;  %v628_v1 = vpack.c.bf16 %v1315_v58, %v1315_v58  ;;  %v670_v56 = vsel %vm648_vm1, %v1294_v32, 0.0  ;;  %v700_v57 = vmul.f32 %v1302_v40, %v1302_v40 }
  0xdf   : > { %v725_v24 = vsel %vm648_vm1, %v699_v52, 0.0  ;;  %v674_v32 = vsel %vm648_vm1, %v1315_v58, 0.0 }
  0xe0   : > { %v621_v5 = vpack.c.bf16 %v591_v62, %v591_v62  ;;  %645 = vst.msk [vmem:[%s1266_s29 + $0x34] sm:$0xf] %vm631_vm0, %v628_v1  ;;  %v694_v11 = vmul.f32 %v591_v62, %v591_v62  ;;  %v660_v15 = vsel %vm648_vm1, %v591_v62, 0.0  ;;  %v701_v62 = vmul.f32 %v1315_v58, %v1315_v58 }
  0xe1   : > { %v661_v28 = vadd.f32 %v660_v15, %v659_v20  ;;  %v727_v1 = vsel %vm648_vm1, %v700_v57, 0.0 }
  0xe2   : > { %638 = vst.msk [vmem:[%s1266_s29 + $0x18] sm:$0xf] %vm631_vm0, %v621_v5  ;;  %v561_v17 = vpop.f32.mrf.mxu2  ;;  %v715_v25 = vsel %vm648_vm1, %v694_v11, 0.0  ;;  %v729_v5 = vsel %vm648_vm1, %v701_v62, 0.0 }
  0xe3   : > { %v610_v18 = vpop.f32.mrf.mxu3  ;;  %v716_v35 = vadd.f32 %v715_v25, %v714_v27 }
  0xe4   : > { %v543_v21 = vpop.f32.mrf.mxu0  ;;  %v611_v23 = vadd.f32 %v610_v18, %v561_v17 }
  0xe5   : > { %v592_v22 = vpop.f32.mrf.mxu1 }
  0xe6   : > { %v593_v26 = vadd.f32 %v592_v22, %v543_v21  ;;  %v629_v29 = vpack.c.bf16 %v611_v23, %v611_v23  ;;  %v702_v2 = vmul.f32 %v611_v23, %v611_v23  ;;  %v676_v6 = vsel %vm648_vm1, %v611_v23, 0.0 }
  0xe8   : > { %v622_v31 = vpack.c.bf16 %v593_v26, %v593_v26  ;;  %v662_v33 = vsel %vm648_vm1, %v593_v26, 0.0  ;;  %v695_v34 = vmul.f32 %v593_v26, %v593_v26  ;;  %646 = vst.msk [vmem:[%s1266_s29 + $0x38] sm:$0xf] %vm631_vm0, %v629_v29  ;;  %v731_v10 = vsel %vm648_vm1, %v702_v2, 0.0 }
  0xe9   : > { %v663_v36 = vadd.f32 %v662_v33, %v661_v28 }
  0xea   : > { %639 = vst.msk [vmem:[%s1266_s29 + $0x1c] sm:$0xf] %vm631_vm0, %v622_v31  ;;  %v717_v39 = vsel %vm648_vm1, %v695_v34, 0.0  ;;  %v563_v46 = vpop.f32.mrf.mxu2 }
  0xeb   : > { %v665_v41 = vadd.f32 %v664_v37, %v663_v36  ;;  %v718_v42 = vadd.f32 %v717_v39, %v716_v35  ;;  %v612_v8 = vpop.f32.mrf.mxu3 }
  0xec   : > { %v613_v49 = vadd.f32 %v612_v8, %v563_v46 }
  0xed   : > { %v667_v47 = vadd.f32 %v666_v44, %v665_v41  ;;  %v720_v48 = vadd.f32 %v719_v43, %v718_v42 }
  0xee   : > { %v630_v16 = vpack.c.bf16 %v613_v49, %v613_v49  ;;  %v703_v7 = vmul.f32 %v613_v49, %v613_v49  ;;  %v678_v11 = vsel %vm648_vm1, %v613_v49, 0.0 }
  0xef   : > { %v669_v53 = vadd.f32 %v668_v51, %v667_v47  ;;  %v722_v54 = vadd.f32 %v721_v50, %v720_v48 }
  0xf0   : > { %647 = vst.msk [vmem:[%s1266_s29 + $0x3c] sm:$0xf] %vm631_vm0, %v630_v16  ;;  %v733_v58 = vsel %vm648_vm1, %v703_v7, 0.0 }
  0xf1   : > { %v724_v59 = vadd.f32 %v723_v55, %v722_v54  ;;  %v671_v60 = vadd.f32 %v670_v56, %v669_v53 }
  0xf3   : > { %v673_v63 = vadd.f32 %v672_v61, %v671_v60  ;;  %v726_v0 = vadd.f32 %v725_v24, %v724_v59 }
  0xf5   : > { %v675_v3 = vadd.f32 %v674_v32, %v673_v63  ;;  %v728_v4 = vadd.f32 %v727_v1, %v726_v0 }
  0xf7   : > { %v677_v9 = vadd.f32 %v676_v6, %v675_v3  ;;  %v730_v40 = vadd.f32 %v729_v5, %v728_v4 }
  0xf9   : > { %v732_v12 = vadd.f32 %v731_v10, %v730_v40  ;;  %v679_v13 = vadd.f32 %v678_v11, %v677_v9 }
  0xfb   : > { %v680_v14 = vrot.slane %v679_v13, 4  ;;  %v734_v15 = vadd.f32 %v733_v58, %v732_v12 }
  0xfd   : > { %v681_v17 = vadd.f32 %v680_v14, %v679_v13  ;;  %v735_v18 = vrot.slane %v734_v15, 4 }
  0xff   : > { %v682_v19 = vrot.slane %v681_v17, 2  ;;  %v736_v20 = vadd.f32 %v735_v18, %v734_v15 }
 0x101   : > { %v683_v21 = vadd.f32 %v682_v19, %v681_v17  ;;  %v737_v22 = vrot.slane %v736_v20, 2 }
 0x103   : > { %v684_v23 = vrot.slane %v683_v21, 1  ;;  %v738_v25 = vadd.f32 %v737_v22, %v736_v20 }
 0x105   : > { %v685_v26 = vadd.f32 %v684_v23, %v683_v21  ;;  %v739_v27 = vrot.slane %v738_v25, 1 }
 0x107   : > { %687 = vst.msk [vmem:[%s286_s6] sm:$0x1] %vm686_vm2, %v685_v26  ;;  %v740_v28 = vadd.f32 %v739_v27, %v738_v25 }
 0x109   : > { %741 = vst.msk [vmem:[%s292_s9] sm:$0x1] %vm686_vm2, %v740_v28 }
 0x10a PF: > { %s15_s17 = sadd.s32 1, %s1152_s17   ;;  %s1396_s15 = smov %s1148_s16 }
 0x10b   : > { %p12_p5 = scmp.ge.s32.totalorder %s15_s17, 6   ;;  %s1397_s16 = smov %s1399_s18 }
 0x10d   :  { %14 = sbr.rel (!%p12_p5) target bundleno = 2 (0x2), region = 85 }

// kernel: generator_forward.8
= control target key start
LH: loop header
LB: loop body
LE: loop exit
PB: predicated region body
PF: predicated region fallthrough
CT: control target
= control target key end

     0   :  { %s1724_s15 = smov 0   ;;  %s1726_s16 = smov 0   ;;  %s2462_s0 = inlined_call_operand.vmem [shape: bf16[4,512,128], index: 0, kind: input, shape index: {}]   ;;  %s2463_s1 = inlined_call_operand.vmem [shape: bf16[4,128,16], index: 1, kind: input, shape index: {}]   ;;  %s2464_s2 = inlined_call_operand.vmem [shape: bf16[4,512,16], index: 2, kind: output, shape index: {0}]   ;;  %s2465_s3 = inlined_call_operand.vmem [shape: f32[4,1,1,16], index: 3, kind: output, shape index: {1}]   ;;  %s2466_s4 = inlined_call_operand.vmem [shape: f32[4,1,1,16], index: 4, kind: output, shape index: {2}]  }
   0x1   :  { %s1728_s17 = smov 0  }
   0x2 LB: > { %s27_s18 = sadd.s32 1, %s1693_s16  ;;  %p1415_p0 = scmp.ge.s32.totalorder %s1697_s17, 1  ;;  %s1697_s17 = sphi %s1728_s17, %s15_s17   ;;  %s1693_s16 = sphi %s1726_s16, %s2468_s16   ;;  %s1689_s15 = sphi %s1724_s15, %s2467_s15  }
   0x3   : > { %p29_p1 = scmp.ge.s32.totalorder %s27_s18, 4  ;;  %p202_p2 = scmp.lt.s32.totalorder %s1697_s17, 5 }
   0x5   : > { %s2470_s18 = smov (%p29_p1, %s27_s18), 0  ;;  %p203_p3 = pnand %p1415_p0, %p202_p2 }
   0x6   : > { %p254_p4 = scmp.lt.s32.totalorder (!%p203_p3), %s1689_s15, 3 }
   0x7   : > { %206 = sbr.rel (%p203_p3) target bundleno = 407 (0x197), region = 28 }
   0xc   : > { %s2472_s15 = smov (!%p254_p4, %s1689_s15), 3  ;;  %vm843_vm0 = vcmask 125952   ;;  %vm908_vm1 = vcmask 130048   ;;  %vm1042_vm2 = vcmask 122880  }
   0xd   : > { %s1585_s19 = sshll.u32 %s2472_s15, 6  ;;  %s1584_s23 = sshll.u32 %s2472_s15, 8 }
   0xe   : > { %s1748_s22 = scalar_lea.vmem %s2463_s1, %s1585_s19  ;;  %s1763_s26 = scalar_lea.vmem %s2462_s0, %s1584_s23 }
   0xf   : > { %v1626_v0 = vld [vmem:[%s1748_s22 + $0x38] sm:$0xff]  ;;  %v1625_v1 = vld [vmem:[%s1748_s22 + $0x30] sm:$0xff]  ;;  %v1624_v2 = vld [vmem:[%s1748_s22 + $0x28] sm:$0xff]  ;;  %s1799_s29 = scalar_lea.vmem %s2464_s2, %s1584_s23  ;;  %s283_s6 = scalar_lea.vmem %s2465_s3, %s2472_s15 }
  0x10   : > { %610 = vmatpush.bf16.msra.mxu0 %v1626_v0  ;;  %1627 = vmatpush.bf16.msra.mxu1 %v1626_v0  ;;  %v1623_v3 = vld [vmem:[%s1748_s22 + $0x20] sm:$0xff]  ;;  %v1622_v4 = vld [vmem:[%s1748_s22 + $0x18] sm:$0xff]  ;;  %v1621_v5 = vld [vmem:[%s1748_s22 + $0x10] sm:$0xff]  ;;  %s289_s9 = scalar_lea.vmem %s2466_s4, %s2472_s15 }
  0x11   : > { %1628 = vmatpush.bf16.msra.mxu2 %v1626_v0  ;;  %1629 = vmatpush.bf16.msra.mxu3 %v1626_v0  ;;  %v1620_v6 = vld [vmem:[%s1748_s22 + $0x8] sm:$0xff]  ;;  %v1619_v7 = vld [vmem:[%s1748_s22] sm:$0xff]  ;;  %v1589_v13 = vld [vmem:[%s1763_s26 + $0x10] sm:$0xff] }
  0x12   : > { %v1587_v8 = vld [vmem:[%s1763_s26] sm:$0xff]  ;;  %v1588_v10 = vld [vmem:[%s1763_s26 + $0x8] sm:$0xff]  ;;  %v1597_v14 = vld [vmem:[%s1763_s26 + $0x50] sm:$0xff] }
  0x13   : > { %v1595_v9 = vld [vmem:[%s1763_s26 + $0x40] sm:$0xff]  ;;  %v1596_v11 = vld [vmem:[%s1763_s26 + $0x48] sm:$0xff]  ;;  %v1590_v16 = vld [vmem:[%s1763_s26 + $0x18] sm:$0xff] }
  0x14   : > { %611 = vmatpush.bf16.msra.mxu0 %v1625_v1  ;;  %1630 = vmatpush.bf16.msra.mxu1 %v1625_v1  ;;  %v1603_v12 = vld [vmem:[%s1763_s26 + $0x80] sm:$0xff]  ;;  %v1604_v15 = vld [vmem:[%s1763_s26 + $0x88] sm:$0xff]  ;;  %v1598_v17 = vld [vmem:[%s1763_s26 + $0x58] sm:$0xff] }
  0x15   : > { %1631 = vmatpush.bf16.msra.mxu2 %v1625_v1  ;;  %1632 = vmatpush.bf16.msra.mxu3 %v1625_v1  ;;  %v1605_v18 = vld [vmem:[%s1763_s26 + $0x90] sm:$0xff]  ;;  %v1611_v19 = vld [vmem:[%s1763_s26 + $0xc0] sm:$0xff]  ;;  %v1606_v22 = vld [vmem:[%s1763_s26 + $0x98] sm:$0xff] }
  0x16   : > { %v1591_v20 = vld [vmem:[%s1763_s26 + $0x20] sm:$0xff]  ;;  %v1612_v23 = vld [vmem:[%s1763_s26 + $0xc8] sm:$0xff]  ;;  %v1613_v27 = vld [vmem:[%s1763_s26 + $0xd0] sm:$0xff] }
  0x17   : > { %v1599_v21 = vld [vmem:[%s1763_s26 + $0x60] sm:$0xff]  ;;  %v1592_v24 = vld [vmem:[%s1763_s26 + $0x28] sm:$0xff]  ;;  %v1593_v28 = vld [vmem:[%s1763_s26 + $0x30] sm:$0xff] }
  0x18   : > { %612 = vmatpush.bf16.msra.mxu0 %v1624_v2  ;;  %1633 = vmatpush.bf16.msra.mxu1 %v1624_v2  ;;  %v1600_v25 = vld [vmem:[%s1763_s26 + $0x68] sm:$0xff]  ;;  %v1607_v26 = vld [vmem:[%s1763_s26 + $0xa0] sm:$0xff]  ;;  %v1601_v29 = vld [vmem:[%s1763_s26 + $0x70] sm:$0xff] }
  0x19   : > { %1634 = vmatpush.bf16.msra.mxu2 %v1624_v2  ;;  %1635 = vmatpush.bf16.msra.mxu3 %v1624_v2  ;;  %v1608_v30 = vld [vmem:[%s1763_s26 + $0xa8] sm:$0xff]  ;;  %v1614_v31 = vld [vmem:[%s1763_s26 + $0xd8] sm:$0xff]  ;;  %v1609_v34 = vld [vmem:[%s1763_s26 + $0xb0] sm:$0xff] }
  0x1a   : > { %v1594_v32 = vld [vmem:[%s1763_s26 + $0x38] sm:$0xff]  ;;  %v1615_v35 = vld [vmem:[%s1763_s26 + $0xe0] sm:$0xff]  ;;  %v1616_v41 = vld [vmem:[%s1763_s26 + $0xe8] sm:$0xff] }
  0x1b   : > { %v1602_v33 = vld [vmem:[%s1763_s26 + $0x78] sm:$0xff]  ;;  %v1617_v62 = vld [vmem:[%s1763_s26 + $0xf0] sm:$0xff] }
  0x1c   : > { %613 = vmatpush.bf16.msra.mxu0 %v1623_v3  ;;  %1636 = vmatpush.bf16.msra.mxu1 %v1623_v3  ;;  %v1610_v40 = vld [vmem:[%s1763_s26 + $0xb8] sm:$0xff] }
  0x1d   : > { %1637 = vmatpush.bf16.msra.mxu2 %v1623_v3  ;;  %1638 = vmatpush.bf16.msra.mxu3 %v1623_v3 }
  0x20   : > { %614 = vmatpush.bf16.msra.mxu0 %v1622_v4  ;;  %1639 = vmatpush.bf16.msra.mxu1 %v1622_v4 }
  0x21   : > { %1640 = vmatpush.bf16.msra.mxu2 %v1622_v4  ;;  %1641 = vmatpush.bf16.msra.mxu3 %v1622_v4 }
  0x24   : > { %615 = vmatpush.bf16.msra.mxu0 %v1621_v5  ;;  %1642 = vmatpush.bf16.msra.mxu1 %v1621_v5 }
  0x25   : > { %1643 = vmatpush.bf16.msra.mxu2 %v1621_v5  ;;  %1644 = vmatpush.bf16.msra.mxu3 %v1621_v5 }
  0x28   : > { %616 = vmatpush.bf16.msra.mxu0 %v1620_v6  ;;  %1645 = vmatpush.bf16.msra.mxu1 %v1620_v6 }
  0x29   : > { %1646 = vmatpush.bf16.msra.mxu2 %v1620_v6  ;;  %1647 = vmatpush.bf16.msra.mxu3 %v1620_v6 }
  0x2c   : > { %617 = vmatpush.bf16.msra.mxu0 %v1619_v7  ;;  %1648 = vmatpush.bf16.msra.mxu1 %v1619_v7 }
  0x2d   : > { %1649 = vmatpush.bf16.msra.mxu2 %v1619_v7  ;;  %1650 = vmatpush.bf16.msra.mxu3 %v1619_v7 }
  0x2f   : > { %618 = vmatmul.bf16.vlgmr.msra.gmra.mxu0 %v1587_v8  ;;  %658 = vmatmul.bf16.vlgmr.msra.gmra.mxu1 %v1595_v9 }
  0x30   : > { %698 = vmatmul.bf16.vlgmr.msra.gmra.mxu2 %v1603_v12  ;;  %738 = vmatmul.bf16.vlgmr.msra.gmra.mxu3 %v1611_v19 }
  0x3f   : > { %623 = vmatmul.bf16.gmra.mxu0 %v1588_v10  ;;  %663 = vmatmul.bf16.gmra.mxu1 %v1596_v11 }
  0x40   : > { %703 = vmatmul.bf16.gmra.mxu2 %v1604_v15  ;;  %743 = vmatmul.bf16.gmra.mxu3 %v1612_v23 }
  0x4f   : > { %628 = vmatmul.bf16.gmra.mxu0 %v1589_v13  ;;  %668 = vmatmul.bf16.gmra.mxu1 %v1597_v14 }
  0x50   : > { %708 = vmatmul.bf16.gmra.mxu2 %v1605_v18  ;;  %748 = vmatmul.bf16.gmra.mxu3 %v1613_v27 }
  0x5f   : > { %633 = vmatmul.bf16.gmra.mxu0 %v1590_v16  ;;  %673 = vmatmul.bf16.gmra.mxu1 %v1598_v17 }
  0x60   : > { %713 = vmatmul.bf16.gmra.mxu2 %v1606_v22  ;;  %753 = vmatmul.bf16.gmra.mxu3 %v1614_v31 }
  0x6f   : > { %638 = vmatmul.bf16.gmra.mxu0 %v1591_v20  ;;  %678 = vmatmul.bf16.gmra.mxu1 %v1599_v21  ;;  %v1618_v21 = vld [vmem:[%s1763_s26 + $0xf8] sm:$0xff] }
  0x70   : > { %718 = vmatmul.bf16.gmra.mxu2 %v1607_v26  ;;  %758 = vmatmul.bf16.gmra.mxu3 %v1615_v35 }
  0x7f   : > { %643 = vmatmul.bf16.gmra.mxu0 %v1592_v24  ;;  %683 = vmatmul.bf16.gmra.mxu1 %v1600_v25 }
  0x80   : > { %723 = vmatmul.bf16.gmra.mxu2 %v1608_v30  ;;  %763 = vmatmul.bf16.gmra.mxu3 %v1616_v41 }
  0x8f   : > { %648 = vmatmul.bf16.gmra.mxu0 %v1593_v28  ;;  %688 = vmatmul.bf16.gmra.mxu1 %v1601_v29 }
  0x90   : > { %728 = vmatmul.bf16.gmra.mxu2 %v1609_v34  ;;  %768 = vmatmul.bf16.gmra.mxu3 %v1617_v62 }
  0x9f   : > { %653 = vmatmul.bf16.gmra.mxu0 %v1594_v32  ;;  %693 = vmatmul.bf16.gmra.mxu1 %v1602_v33 }
  0xa0   : > { %733 = vmatmul.bf16.gmra.mxu2 %v1610_v40  ;;  %773 = vmatmul.bf16.gmra.mxu3 %v1618_v21 }
  0xac   : > { %v619_v36 = vpop.f32.mrf.mxu0  ;;  %v1801_v37 = vpop.f32.mrf.mxu1 }
  0xad   : > { %v779_v38 = vpack.c.bf16 %v619_v36, %v619_v36  ;;  %v795_v39 = vpack.c.bf16 %v1801_v37, %v1801_v37  ;;  %v1044_v42 = vmul.f32 %v619_v36, %v619_v36  ;;  %v909_v43 = vsel %vm908_vm1, %v619_v36, 0.0 }
  0xaf   : > { %844 = vst.msk [vmem:[%s1799_s29] sm:$0xf] %vm843_vm0, %v779_v38  ;;  %v1108_v51 = vsel %vm908_vm1, %v1044_v42, 0.0 }
  0xb0   : > { %860 = vst.msk [vmem:[%s1799_s29 + $0x40] sm:$0xf] %vm843_vm0, %v795_v39 }
  0xb3   : > { %v1839_v6 = vpop.f32.mrf.mxu2  ;;  %v1917_v41 = vpop.f32.mrf.mxu3 }
  0xb4   : > { %v621_v44 = vpop.f32.mrf.mxu0  ;;  %v1812_v45 = vpop.f32.mrf.mxu1  ;;  %v811_v10 = vpack.c.bf16 %v1839_v6, %v1839_v6 }
  0xb5   : > { %v780_v46 = vpack.c.bf16 %v621_v44, %v621_v44  ;;  %v910_v47 = vsel %vm908_vm1, %v621_v44, 0.0  ;;  %v1045_v48 = vmul.f32 %v621_v44, %v621_v44  ;;  %v796_v49 = vpack.c.bf16 %v1812_v45, %v1812_v45 }
  0xb6   : > { %v911_v50 = vadd.f32 %v910_v47, %v909_v43  ;;  %876 = vst.msk [vmem:[%s1799_s29 + $0x80] sm:$0xf] %vm843_vm0, %v811_v10  ;;  %v827_v43 = vpack.c.bf16 %v1917_v41, %v1917_v41 }
  0xb7   : > { %845 = vst.msk [vmem:[%s1799_s29 + $0x4] sm:$0xf] %vm843_vm0, %v780_v46  ;;  %v1109_v52 = vsel %vm908_vm1, %v1045_v48, 0.0 }
  0xb8   : > { %v1110_v53 = vadd.f32 %v1109_v52, %v1108_v51  ;;  %861 = vst.msk [vmem:[%s1799_s29 + $0x44] sm:$0xf] %vm843_vm0, %v796_v49 }
  0xb9   : > { %892 = vst.msk [vmem:[%s1799_s29 + $0xc0] sm:$0xf] %vm843_vm0, %v827_v43 }
  0xbb   : > { %v1855_v17 = vpop.f32.mrf.mxu2 }
  0xbc   : > { %v624_v54 = vpop.f32.mrf.mxu0  ;;  %v1823_v55 = vpop.f32.mrf.mxu1  ;;  %v812_v19 = vpack.c.bf16 %v1855_v17, %v1855_v17 }
  0xbd   : > { %v781_v56 = vpack.c.bf16 %v624_v54, %v624_v54  ;;  %v912_v57 = vsel %vm908_vm1, %v624_v54, 0.0  ;;  %v1046_v58 = vmul.f32 %v624_v54, %v624_v54  ;;  %v797_v59 = vpack.c.bf16 %v1823_v55, %v1823_v55 }
  0xbe   : > { %v913_v60 = vadd.f32 %v912_v57, %v911_v50  ;;  %877 = vst.msk [vmem:[%s1799_s29 + $0x84] sm:$0xf] %vm843_vm0, %v812_v19  ;;  %v1941_v50 = vpop.f32.mrf.mxu3 }
  0xbf   : > { %846 = vst.msk [vmem:[%s1799_s29 + $0x8] sm:$0xf] %vm843_vm0, %v781_v56  ;;  %v1111_v61 = vsel %vm908_vm1, %v1046_v58, 0.0  ;;  %v828_v52 = vpack.c.bf16 %v1941_v50, %v1941_v50 }
  0xc0   : > { %v1112_v63 = vadd.f32 %v1111_v61, %v1110_v53  ;;  %862 = vst.msk [vmem:[%s1799_s29 + $0x48] sm:$0xf] %vm843_vm0, %v797_v59 }
  0xc1   : > { %893 = vst.msk [vmem:[%s1799_s29 + $0xc4] sm:$0xf] %vm843_vm0, %v828_v52 }
  0xc3   : > { %v1879_v27 = vpop.f32.mrf.mxu2 }
  0xc4   : > { %v626_v0 = vpop.f32.mrf.mxu0  ;;  %v1834_v1 = vpop.f32.mrf.mxu1  ;;  %v813_v28 = vpack.c.bf16 %v1879_v27, %v1879_v27 }
  0xc5   : > { %v782_v2 = vpack.c.bf16 %v626_v0, %v626_v0  ;;  %v914_v3 = vsel %vm908_vm1, %v626_v0, 0.0  ;;  %v1047_v4 = vmul.f32 %v626_v0, %v626_v0  ;;  %v798_v5 = vpack.c.bf16 %v1834_v1, %v1834_v1 }
  0xc6   : > { %v915_v7 = vadd.f32 %v914_v3, %v913_v60  ;;  %878 = vst.msk [vmem:[%s1799_s29 + $0x88] sm:$0xf] %vm843_vm0, %v813_v28  ;;  %v1965_v59 = vpop.f32.mrf.mxu3 }
  0xc7   : > { %847 = vst.msk [vmem:[%s1799_s29 + $0xc] sm:$0xf] %vm843_vm0, %v782_v2  ;;  %v1113_v8 = vsel %vm908_vm1, %v1047_v4, 0.0  ;;  %v829_v61 = vpack.c.bf16 %v1965_v59, %v1965_v59 }
  0xc8   : > { %v1114_v9 = vadd.f32 %v1113_v8, %v1112_v63  ;;  %863 = vst.msk [vmem:[%s1799_s29 + $0x4c] sm:$0xf] %vm843_vm0, %v798_v5 }
  0xc9   : > { %894 = vst.msk [vmem:[%s1799_s29 + $0xc8] sm:$0xf] %vm843_vm0, %v829_v61 }
  0xcb   : > { %v1897_v33 = vpop.f32.mrf.mxu2 }
  0xcc   : > { %v629_v11 = vpop.f32.mrf.mxu0  ;;  %v1850_v12 = vpop.f32.mrf.mxu1  ;;  %v814_v34 = vpack.c.bf16 %v1897_v33, %v1897_v33 }
  0xcd   : > { %v783_v13 = vpack.c.bf16 %v629_v11, %v629_v11  ;;  %v916_v14 = vsel %vm908_vm1, %v629_v11, 0.0  ;;  %v1048_v15 = vmul.f32 %v629_v11, %v629_v11  ;;  %v799_v16 = vpack.c.bf16 %v1850_v12, %v1850_v12 }
  0xce   : > { %v1857_v18 = vadd.f32 %v916_v14, %v915_v7  ;;  %879 = vst.msk [vmem:[%s1799_s29 + $0x8c] sm:$0xf] %vm843_vm0, %v814_v34  ;;  %v1989_v4 = vpop.f32.mrf.mxu3 }
  0xcf   : > { %848 = vst.msk [vmem:[%s1799_s29 + $0x10] sm:$0xf] %vm843_vm0, %v783_v13  ;;  %v1115_v20 = vsel %vm908_vm1, %v1048_v15, 0.0  ;;  %v830_v7 = vpack.c.bf16 %v1989_v4, %v1989_v4 }
  0xd0   : > { %v1865_v22 = vadd.f32 %v1115_v20, %v1114_v9  ;;  %864 = vst.msk [vmem:[%s1799_s29 + $0x50] sm:$0xf] %vm843_vm0, %v799_v16 }
  0xd1   : > { %895 = vst.msk [vmem:[%s1799_s29 + $0xcc] sm:$0xf] %vm843_vm0, %v830_v7 }
  0xd3   : > { %v1915_v40 = vpop.f32.mrf.mxu2 }
  0xd4   : > { %v1871_v23 = vpop.f32.mrf.mxu0  ;;  %v1873_v24 = vpop.f32.mrf.mxu1  ;;  %v815_v42 = vpack.c.bf16 %v1915_v40, %v1915_v40 }
  0xd5   : > { %v784_v25 = vpack.c.bf16 %v1871_v23, %v1871_v23  ;;  %v800_v26 = vpack.c.bf16 %v1873_v24, %v1873_v24  ;;  %v1049_v19 = vmul.f32 %v1871_v23, %v1871_v23 }
  0xd6   : > { %880 = vst.msk [vmem:[%s1799_s29 + $0x90] sm:$0xf] %vm843_vm0, %v815_v42  ;;  %v2009_v14 = vpop.f32.mrf.mxu3 }
  0xd7   : > { %849 = vst.msk [vmem:[%s1799_s29 + $0x14] sm:$0xf] %vm843_vm0, %v784_v25  ;;  %v831_v34 = vpack.c.bf16 %v2009_v14, %v2009_v14 }
  0xd8   : > { %865 = vst.msk [vmem:[%s1799_s29 + $0x54] sm:$0xf] %vm843_vm0, %v800_v26 }
  0xd9   : > { %896 = vst.msk [vmem:[%s1799_s29 + $0xd0] sm:$0xf] %vm843_vm0, %v831_v34 }
  0xdb   : > { %v1939_v49 = vpop.f32.mrf.mxu2 }
  0xdc   : > { %v1889_v29 = vpop.f32.mrf.mxu0  ;;  %v1891_v30 = vpop.f32.mrf.mxu1  ;;  %v816_v51 = vpack.c.bf16 %v1939_v49, %v1939_v49 }
  0xdd   : > { %v785_v31 = vpack.c.bf16 %v1889_v29, %v1889_v29  ;;  %v801_v32 = vpack.c.bf16 %v1891_v30, %v1891_v30 }
  0xde   : > { %881 = vst.msk [vmem:[%s1799_s29 + $0x94] sm:$0xf] %vm843_vm0, %v816_v51  ;;  %v2023_v26 = vpop.f32.mrf.mxu3 }
  0xdf   : > { %850 = vst.msk [vmem:[%s1799_s29 + $0x18] sm:$0xf] %vm843_vm0, %v785_v31  ;;  %v918_v31 = vsel %vm908_vm1, %v1871_v23, 0.0  ;;  %v920_v23 = vsel %vm908_vm1, %v1889_v29, 0.0 }
  0xe0   : > { %866 = vst.msk [vmem:[%s1799_s29 + $0x58] sm:$0xf] %vm843_vm0, %v801_v32  ;;  %v1050_v32 = vmul.f32 %v1889_v29, %v1889_v29  ;;  %v919_v43 = vadd.f32 %v918_v31, %v1857_v18 }
  0xe3   : > { %v1963_v58 = vpop.f32.mrf.mxu2 }
  0xe4   : > { %v1907_v35 = vpop.f32.mrf.mxu0  ;;  %v1909_v36 = vpop.f32.mrf.mxu1  ;;  %v817_v60 = vpack.c.bf16 %v1963_v58, %v1963_v58 }
  0xe5   : > { %v786_v38 = vpack.c.bf16 %v1907_v35, %v1907_v35  ;;  %v802_v39 = vpack.c.bf16 %v1909_v36, %v1909_v36  ;;  %v922_v51 = vsel %vm908_vm1, %v1907_v35, 0.0 }
  0xe6   : > { %882 = vst.msk [vmem:[%s1799_s29 + $0x98] sm:$0xf] %vm843_vm0, %v817_v60 }
  0xe7   : > { %851 = vst.msk [vmem:[%s1799_s29 + $0x1c] sm:$0xf] %vm843_vm0, %v786_v38  ;;  %v1051_v38 = vmul.f32 %v1907_v35, %v1907_v35 }
  0xe8   : > { %867 = vst.msk [vmem:[%s1799_s29 + $0x5c] sm:$0xf] %vm843_vm0, %v802_v39  ;;  %v1117_v39 = vsel %vm908_vm1, %v1049_v19, 0.0 }
  0xe9   : > { %v1118_v52 = vadd.f32 %v1117_v39, %v1865_v22  ;;  %v1121_v18 = vsel %vm908_vm1, %v1051_v38, 0.0 }
  0xeb   : > { %v1987_v3 = vpop.f32.mrf.mxu2 }
  0xec   : > { %v1931_v44 = vpop.f32.mrf.mxu0  ;;  %v1933_v46 = vpop.f32.mrf.mxu1  ;;  %v818_v5 = vpack.c.bf16 %v1987_v3, %v1987_v3 }
  0xed   : > { %v787_v47 = vpack.c.bf16 %v1931_v44, %v1931_v44  ;;  %v803_v48 = vpack.c.bf16 %v1933_v46, %v1933_v46  ;;  %v1052_v29 = vmul.f32 %v1931_v44, %v1931_v44  ;;  %v924_v35 = vsel %vm908_vm1, %v1931_v44, 0.0 }
  0xee   : > { %883 = vst.msk [vmem:[%s1799_s29 + $0x9c] sm:$0xf] %vm843_vm0, %v818_v5  ;;  %v2072_v5 = vpop.f32.mrf.mxu3 }
  0xef   : > { %852 = vst.msk [vmem:[%s1799_s29 + $0x20] sm:$0xf] %vm843_vm0, %v787_v47  ;;  %v832_v47 = vpack.c.bf16 %v2023_v26, %v2023_v26 }
  0xf0   : > { %868 = vst.msk [vmem:[%s1799_s29 + $0x60] sm:$0xf] %vm843_vm0, %v803_v48  ;;  %v1119_v48 = vsel %vm908_vm1, %v1050_v32, 0.0 }
  0xf1   : > { %897 = vst.msk [vmem:[%s1799_s29 + $0xd4] sm:$0xf] %vm843_vm0, %v832_v47  ;;  %v1120_v7 = vadd.f32 %v1119_v48, %v1118_v52 }
  0xf3   : > { %v2007_v13 = vpop.f32.mrf.mxu2 }
  0xf4   : > { %v1955_v53 = vpop.f32.mrf.mxu0  ;;  %v1957_v54 = vpop.f32.mrf.mxu1  ;;  %v819_v28 = vpack.c.bf16 %v2007_v13, %v2007_v13 }
  0xf5   : > { %v788_v56 = vpack.c.bf16 %v1955_v53, %v1955_v53  ;;  %v804_v57 = vpack.c.bf16 %v1957_v54, %v1957_v54  ;;  %v1053_v61 = vmul.f32 %v1955_v53, %v1955_v53  ;;  %v926_v19 = vsel %vm908_vm1, %v1955_v53, 0.0 }
  0xf6   : > { %884 = vst.msk [vmem:[%s1799_s29 + $0xa0] sm:$0xf] %vm843_vm0, %v819_v28 }
  0xf7   : > { %853 = vst.msk [vmem:[%s1799_s29 + $0x24] sm:$0xf] %vm843_vm0, %v788_v56  ;;  %v921_v56 = vadd.f32 %v920_v23, %v919_v43  ;;  %v1125_v31 = vsel %vm908_vm1, %v1053_v61, 0.0 }
  0xf8   : > { %869 = vst.msk [vmem:[%s1799_s29 + $0x64] sm:$0xf] %vm843_vm0, %v804_v57 }
  0xfb   : > { %v2021_v25 = vpop.f32.mrf.mxu2 }
  0xfc   : > { %v1979_v62 = vpop.f32.mrf.mxu0  ;;  %v1981_v63 = vpop.f32.mrf.mxu1  ;;  %v820_v42 = vpack.c.bf16 %v2021_v25, %v2021_v25 }
  0xfd   : > { %v789_v0 = vpack.c.bf16 %v1979_v62, %v1979_v62  ;;  %v805_v2 = vpack.c.bf16 %v1981_v63, %v1981_v63  ;;  %v1054_v44 = vmul.f32 %v1979_v62, %v1979_v62  ;;  %v928_v32 = vsel %vm908_vm1, %v1979_v62, 0.0 }
  0xfe   : > { %885 = vst.msk [vmem:[%s1799_s29 + $0xa4] sm:$0xf] %vm843_vm0, %v820_v42 }
  0xff   : > { %854 = vst.msk [vmem:[%s1799_s29 + $0x28] sm:$0xf] %vm843_vm0, %v789_v0  ;;  %v1127_v39 = vsel %vm908_vm1, %v1054_v44, 0.0 }
 0x100   : > { %870 = vst.msk [vmem:[%s1799_s29 + $0x68] sm:$0xf] %vm843_vm0, %v805_v2 }
 0x103   : > { %v2070_v2 = vpop.f32.mrf.mxu2 }
 0x104   : > { %v646_v8 = vpop.f32.mrf.mxu0  ;;  %v2003_v9 = vpop.f32.mrf.mxu1 }
 0x105   : > { %v790_v10 = vpack.c.bf16 %v646_v8, %v646_v8  ;;  %v806_v11 = vpack.c.bf16 %v2003_v9, %v2003_v9  ;;  %v1055_v28 = vmul.f32 %v646_v8, %v646_v8  ;;  %v930_v53 = vsel %vm908_vm1, %v646_v8, 0.0  ;;  %v2096_v8 = vpop.f32.mrf.mxu3 }
 0x107   : > { %855 = vst.msk [vmem:[%s1799_s29 + $0x2c] sm:$0xf] %vm843_vm0, %v790_v10  ;;  %v923_v10 = vadd.f32 %v922_v51, %v921_v56  ;;  %v1129_v47 = vsel %vm908_vm1, %v1055_v28, 0.0 }
 0x108   : > { %871 = vst.msk [vmem:[%s1799_s29 + $0x6c] sm:$0xf] %vm843_vm0, %v806_v11  ;;  %v1123_v11 = vsel %vm908_vm1, %v1052_v29, 0.0 }
 0x10c   : > { %v649_v15 = vpop.f32.mrf.mxu0  ;;  %v2015_v16 = vpop.f32.mrf.mxu1 }
 0x10d   : > { %v791_v20 = vpack.c.bf16 %v649_v15, %v649_v15  ;;  %v807_v21 = vpack.c.bf16 %v2015_v16, %v2015_v16  ;;  %v1056_v23 = vmul.f32 %v649_v15, %v649_v15  ;;  %v932_v29 = vsel %vm908_vm1, %v649_v15, 0.0 }
 0x10f   : > { %856 = vst.msk [vmem:[%s1799_s29 + $0x30] sm:$0xf] %vm843_vm0, %v791_v20  ;;  %v1122_v20 = vadd.f32 %v1121_v18, %v1120_v7  ;;  %v2094_v18 = vpop.f32.mrf.mxu2 }
 0x110   : > { %872 = vst.msk [vmem:[%s1799_s29 + $0x70] sm:$0xf] %vm843_vm0, %v807_v21  ;;  %v925_v21 = vadd.f32 %v924_v35, %v923_v10  ;;  %v833_v10 = vpack.c.bf16 %v2072_v5, %v2072_v5 }
 0x111   : > { %v1124_v34 = vadd.f32 %v1123_v11, %v1122_v20 }
 0x112   : > { %v927_v38 = vadd.f32 %v926_v19, %v925_v21  ;;  %898 = vst.msk [vmem:[%s1799_s29 + $0xd8] sm:$0xf] %vm843_vm0, %v833_v10 }
 0x113   : > { %v1126_v42 = vadd.f32 %v1125_v31, %v1124_v34  ;;  %v834_v31 = vpack.c.bf16 %v2096_v8, %v2096_v8  ;;  %v1060_v34 = vmul.f32 %v1801_v37, %v1801_v37 }
 0x114   : > { %v651_v57 = vpop.f32.mrf.mxu0  ;;  %v2060_v60 = vpop.f32.mrf.mxu1  ;;  %v929_v43 = vadd.f32 %v928_v32, %v927_v38 }
 0x115   : > { %v792_v0 = vpack.c.bf16 %v651_v57, %v651_v57  ;;  %v808_v22 = vpack.c.bf16 %v2060_v60, %v2060_v60  ;;  %v1057_v52 = vmul.f32 %v651_v57, %v651_v57  ;;  %v1128_v35 = vadd.f32 %v1127_v39, %v1126_v42  ;;  %899 = vst.msk [vmem:[%s1799_s29 + $0xdc] sm:$0xf] %vm843_vm0, %v834_v31 }
 0x116   : > { %v931_v61 = vadd.f32 %v930_v53, %v929_v43  ;;  %v934_v15 = vsel %vm908_vm1, %v651_v57, 0.0  ;;  %v822_v57 = vpack.c.bf16 %v2094_v18, %v2094_v18  ;;  %v1139_v10 = vsel %vm908_vm1, %v1060_v34, 0.0 }
 0x117   : > { %857 = vst.msk [vmem:[%s1799_s29 + $0x34] sm:$0xf] %vm843_vm0, %v792_v0  ;;  %v821_v0 = vpack.c.bf16 %v2070_v2, %v2070_v2  ;;  %v1130_v11 = vadd.f32 %v1129_v47, %v1128_v35  ;;  %v1133_v44 = vsel %vm908_vm1, %v1057_v52, 0.0  ;;  %v2132_v52 = vpop.f32.mrf.mxu3  ;;  %v940_v35 = vsel %vm908_vm1, %v1801_v37, 0.0 }
 0x118   : > { %873 = vst.msk [vmem:[%s1799_s29 + $0x74] sm:$0xf] %vm843_vm0, %v808_v22  ;;  %v1131_v22 = vsel %vm908_vm1, %v1056_v23, 0.0  ;;  %v933_v19 = vadd.f32 %v932_v29, %v931_v61  ;;  %v2130_v29 = vpop.f32.mrf.mxu2  ;;  %v1061_v61 = vmul.f32 %v1812_v45, %v1812_v45 }
 0x119   : > { %886 = vst.msk [vmem:[%s1799_s29 + $0xa8] sm:$0xf] %vm843_vm0, %v821_v0  ;;  %v1132_v21 = vadd.f32 %v1131_v22, %v1130_v11  ;;  %v1062_v22 = vmul.f32 %v1823_v55, %v1823_v55  ;;  %v942_v11 = vsel %vm908_vm1, %v1812_v45, 0.0  ;;  %v1064_v45 = vmul.f32 %v1850_v12, %v1850_v12 }
 0x11a   : > { %v935_v28 = vadd.f32 %v934_v15, %v933_v19  ;;  %887 = vst.msk [vmem:[%s1799_s29 + $0xac] sm:$0xf] %vm843_vm0, %v822_v57  ;;  %v1063_v57 = vmul.f32 %v1834_v1, %v1834_v1  ;;  %v823_v34 = vpack.c.bf16 %v2130_v29, %v2130_v29 }
 0x11b   : > { %v1134_v38 = vadd.f32 %v1133_v44, %v1132_v21  ;;  %v1141_v44 = vsel %vm908_vm1, %v1061_v61, 0.0  ;;  %v1143_v21 = vsel %vm908_vm1, %v1062_v22, 0.0  ;;  %v1147_v61 = vsel %vm908_vm1, %v1064_v45, 0.0 }
 0x11c   : > { %v654_v48 = vpop.f32.mrf.mxu0  ;;  %v2089_v51 = vpop.f32.mrf.mxu1  ;;  %888 = vst.msk [vmem:[%s1799_s29 + $0xb0] sm:$0xf] %vm843_vm0, %v823_v34  ;;  %v1069_v45 = vmul.f32 %v1957_v54, %v1957_v54 }
 0x11d   : > { %v793_v62 = vpack.c.bf16 %v654_v48, %v654_v48  ;;  %v809_v56 = vpack.c.bf16 %v2089_v51, %v2089_v51  ;;  %v1058_v7 = vmul.f32 %v654_v48, %v654_v48  ;;  %v936_v20 = vsel %vm908_vm1, %v654_v48, 0.0 }
 0x11e   : > { %v937_v39 = vadd.f32 %v936_v20, %v935_v28  ;;  %v944_v20 = vsel %vm908_vm1, %v1823_v55, 0.0  ;;  %v835_v55 = vpack.c.bf16 %v2132_v52, %v2132_v52 }
 0x11f   : > { %858 = vst.msk [vmem:[%s1799_s29 + $0x38] sm:$0xf] %vm843_vm0, %v793_v62  ;;  %v1135_v32 = vsel %vm908_vm1, %v1058_v7, 0.0 }
 0x120   : > { %874 = vst.msk [vmem:[%s1799_s29 + $0x78] sm:$0xf] %vm843_vm0, %v809_v56  ;;  %v1136_v62 = vadd.f32 %v1135_v32, %v1134_v38  ;;  %v946_v32 = vsel %vm908_vm1, %v1834_v1, 0.0  ;;  %v2162_v38 = vpop.f32.mrf.mxu2  ;;  %v948_v1 = vsel %vm908_vm1, %v1850_v12, 0.0  ;;  %v950_v12 = vsel %vm908_vm1, %v1873_v24, 0.0 }
 0x121   : > { %900 = vst.msk [vmem:[%s1799_s29 + $0xe0] sm:$0xf] %vm843_vm0, %v835_v55 }
 0x124   : > { %v656_v53 = vpop.f32.mrf.mxu0  ;;  %v2123_v23 = vpop.f32.mrf.mxu1 }
 0x125   : > { %v794_v42 = vpack.c.bf16 %v656_v53, %v656_v53  ;;  %v938_v43 = vsel %vm908_vm1, %v656_v53, 0.0  ;;  %v1059_v47 = vmul.f32 %v656_v53, %v656_v53  ;;  %v810_v48 = vpack.c.bf16 %v2123_v23, %v2123_v23 }
 0x126   : > { %v939_v56 = vadd.f32 %v938_v43, %v937_v39  ;;  %v2164_v39 = vpop.f32.mrf.mxu3  ;;  %v1145_v43 = vsel %vm908_vm1, %v1063_v57, 0.0 }
 0x127   : > { %859 = vst.msk [vmem:[%s1799_s29 + $0x3c] sm:$0xf] %vm843_vm0, %v794_v42  ;;  %v1137_v0 = vsel %vm908_vm1, %v1059_v47, 0.0  ;;  %v1065_v47 = vmul.f32 %v1873_v24, %v1873_v24 }
 0x128   : > { %v941_v15 = vadd.f32 %v940_v35, %v939_v56  ;;  %v1138_v7 = vadd.f32 %v1137_v0, %v1136_v62  ;;  %875 = vst.msk [vmem:[%s1799_s29 + $0x7c] sm:$0xf] %vm843_vm0, %v810_v48  ;;  %v824_v48 = vpack.c.bf16 %v2162_v38, %v2162_v38  ;;  %v836_v35 = vpack.c.bf16 %v2164_v39, %v2164_v39  ;;  %v2198_v57 = vpop.f32.mrf.mxu2 }
 0x129   : > { %v1066_v0 = vmul.f32 %v1891_v30, %v1891_v30 }
 0x12a   : > { %v943_v37 = vadd.f32 %v942_v11, %v941_v15  ;;  %v1140_v19 = vadd.f32 %v1139_v10, %v1138_v7  ;;  %889 = vst.msk [vmem:[%s1799_s29 + $0xb4] sm:$0xf] %vm843_vm0, %v824_v48  ;;  %v1149_v7 = vsel %vm908_vm1, %v1065_v47, 0.0  ;;  %v952_v10 = vsel %vm908_vm1, %v1891_v30, 0.0 }
 0x12b   : > { %901 = vst.msk [vmem:[%s1799_s29 + $0xe4] sm:$0xf] %vm843_vm0, %v836_v35  ;;  %v1067_v11 = vmul.f32 %v1909_v36, %v1909_v36  ;;  %v1151_v24 = vsel %vm908_vm1, %v1066_v0, 0.0  ;;  %v1157_v47 = vsel %vm908_vm1, %v1069_v45, 0.0  ;;  %v1071_v48 = vmul.f32 %v2003_v9, %v2003_v9 }
 0x12c   : > { %v945_v28 = vadd.f32 %v944_v20, %v943_v37  ;;  %v1142_v31 = vadd.f32 %v1141_v44, %v1140_v19  ;;  %v954_v44 = vsel %vm908_vm1, %v1909_v36, 0.0  ;;  %v1068_v20 = vmul.f32 %v1933_v46, %v1933_v46 }
 0x12d   : > { %v1153_v30 = vsel %vm908_vm1, %v1067_v11, 0.0  ;;  %v1070_v36 = vmul.f32 %v1981_v63, %v1981_v63  ;;  %v1073_v11 = vmul.f32 %v2060_v60, %v2060_v60  ;;  %v968_v45 = vsel %vm908_vm1, %v2089_v51, 0.0 }
 0x12e   : > { %v947_v53 = vadd.f32 %v946_v32, %v945_v28  ;;  %v1144_v42 = vadd.f32 %v1143_v21, %v1142_v31  ;;  %v2200_v21 = vpop.f32.mrf.mxu3  ;;  %v956_v32 = vsel %vm908_vm1, %v1933_v46, 0.0  ;;  %v960_v46 = vsel %vm908_vm1, %v1981_v63, 0.0 }
 0x12f   : > { %v837_v63 = vpack.c.bf16 %v2200_v21, %v2200_v21 }
 0x130   : > { %v949_v62 = vadd.f32 %v948_v1, %v947_v53  ;;  %v1146_v56 = vadd.f32 %v1145_v43, %v1144_v42  ;;  %v1155_v53 = vsel %vm908_vm1, %v1068_v20, 0.0  ;;  %v958_v42 = vsel %vm908_vm1, %v1957_v54, 0.0  ;;  %v2226_v0 = vpop.f32.mrf.mxu2 }
 0x131   : > { %v1072_v54 = vmul.f32 %v2015_v16, %v2015_v16  ;;  %902 = vst.msk [vmem:[%s1799_s29 + $0xe8] sm:$0xf] %vm843_vm0, %v837_v63 }
 0x132   : > { %v951_v22 = vadd.f32 %v950_v12, %v949_v62  ;;  %v1148_v15 = vadd.f32 %v1147_v61, %v1146_v56  ;;  %v1159_v62 = vsel %vm908_vm1, %v1070_v36, 0.0  ;;  %v962_v61 = vsel %vm908_vm1, %v2003_v9, 0.0 }
 0x133   : > { %v825_v12 = vpack.c.bf16 %v2198_v57, %v2198_v57  ;;  %v964_v9 = vsel %vm908_vm1, %v2015_v16, 0.0  ;;  %v1163_v20 = vsel %vm908_vm1, %v1072_v54, 0.0  ;;  %v966_v16 = vsel %vm908_vm1, %v2060_v60, 0.0 }
 0x134   : > { %v1150_v37 = vadd.f32 %v1149_v7, %v1148_v15  ;;  %v953_v19 = vadd.f32 %v952_v10, %v951_v22  ;;  %v1161_v10 = vsel %vm908_vm1, %v1071_v48, 0.0  ;;  %v1075_v36 = vmul.f32 %v2123_v23, %v2123_v23 }
 0x135   : > { %890 = vst.msk [vmem:[%s1799_s29 + $0xb8] sm:$0xf] %vm843_vm0, %v825_v12  ;;  %v1076_v60 = vmul.f32 %v1839_v6, %v1839_v6 }
 0x136   : > { %v955_v28 = vadd.f32 %v954_v44, %v953_v19  ;;  %v1152_v31 = vadd.f32 %v1151_v24, %v1150_v37  ;;  %v2228_v22 = vpop.f32.mrf.mxu3  ;;  %v826_v37 = vpack.c.bf16 %v2226_v0, %v2226_v0  ;;  %v1169_v48 = vsel %vm908_vm1, %v1075_v36, 0.0 }
 0x137   : > { %v838_v44 = vpack.c.bf16 %v2228_v22, %v2228_v22 }
 0x138   : > { %v957_v34 = vadd.f32 %v956_v32, %v955_v28  ;;  %v1154_v55 = vadd.f32 %v1153_v30, %v1152_v31  ;;  %v1074_v28 = vmul.f32 %v2089_v51, %v2089_v51  ;;  %891 = vst.msk [vmem:[%s1799_s29 + $0xbc] sm:$0xf] %vm843_vm0, %v826_v37  ;;  %v1165_v32 = vsel %vm908_vm1, %v1073_v11, 0.0 }
 0x139   : > { %903 = vst.msk [vmem:[%s1799_s29 + $0xec] sm:$0xf] %vm843_vm0, %v838_v44  ;;  %v972_v51 = vsel %vm908_vm1, %v1839_v6, 0.0  ;;  %v976_v6 = vsel %vm908_vm1, %v1879_v27, 0.0  ;;  %v1080_v11 = vmul.f32 %v1915_v40, %v1915_v40 }
 0x13a   : > { %v959_v43 = vadd.f32 %v958_v42, %v957_v34  ;;  %v1156_v1 = vadd.f32 %v1155_v53, %v1154_v55  ;;  %v1167_v53 = vsel %vm908_vm1, %v1074_v28, 0.0  ;;  %v970_v42 = vsel %vm908_vm1, %v2123_v23, 0.0 }
 0x13b   : > { %v1078_v23 = vmul.f32 %v1879_v27, %v1879_v27 }
 0x13c   : > { %v961_v56 = vadd.f32 %v960_v46, %v959_v43  ;;  %v1158_v35 = vadd.f32 %v1157_v47, %v1156_v1  ;;  %v1077_v46 = vmul.f32 %v1855_v17, %v1855_v17 }
 0x13e   : > { %v963_v15 = vadd.f32 %v962_v61, %v961_v56  ;;  %v1160_v7 = vadd.f32 %v1159_v62, %v1158_v35  ;;  %v2262_v43 = vpop.f32.mrf.mxu3  ;;  %v1171_v35 = vsel %vm908_vm1, %v1076_v60, 0.0  ;;  %v974_v61 = vsel %vm908_vm1, %v1855_v17, 0.0 }
 0x13f   : > { %v1173_v63 = vsel %vm908_vm1, %v1077_v46, 0.0  ;;  %v978_v17 = vsel %vm908_vm1, %v1897_v33, 0.0  ;;  %v839_v37 = vpack.c.bf16 %v2262_v43, %v2262_v43  ;;  %v1083_v60 = vmul.f32 %v1987_v3, %v1987_v3 }
 0x140   : > { %v965_v19 = vadd.f32 %v964_v9, %v963_v15  ;;  %v1162_v24 = vadd.f32 %v1161_v10, %v1160_v7  ;;  %v1079_v15 = vmul.f32 %v1897_v33, %v1897_v33  ;;  %v1175_v9 = vsel %vm908_vm1, %v1078_v23, 0.0 }
 0x141   : > { %v1081_v33 = vmul.f32 %v1939_v49, %v1939_v49  ;;  %904 = vst.msk [vmem:[%s1799_s29 + $0xf0] sm:$0xf] %vm843_vm0, %v839_v37 }
 0x142   : > { %v1164_v31 = vadd.f32 %v1163_v20, %v1162_v24  ;;  %v967_v30 = vadd.f32 %v966_v16, %v965_v19  ;;  %v1177_v20 = vsel %vm908_vm1, %v1079_v15, 0.0  ;;  %v980_v16 = vsel %vm908_vm1, %v1915_v40, 0.0 }
 0x143   : > { %v1181_v40 = vsel %vm908_vm1, %v1081_v33, 0.0  ;;  %v1087_v15 = vmul.f32 %v2094_v18, %v2094_v18 }
 0x144   : > { %v1166_v34 = vadd.f32 %v1165_v32, %v1164_v31  ;;  %v969_v55 = vadd.f32 %v968_v45, %v967_v30  ;;  %v1179_v30 = vsel %vm908_vm1, %v1080_v11, 0.0  ;;  %v982_v32 = vsel %vm908_vm1, %v1939_v49, 0.0 }
 0x145   : > { %v1082_v45 = vmul.f32 %v1963_v58, %v1963_v58  ;;  %v986_v49 = vsel %vm908_vm1, %v1987_v3, 0.0  ;;  %v990_v3 = vsel %vm908_vm1, %v2021_v25, 0.0 }
 0x146   : > { %v1168_v1 = vadd.f32 %v1167_v53, %v1166_v34  ;;  %v971_v47 = vadd.f32 %v970_v42, %v969_v55  ;;  %v2286_v19 = vpop.f32.mrf.mxu3  ;;  %v984_v55 = vsel %vm908_vm1, %v1963_v58, 0.0  ;;  %v988_v58 = vsel %vm908_vm1, %v2007_v13, 0.0 }
 0x147   : > { %v840_v44 = vpack.c.bf16 %v2286_v19, %v2286_v19 }
 0x148   : > { %v973_v62 = vadd.f32 %v972_v51, %v971_v47  ;;  %v1170_v56 = vadd.f32 %v1169_v48, %v1168_v1  ;;  %v1183_v1 = vsel %vm908_vm1, %v1082_v45, 0.0  ;;  %v1084_v47 = vmul.f32 %v2007_v13, %v2007_v13 }
 0x149   : > { %905 = vst.msk [vmem:[%s1799_s29 + $0xf4] sm:$0xf] %vm843_vm0, %v840_v44  ;;  %v992_v13 = vsel %vm908_vm1, %v2070_v2, 0.0  ;;  %v1193_v44 = vsel %vm908_vm1, %v1087_v15, 0.0 }
 0x14a   : > { %v975_v54 = vadd.f32 %v974_v61, %v973_v62  ;;  %v1172_v12 = vadd.f32 %v1171_v35, %v1170_v56  ;;  %v1185_v62 = vsel %vm908_vm1, %v1083_v60, 0.0  ;;  %v1085_v56 = vmul.f32 %v2021_v25, %v2021_v25 }
 0x14b   : > { %v1187_v23 = vsel %vm908_vm1, %v1084_v47, 0.0  ;;  %v994_v25 = vsel %vm908_vm1, %v2094_v18, 0.0  ;;  %v1089_v18 = vmul.f32 %v2162_v38, %v2162_v38  ;;  %v1092_v60 = vmul.f32 %v1917_v41, %v1917_v41 }
 0x14c   : > { %v977_v7 = vadd.f32 %v976_v6, %v975_v54  ;;  %v1174_v10 = vadd.f32 %v1173_v63, %v1172_v12  ;;  %v1086_v54 = vmul.f32 %v2070_v2, %v2070_v2  ;;  %v1189_v6 = vsel %vm908_vm1, %v1085_v56, 0.0 }
 0x14e   : > { %v979_v27 = vadd.f32 %v978_v17, %v977_v7  ;;  %v1176_v24 = vadd.f32 %v1175_v9, %v1174_v10  ;;  %v2314_v51 = vpop.f32.mrf.mxu3  ;;  %v1191_v9 = vsel %vm908_vm1, %v1086_v54, 0.0  ;;  %v1088_v17 = vmul.f32 %v2130_v29, %v2130_v29 }
 0x14f   : > { %v841_v11 = vpack.c.bf16 %v2314_v51, %v2314_v51 }
 0x150   : > { %v981_v28 = vadd.f32 %v980_v16, %v979_v27  ;;  %v1178_v31 = vadd.f32 %v1177_v20, %v1176_v24  ;;  %v996_v20 = vsel %vm908_vm1, %v2130_v29, 0.0  ;;  %v1197_v29 = vsel %vm908_vm1, %v1089_v18, 0.0 }
 0x151   : > { %906 = vst.msk [vmem:[%s1799_s29 + $0xf8] sm:$0xf] %vm843_vm0, %v841_v11 }
 0x152   : > { %v983_v36 = vadd.f32 %v982_v32, %v981_v28  ;;  %v1180_v34 = vadd.f32 %v1179_v30, %v1178_v31  ;;  %v1195_v28 = vsel %vm908_vm1, %v1088_v17, 0.0  ;;  %v998_v31 = vsel %vm908_vm1, %v2162_v38, 0.0 }
 0x153   : > { %v1090_v30 = vmul.f32 %v2198_v57, %v2198_v57  ;;  %v1098_v17 = vmul.f32 %v2072_v5, %v2072_v5 }
 0x154   : > { %v1182_v53 = vadd.f32 %v1181_v40, %v1180_v34  ;;  %v985_v42 = vadd.f32 %v984_v55, %v983_v36  ;;  %v1000_v36 = vsel %vm908_vm1, %v2198_v57, 0.0  ;;  %v1091_v34 = vmul.f32 %v2226_v0, %v2226_v0 }
 0x155   : > { %v1199_v38 = vsel %vm908_vm1, %v1090_v30, 0.0  ;;  %v1093_v57 = vmul.f32 %v1941_v50, %v1941_v50  ;;  %v1215_v18 = vsel %vm908_vm1, %v1098_v17, 0.0  ;;  %v1101_v30 = vmul.f32 %v2164_v39, %v2164_v39 }
 0x156   : > { %v987_v46 = vadd.f32 %v986_v49, %v985_v42  ;;  %v1184_v48 = vadd.f32 %v1183_v1, %v1182_v53  ;;  %v2338_v37 = vpop.f32.mrf.mxu3  ;;  %v1002_v53 = vsel %vm908_vm1, %v2226_v0, 0.0  ;;  %v1004_v49 = vsel %vm908_vm1, %v1917_v41, 0.0 }
 0x157   : > { %v842_v24 = vpack.c.bf16 %v2338_v37, %v2338_v37  ;;  %v1201_v47 = vsel %vm908_vm1, %v1091_v34, 0.0  ;;  %v1094_v0 = vmul.f32 %v1965_v59, %v1965_v59  ;;  %v1008_v41 = vsel %vm908_vm1, %v1965_v59, 0.0 }
 0x158   : > { %v989_v35 = vadd.f32 %v988_v58, %v987_v46  ;;  %v1186_v61 = vadd.f32 %v1185_v62, %v1184_v48  ;;  %v1203_v62 = vsel %vm908_vm1, %v1092_v60, 0.0  ;;  %v1006_v58 = vsel %vm908_vm1, %v1941_v50, 0.0 }
 0x159   : > { %907 = vst.msk [vmem:[%s1799_s29 + $0xfc] sm:$0xf] %vm843_vm0, %v842_v24  ;;  %v1010_v50 = vsel %vm908_vm1, %v1989_v4, 0.0  ;;  %v1012_v59 = vsel %vm908_vm1, %v2009_v14, 0.0  ;;  %v1099_v24 = vmul.f32 %v2096_v8, %v2096_v8  ;;  %v1103_v60 = vmul.f32 %v2228_v22, %v2228_v22 }
 0x15a   : > { %v991_v12 = vadd.f32 %v990_v3, %v989_v35  ;;  %v1188_v63 = vadd.f32 %v1187_v23, %v1186_v61  ;;  %v1205_v61 = vsel %vm908_vm1, %v1093_v57, 0.0  ;;  %v1095_v23 = vmul.f32 %v1989_v4, %v1989_v4 }
 0x15b   : > { %v1014_v4 = vsel %vm908_vm1, %v2023_v26, 0.0 }
 0x15c   : > { %v993_v7 = vadd.f32 %v992_v13, %v991_v12  ;;  %v1190_v10 = vadd.f32 %v1189_v6, %v1188_v63  ;;  %v1207_v12 = vsel %vm908_vm1, %v1094_v0, 0.0  ;;  %v1096_v63 = vmul.f32 %v2009_v14, %v2009_v14 }
 0x15d   : > { %v1209_v15 = vsel %vm908_vm1, %v1095_v23, 0.0  ;;  %v1016_v14 = vsel %vm908_vm1, %v2072_v5, 0.0  ;;  %v1020_v5 = vsel %vm908_vm1, %v2132_v52, 0.0  ;;  %v1106_v0 = vmul.f32 %v2314_v51, %v2314_v51 }
 0x15e   : > { %v995_v2 = vadd.f32 %v994_v25, %v993_v7  ;;  %v1192_v27 = vadd.f32 %v1191_v9, %v1190_v10  ;;  %v1097_v7 = vmul.f32 %v2023_v26, %v2023_v26  ;;  %v1211_v25 = vsel %vm908_vm1, %v1096_v63, 0.0 }
 0x15f   : > { %v1018_v26 = vsel %vm908_vm1, %v2096_v8, 0.0  ;;  %v1022_v8 = vsel %vm908_vm1, %v2164_v39, 0.0  ;;  %v1026_v39 = vsel %vm908_vm1, %v2228_v22, 0.0  ;;  %v1030_v22 = vsel %vm908_vm1, %v2286_v19, 0.0 }
 0x160   : > { %v1194_v16 = vadd.f32 %v1193_v44, %v1192_v27  ;;  %v997_v33 = vadd.f32 %v996_v20, %v995_v2  ;;  %v1213_v27 = vsel %vm908_vm1, %v1097_v7, 0.0 }
 0x162   : > { %v1196_v32 = vadd.f32 %v1195_v28, %v1194_v16  ;;  %v999_v45 = vadd.f32 %v998_v31, %v997_v33  ;;  %v1100_v16 = vmul.f32 %v2132_v52, %v2132_v52  ;;  %v1217_v31 = vsel %vm908_vm1, %v1099_v24, 0.0 }
 0x163   : > { %v1024_v52 = vsel %vm908_vm1, %v2200_v21, 0.0 }
 0x164   : > { %v1198_v40 = vadd.f32 %v1197_v29, %v1196_v32  ;;  %v1001_v55 = vadd.f32 %v1000_v36, %v999_v45  ;;  %v1219_v29 = vsel %vm908_vm1, %v1100_v16, 0.0  ;;  %v1102_v36 = vmul.f32 %v2200_v21, %v2200_v21 }
 0x165   : > { %v1028_v21 = vsel %vm908_vm1, %v2262_v43, 0.0 }
 0x166   : > { %v1200_v42 = vadd.f32 %v1199_v38, %v1198_v40  ;;  %v1003_v1 = vadd.f32 %v1002_v53, %v1001_v55  ;;  %v1221_v55 = vsel %vm908_vm1, %v1101_v30, 0.0 }
 0x168   : > { %v1005_v46 = vadd.f32 %v1004_v49, %v1003_v1  ;;  %v1202_v48 = vadd.f32 %v1201_v47, %v1200_v42  ;;  %v1223_v42 = vsel %vm908_vm1, %v1102_v36, 0.0  ;;  %v1104_v1 = vmul.f32 %v2262_v43, %v2262_v43 }
 0x169   : > { %v1225_v47 = vsel %vm908_vm1, %v1103_v60, 0.0  ;;  %v1032_v43 = vsel %vm908_vm1, %v2314_v51, 0.0 }
 0x16a   : > { %v1007_v56 = vadd.f32 %v1006_v58, %v1005_v46  ;;  %v1204_v35 = vadd.f32 %v1203_v62, %v1202_v48  ;;  %v1105_v46 = vmul.f32 %v2286_v19, %v2286_v19  ;;  %v1227_v58 = vsel %vm908_vm1, %v1104_v1, 0.0 }
 0x16b   : > { %v1034_v19 = vsel %vm908_vm1, %v2338_v37, 0.0 }
 0x16c   : > { %v1009_v3 = vadd.f32 %v1008_v41, %v1007_v56  ;;  %v1206_v54 = vadd.f32 %v1205_v61, %v1204_v35  ;;  %v1229_v61 = vsel %vm908_vm1, %v1105_v46, 0.0  ;;  %v1107_v41 = vmul.f32 %v2338_v37, %v2338_v37 }
 0x16e   : > { %v1011_v6 = vadd.f32 %v1010_v50, %v1009_v3  ;;  %v1208_v13 = vadd.f32 %v1207_v12, %v1206_v54  ;;  %v1231_v54 = vsel %vm908_vm1, %v1106_v0, 0.0  ;;  %v1233_v63 = vsel %vm908_vm1, %v1107_v41, 0.0 }
 0x170   : > { %v1013_v10 = vadd.f32 %v1012_v59, %v1011_v6  ;;  %v1210_v9 = vadd.f32 %v1209_v15, %v1208_v13 }
 0x172   : > { %v1015_v11 = vadd.f32 %v1014_v4, %v1013_v10  ;;  %v1212_v2 = vadd.f32 %v1211_v25, %v1210_v9 }
 0x174   : > { %v1214_v44 = vadd.f32 %v1213_v27, %v1212_v2  ;;  %v1017_v20 = vadd.f32 %v1016_v14, %v1015_v11 }
 0x176   : > { %v1019_v33 = vadd.f32 %v1018_v26, %v1017_v20  ;;  %v1216_v28 = vadd.f32 %v1215_v18, %v1214_v44 }
 0x178   : > { %v1021_v32 = vadd.f32 %v1020_v5, %v1019_v33  ;;  %v1218_v45 = vadd.f32 %v1217_v31, %v1216_v28 }
 0x17a   : > { %v1023_v34 = vadd.f32 %v1022_v8, %v1021_v32  ;;  %v1220_v40 = vadd.f32 %v1219_v29, %v1218_v45 }
 0x17c   : > { %v1025_v38 = vadd.f32 %v1024_v52, %v1023_v34  ;;  %v1222_v53 = vadd.f32 %v1221_v55, %v1220_v40 }
 0x17e   : > { %v1027_v49 = vadd.f32 %v1026_v39, %v1025_v38  ;;  %v1224_v57 = vadd.f32 %v1223_v42, %v1222_v53 }
 0x180   : > { %v1226_v48 = vadd.f32 %v1225_v47, %v1224_v57  ;;  %v1029_v62 = vadd.f32 %v1028_v21, %v1027_v49 }
 0x182   : > { %v1228_v56 = vadd.f32 %v1227_v58, %v1226_v48  ;;  %v1031_v35 = vadd.f32 %v1030_v22, %v1029_v62 }
 0x184   : > { %v1230_v23 = vadd.f32 %v1229_v61, %v1228_v56  ;;  %v1033_v3 = vadd.f32 %v1032_v43, %v1031_v35 }
 0x186   : > { %v1232_v12 = vadd.f32 %v1231_v54, %v1230_v23  ;;  %v1035_v50 = vadd.f32 %v1034_v19, %v1033_v3 }
 0x188   : > { %v1036_v6 = vrot.slane %v1035_v50, 4  ;;  %v1234_v13 = vadd.f32 %v1233_v63, %v1232_v12 }
 0x18a   : > { %v1037_v15 = vadd.f32 %v1036_v6, %v1035_v50  ;;  %v1235_v51 = vrot.slane %v1234_v13, 4 }
 0x18c   : > { %v1038_v59 = vrot.slane %v1037_v15, 2  ;;  %v1236_v7 = vadd.f32 %v1235_v51, %v1234_v13 }
 0x18e   : > { %v1039_v10 = vadd.f32 %v1038_v59, %v1037_v15  ;;  %v1237_v9 = vrot.slane %v1236_v7, 2 }
 0x190   : > { %v1040_v25 = vrot.slane %v1039_v10, 1  ;;  %v1238_v4 = vadd.f32 %v1237_v9, %v1236_v7 }
 0x192   : > { %v1041_v37 = vadd.f32 %v1040_v25, %v1039_v10  ;;  %v1239_v17 = vrot.slane %v1238_v4, 1 }
 0x194   : > { %1043 = vst.msk [vmem:[%s283_s6] sm:$0x1] %vm1042_vm2, %v1041_v37  ;;  %v1240_v11 = vadd.f32 %v1239_v17, %v1238_v4 }
 0x196   : > { %1241 = vst.msk [vmem:[%s289_s9] sm:$0x1] %vm1042_vm2, %v1240_v11 }
 0x197 PF: > { %s15_s17 = sadd.s32 1, %s1697_s17   ;;  %s2467_s15 = smov %s1693_s16 }
 0x198   : > { %p12_p5 = scmp.ge.s32.totalorder %s15_s17, 6   ;;  %s2468_s16 = smov %s2470_s18 }
 0x19a   :  { %14 = sbr.rel (!%p12_p5) target bundleno = 2 (0x2), region = 85 }

// kernel: generator_forward.9
= control target key start
LH: loop header
LB: loop body
LE: loop exit
PB: predicated region body
PF: predicated region fallthrough
CT: control target
= control target key end

     0   :  { %s4169_s9 = smov 0   ;;  %s4171_s10 = smov 0   ;;  %s4982_s0 = inlined_call_operand.vmem [shape: bf16[4,2048,64], index: 0, kind: input, shape index: {}]   ;;  %s4983_s1 = inlined_call_operand.vmem [shape: bf16[4,64,3], index: 1, kind: input, shape index: {}]   ;;  %s4984_s2 = inlined_call_operand.vmem [shape: f32[4,2048,3], index: 2, kind: output, shape index: {}]  }
   0x1   :  { %s4173_s11 = smov 0  }
   0x2 LB: > { %s24_s12 = sadd.s32 1, %s4148_s10  ;;  %p2782_p0 = scmp.ge.s32.totalorder %s4152_s11, 1  ;;  %s4152_s11 = sphi %s4173_s11, %s12_s11   ;;  %s4148_s10 = sphi %s4171_s10, %s4986_s10   ;;  %s4144_s9 = sphi %s4169_s9, %s4985_s9  }
   0x3   : > { %p26_p1 = scmp.ge.s32.totalorder %s24_s12, 4  ;;  %p143_p2 = scmp.lt.s32.totalorder %s4152_s11, 5 }
   0x5   : > { %s4988_s12 = smov (%p26_p1, %s24_s12), 0  ;;  %p144_p3 = pnand %p2782_p0, %p143_p2 }
   0x6   : > { %p179_p4 = scmp.lt.s32.totalorder (!%p144_p3), %s4144_s9, 3 }
   0x7   : > { %147 = sbr.rel (%p144_p3) target bundleno = 677 (0x2a5), region = 28 }
   0xc   : > { %s4990_s9 = smov (!%p179_p4, %s4144_s9), 3  ;;  %vm1132_vm0 = vcmask 523264   ;;  %vm2422_vm1 = vcmask 23552  }
   0xd   : > { %s3448_s13 = sshll.u32 %s4990_s9, 5  ;;  %s3447_s17 = sshll.u32 %s4990_s9, 10 }
   0xe   : > { %s192_s16 = scalar_lea.vmem %s4983_s1, %s3448_s13  ;;  %s4197_s20 = scalar_lea.vmem %s4982_s0, %s3447_s17 }
   0xf   : > { %v3581_v0 = vld [vmem:[%s192_s16 + $0x18] sm:$0xff]  ;;  %v3580_v1 = vld [vmem:[%s192_s16 + $0x10] sm:$0xff]  ;;  %v3579_v2 = vld [vmem:[%s192_s16 + $0x8] sm:$0xff]  ;;  %s3449_s21 = sshll.u32 %s4990_s9, 11 }
  0x10   : > { %1521 = vmatpush.bf16.msra.mxu0 %v3581_v0  ;;  %3582 = vmatpush.bf16.msra.mxu1 %v3581_v0  ;;  %v3578_v3 = vld [vmem:[%s192_s16] sm:$0xff]  ;;  %v3451_v8 = vld [vmem:[%s4197_s20 + $0x8] sm:$0xff]  ;;  %v3452_v12 = vld [vmem:[%s4197_s20 + $0x10] sm:$0xff]  ;;  %s4275_s24 = scalar_lea.vmem %s4984_s2, %s3449_s21 }
  0x11   : > { %3583 = vmatpush.bf16.msra.mxu2 %v3581_v0  ;;  %3584 = vmatpush.bf16.msra.mxu3 %v3581_v0  ;;  %v3450_v4 = vld [vmem:[%s4197_s20] sm:$0xff]  ;;  %v3483_v9 = vld [vmem:[%s4197_s20 + $0x108] sm:$0xff]  ;;  %v3484_v13 = vld [vmem:[%s4197_s20 + $0x110] sm:$0xff] }
  0x12   : > { %v3482_v5 = vld [vmem:[%s4197_s20 + $0x100] sm:$0xff]  ;;  %v3515_v10 = vld [vmem:[%s4197_s20 + $0x208] sm:$0xff]  ;;  %v3516_v14 = vld [vmem:[%s4197_s20 + $0x210] sm:$0xff] }
  0x13   : > { %v3514_v6 = vld [vmem:[%s4197_s20 + $0x200] sm:$0xff]  ;;  %v3547_v11 = vld [vmem:[%s4197_s20 + $0x308] sm:$0xff]  ;;  %v3548_v15 = vld [vmem:[%s4197_s20 + $0x310] sm:$0xff] }
  0x14   : > { %1522 = vmatpush.bf16.msra.mxu0 %v3580_v1  ;;  %3585 = vmatpush.bf16.msra.mxu1 %v3580_v1  ;;  %v3546_v7 = vld [vmem:[%s4197_s20 + $0x300] sm:$0xff]  ;;  %v3453_v16 = vld [vmem:[%s4197_s20 + $0x18] sm:$0xff]  ;;  %v3455_v24 = vld [vmem:[%s4197_s20 + $0x28] sm:$0xff] }
  0x15   : > { %3586 = vmatpush.bf16.msra.mxu2 %v3580_v1  ;;  %3587 = vmatpush.bf16.msra.mxu3 %v3580_v1  ;;  %v3485_v17 = vld [vmem:[%s4197_s20 + $0x118] sm:$0xff]  ;;  %v3454_v20 = vld [vmem:[%s4197_s20 + $0x20] sm:$0xff]  ;;  %v3487_v25 = vld [vmem:[%s4197_s20 + $0x128] sm:$0xff] }
  0x16   : > { %v3517_v18 = vld [vmem:[%s4197_s20 + $0x218] sm:$0xff]  ;;  %v3486_v21 = vld [vmem:[%s4197_s20 + $0x120] sm:$0xff]  ;;  %v3519_v26 = vld [vmem:[%s4197_s20 + $0x228] sm:$0xff] }
  0x17   : > { %v3549_v19 = vld [vmem:[%s4197_s20 + $0x318] sm:$0xff]  ;;  %v3518_v22 = vld [vmem:[%s4197_s20 + $0x220] sm:$0xff]  ;;  %v3551_v27 = vld [vmem:[%s4197_s20 + $0x328] sm:$0xff] }
  0x18   : > { %1523 = vmatpush.bf16.msra.mxu0 %v3579_v2  ;;  %3588 = vmatpush.bf16.msra.mxu1 %v3579_v2  ;;  %v3550_v23 = vld [vmem:[%s4197_s20 + $0x320] sm:$0xff]  ;;  %v3456_v28 = vld [vmem:[%s4197_s20 + $0x30] sm:$0xff]  ;;  %v3457_v32 = vld [vmem:[%s4197_s20 + $0x38] sm:$0xff] }
  0x19   : > { %3589 = vmatpush.bf16.msra.mxu2 %v3579_v2  ;;  %3590 = vmatpush.bf16.msra.mxu3 %v3579_v2  ;;  %v3488_v29 = vld [vmem:[%s4197_s20 + $0x130] sm:$0xff]  ;;  %v3489_v33 = vld [vmem:[%s4197_s20 + $0x138] sm:$0xff]  ;;  %v3458_v36 = vld [vmem:[%s4197_s20 + $0x40] sm:$0xff] }
  0x1a   : > { %v3520_v30 = vld [vmem:[%s4197_s20 + $0x230] sm:$0xff]  ;;  %v3521_v34 = vld [vmem:[%s4197_s20 + $0x238] sm:$0xff]  ;;  %v3490_v37 = vld [vmem:[%s4197_s20 + $0x140] sm:$0xff] }
  0x1b   : > { %v3552_v31 = vld [vmem:[%s4197_s20 + $0x330] sm:$0xff]  ;;  %v3553_v35 = vld [vmem:[%s4197_s20 + $0x338] sm:$0xff]  ;;  %v3522_v40 = vld [vmem:[%s4197_s20 + $0x240] sm:$0xff] }
  0x1c   : > { %1524 = vmatpush.bf16.msra.mxu0 %v3578_v3  ;;  %3591 = vmatpush.bf16.msra.mxu1 %v3578_v3  ;;  %v3554_v41 = vld [vmem:[%s4197_s20 + $0x340] sm:$0xff]  ;;  %v3459_v52 = vld [vmem:[%s4197_s20 + $0x48] sm:$0xff] }
  0x1d   : > { %3592 = vmatpush.bf16.msra.mxu2 %v3578_v3  ;;  %3593 = vmatpush.bf16.msra.mxu3 %v3578_v3  ;;  %v3491_v53 = vld [vmem:[%s4197_s20 + $0x148] sm:$0xff] }
  0x1e   : > { %v3523_v57 = vld [vmem:[%s4197_s20 + $0x248] sm:$0xff] }
  0x1f   : > { %3317 = vmatmul.msk.bf16.vlgmr.msra.gmra.mxu0 %vm1132_vm0, %v3450_v4  ;;  %3349 = vmatmul.msk.bf16.vlgmr.msra.gmra.mxu1 %vm1132_vm0, %v3482_v5  ;;  %v3555_v58 = vld [vmem:[%s4197_s20 + $0x348] sm:$0xff] }
  0x20   : > { %3381 = vmatmul.msk.bf16.vlgmr.msra.gmra.mxu2 %vm1132_vm0, %v3514_v6  ;;  %3413 = vmatmul.msk.bf16.vlgmr.msra.gmra.mxu3 %vm1132_vm0, %v3546_v7 }
  0x2f   : > { %3318 = vmatmul.msk.bf16.gmra.mxu0 %vm1132_vm0, %v3451_v8  ;;  %3350 = vmatmul.msk.bf16.gmra.mxu1 %vm1132_vm0, %v3483_v9  ;;  %v3460_v8 = vld [vmem:[%s4197_s20 + $0x50] sm:$0xff] }
  0x30   : > { %3382 = vmatmul.msk.bf16.gmra.mxu2 %vm1132_vm0, %v3515_v10  ;;  %3414 = vmatmul.msk.bf16.gmra.mxu3 %vm1132_vm0, %v3547_v11  ;;  %v3492_v9 = vld [vmem:[%s4197_s20 + $0x150] sm:$0xff] }
  0x3f   : > { %3319 = vmatmul.msk.bf16.gmra.mxu0 %vm1132_vm0, %v3452_v12  ;;  %3351 = vmatmul.msk.bf16.gmra.mxu1 %vm1132_vm0, %v3484_v13  ;;  %v3524_v13 = vld [vmem:[%s4197_s20 + $0x250] sm:$0xff] }
  0x40   : > { %3383 = vmatmul.msk.bf16.gmra.mxu2 %vm1132_vm0, %v3516_v14  ;;  %3415 = vmatmul.msk.bf16.gmra.mxu3 %vm1132_vm0, %v3548_v15  ;;  %v3556_v14 = vld [vmem:[%s4197_s20 + $0x350] sm:$0xff] }
  0x4f   : > { %3320 = vmatmul.msk.bf16.gmra.mxu0 %vm1132_vm0, %v3453_v16  ;;  %3352 = vmatmul.msk.bf16.gmra.mxu1 %vm1132_vm0, %v3485_v17 }
  0x50   : > { %3384 = vmatmul.msk.bf16.gmra.mxu2 %vm1132_vm0, %v3517_v18  ;;  %3416 = vmatmul.msk.bf16.gmra.mxu3 %vm1132_vm0, %v3549_v19 }
  0x5f   : > { %3321 = vmatmul.msk.bf16.gmra.mxu0 %vm1132_vm0, %v3454_v20  ;;  %3353 = vmatmul.msk.bf16.gmra.mxu1 %vm1132_vm0, %v3486_v21 }
  0x60   : > { %3385 = vmatmul.msk.bf16.gmra.mxu2 %vm1132_vm0, %v3518_v22  ;;  %3417 = vmatmul.msk.bf16.gmra.mxu3 %vm1132_vm0, %v3550_v23 }
  0x6f   : > { %3322 = vmatmul.msk.bf16.gmra.mxu0 %vm1132_vm0, %v3455_v24  ;;  %3354 = vmatmul.msk.bf16.gmra.mxu1 %vm1132_vm0, %v3487_v25 }
  0x70   : > { %3386 = vmatmul.msk.bf16.gmra.mxu2 %vm1132_vm0, %v3519_v26  ;;  %3418 = vmatmul.msk.bf16.gmra.mxu3 %vm1132_vm0, %v3551_v27 }
  0x7f   : > { %3323 = vmatmul.msk.bf16.gmra.mxu0 %vm1132_vm0, %v3456_v28  ;;  %3355 = vmatmul.msk.bf16.gmra.mxu1 %vm1132_vm0, %v3488_v29  ;;  %v3461_v28 = vld [vmem:[%s4197_s20 + $0x58] sm:$0xff] }
  0x80   : > { %3387 = vmatmul.msk.bf16.gmra.mxu2 %vm1132_vm0, %v3520_v30  ;;  %3419 = vmatmul.msk.bf16.gmra.mxu3 %vm1132_vm0, %v3552_v31  ;;  %v3493_v29 = vld [vmem:[%s4197_s20 + $0x158] sm:$0xff] }
  0x8f   : > { %3324 = vmatmul.msk.bf16.gmra.mxu0 %vm1132_vm0, %v3457_v32  ;;  %3356 = vmatmul.msk.bf16.gmra.mxu1 %vm1132_vm0, %v3489_v33  ;;  %v3525_v33 = vld [vmem:[%s4197_s20 + $0x258] sm:$0xff] }
  0x90   : > { %3388 = vmatmul.msk.bf16.gmra.mxu2 %vm1132_vm0, %v3521_v34  ;;  %3420 = vmatmul.msk.bf16.gmra.mxu3 %vm1132_vm0, %v3553_v35  ;;  %v3557_v34 = vld [vmem:[%s4197_s20 + $0x358] sm:$0xff] }
  0x9c   : > { %v1526_v38 = vpop.f32.mrf.mxu0  ;;  %v1686_v39 = vpop.f32.mrf.mxu1 }
  0x9d   : > { %3618 = vtanh.f32 %v1526_v38 }
  0x9e   : > { %3620 = vtanh.f32 %v1686_v39 }
  0x9f   : > { %3325 = vmatmul.msk.bf16.gmra.mxu0 %vm1132_vm0, %v3458_v36  ;;  %3357 = vmatmul.msk.bf16.gmra.mxu1 %vm1132_vm0, %v3490_v37 }
  0xa0   : > { %3389 = vmatmul.msk.bf16.gmra.mxu2 %vm1132_vm0, %v3522_v40  ;;  %3421 = vmatmul.msk.bf16.gmra.mxu3 %vm1132_vm0, %v3554_v41 }
  0xa3   : > { %v3619_v42 = vpop.eup %3618  ;;  %v1846_v43 = vpop.f32.mrf.mxu2 }
  0xa4   : > { %v2006_v44 = vpop.f32.mrf.mxu3  ;;  %v3621_v45 = vpop.eup %3620  ;;  %2423 = vst.msk [vmem:[%s4275_s24] sm:$0xff] %vm2422_vm1, %v3619_v42  ;;  %3622 = vtanh.f32 %v1846_v43 }
  0xa5   : > { %v1528_v46 = vpop.f32.mrf.mxu0  ;;  %v1688_v47 = vpop.f32.mrf.mxu1  ;;  %2487 = vst.msk [vmem:[%s4275_s24 + $0x200] sm:$0xff] %vm2422_vm1, %v3621_v45  ;;  %3624 = vtanh.f32 %v2006_v44 }
  0xa6   : > { %3626 = vtanh.f32 %v1528_v46 }
  0xa7   : > { %3628 = vtanh.f32 %v1688_v47 }
  0xaa   : > { %v3623_v48 = vpop.eup %3622 }
  0xab   : > { %v3625_v49 = vpop.eup %3624  ;;  %2551 = vst.msk [vmem:[%s4275_s24 + $0x400] sm:$0xff] %vm2422_vm1, %v3623_v48  ;;  %v1848_v50 = vpop.f32.mrf.mxu2  ;;  %v3462_v48 = vld [vmem:[%s4197_s20 + $0x60] sm:$0xff] }
  0xac   : > { %v2008_v51 = vpop.f32.mrf.mxu3  ;;  %v3627_v54 = vpop.eup %3626  ;;  %2615 = vst.msk [vmem:[%s4275_s24 + $0x600] sm:$0xff] %vm2422_vm1, %v3625_v49  ;;  %3630 = vtanh.f32 %v1848_v50  ;;  %v3494_v49 = vld [vmem:[%s4197_s20 + $0x160] sm:$0xff] }
  0xad   : > { %v1531_v55 = vpop.f32.mrf.mxu0  ;;  %v1691_v56 = vpop.f32.mrf.mxu1  ;;  %2424 = vst.msk [vmem:[%s4275_s24 + $0x8] sm:$0xff] %vm2422_vm1, %v3627_v54  ;;  %3632 = vtanh.f32 %v2008_v51  ;;  %v3558_v54 = vld [vmem:[%s4197_s20 + $0x360] sm:$0xff] }
  0xae   : > { %v3629_v59 = vpop.eup %3628  ;;  %3634 = vtanh.f32 %v1531_v55 }
  0xaf   : > { %2488 = vst.msk [vmem:[%s4275_s24 + $0x208] sm:$0xff] %vm2422_vm1, %v3629_v59  ;;  %3636 = vtanh.f32 %v1691_v56  ;;  %3326 = vmatmul.msk.bf16.gmra.mxu0 %vm1132_vm0, %v3459_v52  ;;  %3358 = vmatmul.msk.bf16.gmra.mxu1 %vm1132_vm0, %v3491_v53  ;;  %v3526_v53 = vld [vmem:[%s4197_s20 + $0x260] sm:$0xff] }
  0xb0   : > { %3390 = vmatmul.msk.bf16.gmra.mxu2 %vm1132_vm0, %v3523_v57  ;;  %3422 = vmatmul.msk.bf16.gmra.mxu3 %vm1132_vm0, %v3555_v58 }
  0xb2   : > { %v3631_v60 = vpop.eup %3630 }
  0xb3   : > { %v3633_v61 = vpop.eup %3632  ;;  %2552 = vst.msk [vmem:[%s4275_s24 + $0x408] sm:$0xff] %vm2422_vm1, %v3631_v60  ;;  %v1851_v62 = vpop.f32.mrf.mxu2 }
  0xb4   : > { %v2011_v63 = vpop.f32.mrf.mxu3  ;;  %v3635_v0 = vpop.eup %3634  ;;  %2616 = vst.msk [vmem:[%s4275_s24 + $0x608] sm:$0xff] %vm2422_vm1, %v3633_v61  ;;  %3638 = vtanh.f32 %v1851_v62 }
  0xb5   : > { %v1533_v1 = vpop.f32.mrf.mxu0  ;;  %v1693_v2 = vpop.f32.mrf.mxu1  ;;  %2425 = vst.msk [vmem:[%s4275_s24 + $0x10] sm:$0xff] %vm2422_vm1, %v3635_v0  ;;  %3640 = vtanh.f32 %v2011_v63 }
  0xb6   : > { %v3637_v3 = vpop.eup %3636  ;;  %3642 = vtanh.f32 %v1533_v1 }
  0xb7   : > { %2489 = vst.msk [vmem:[%s4275_s24 + $0x210] sm:$0xff] %vm2422_vm1, %v3637_v3  ;;  %3644 = vtanh.f32 %v1693_v2 }
  0xba   : > { %v3639_v4 = vpop.eup %3638 }
  0xbb   : > { %v3641_v5 = vpop.eup %3640  ;;  %2553 = vst.msk [vmem:[%s4275_s24 + $0x410] sm:$0xff] %vm2422_vm1, %v3639_v4  ;;  %v1853_v6 = vpop.f32.mrf.mxu2  ;;  %v3463_v4 = vld [vmem:[%s4197_s20 + $0x68] sm:$0xff] }
  0xbc   : > { %v2013_v7 = vpop.f32.mrf.mxu3  ;;  %v3643_v10 = vpop.eup %3642  ;;  %2617 = vst.msk [vmem:[%s4275_s24 + $0x610] sm:$0xff] %vm2422_vm1, %v3641_v5  ;;  %3646 = vtanh.f32 %v1853_v6  ;;  %v3495_v5 = vld [vmem:[%s4197_s20 + $0x168] sm:$0xff] }
  0xbd   : > { %v1536_v11 = vpop.f32.mrf.mxu0  ;;  %v1696_v12 = vpop.f32.mrf.mxu1  ;;  %2426 = vst.msk [vmem:[%s4275_s24 + $0x18] sm:$0xff] %vm2422_vm1, %v3643_v10  ;;  %3648 = vtanh.f32 %v2013_v7  ;;  %v3559_v10 = vld [vmem:[%s4197_s20 + $0x368] sm:$0xff] }
  0xbe   : > { %v3645_v15 = vpop.eup %3644  ;;  %3650 = vtanh.f32 %v1536_v11 }
  0xbf   : > { %2490 = vst.msk [vmem:[%s4275_s24 + $0x218] sm:$0xff] %vm2422_vm1, %v3645_v15  ;;  %3652 = vtanh.f32 %v1696_v12  ;;  %3327 = vmatmul.msk.bf16.gmra.mxu0 %vm1132_vm0, %v3460_v8  ;;  %3359 = vmatmul.msk.bf16.gmra.mxu1 %vm1132_vm0, %v3492_v9  ;;  %v3527_v9 = vld [vmem:[%s4197_s20 + $0x268] sm:$0xff] }
  0xc0   : > { %3391 = vmatmul.msk.bf16.gmra.mxu2 %vm1132_vm0, %v3524_v13  ;;  %3423 = vmatmul.msk.bf16.gmra.mxu3 %vm1132_vm0, %v3556_v14 }
  0xc2   : > { %v3647_v16 = vpop.eup %3646 }
  0xc3   : > { %v3649_v17 = vpop.eup %3648  ;;  %2554 = vst.msk [vmem:[%s4275_s24 + $0x418] sm:$0xff] %vm2422_vm1, %v3647_v16  ;;  %v1856_v18 = vpop.f32.mrf.mxu2 }
  0xc4   : > { %v2016_v19 = vpop.f32.mrf.mxu3  ;;  %v3651_v20 = vpop.eup %3650  ;;  %2618 = vst.msk [vmem:[%s4275_s24 + $0x618] sm:$0xff] %vm2422_vm1, %v3649_v17  ;;  %3654 = vtanh.f32 %v1856_v18 }
  0xc5   : > { %v1538_v21 = vpop.f32.mrf.mxu0  ;;  %v1698_v22 = vpop.f32.mrf.mxu1  ;;  %2427 = vst.msk [vmem:[%s4275_s24 + $0x20] sm:$0xff] %vm2422_vm1, %v3651_v20  ;;  %3656 = vtanh.f32 %v2016_v19 }
  0xc6   : > { %v3653_v23 = vpop.eup %3652  ;;  %3658 = vtanh.f32 %v1538_v21 }
  0xc7   : > { %2491 = vst.msk [vmem:[%s4275_s24 + $0x220] sm:$0xff] %vm2422_vm1, %v3653_v23  ;;  %3660 = vtanh.f32 %v1698_v22 }
  0xca   : > { %v3655_v24 = vpop.eup %3654 }
  0xcb   : > { %v3657_v25 = vpop.eup %3656  ;;  %2555 = vst.msk [vmem:[%s4275_s24 + $0x420] sm:$0xff] %vm2422_vm1, %v3655_v24  ;;  %v1858_v26 = vpop.f32.mrf.mxu2  ;;  %v3464_v24 = vld [vmem:[%s4197_s20 + $0x70] sm:$0xff] }
  0xcc   : > { %v2018_v27 = vpop.f32.mrf.mxu3  ;;  %v3659_v30 = vpop.eup %3658  ;;  %2619 = vst.msk [vmem:[%s4275_s24 + $0x620] sm:$0xff] %vm2422_vm1, %v3657_v25  ;;  %3662 = vtanh.f32 %v1858_v26  ;;  %v3496_v25 = vld [vmem:[%s4197_s20 + $0x170] sm:$0xff] }
  0xcd   : > { %v1541_v31 = vpop.f32.mrf.mxu0  ;;  %v1701_v32 = vpop.f32.mrf.mxu1  ;;  %2428 = vst.msk [vmem:[%s4275_s24 + $0x28] sm:$0xff] %vm2422_vm1, %v3659_v30  ;;  %3664 = vtanh.f32 %v2018_v27  ;;  %v3560_v30 = vld [vmem:[%s4197_s20 + $0x370] sm:$0xff] }
  0xce   : > { %v3661_v35 = vpop.eup %3660  ;;  %3666 = vtanh.f32 %v1541_v31 }
  0xcf   : > { %2492 = vst.msk [vmem:[%s4275_s24 + $0x228] sm:$0xff] %vm2422_vm1, %v3661_v35  ;;  %3668 = vtanh.f32 %v1701_v32  ;;  %3328 = vmatmul.msk.bf16.gmra.mxu0 %vm1132_vm0, %v3461_v28  ;;  %3360 = vmatmul.msk.bf16.gmra.mxu1 %vm1132_vm0, %v3493_v29  ;;  %v3528_v29 = vld [vmem:[%s4197_s20 + $0x270] sm:$0xff] }
  0xd0   : > { %3392 = vmatmul.msk.bf16.gmra.mxu2 %vm1132_vm0, %v3525_v33  ;;  %3424 = vmatmul.msk.bf16.gmra.mxu3 %vm1132_vm0, %v3557_v34 }
  0xd2   : > { %v3663_v36 = vpop.eup %3662 }
  0xd3   : > { %v3665_v37 = vpop.eup %3664  ;;  %2556 = vst.msk [vmem:[%s4275_s24 + $0x428] sm:$0xff] %vm2422_vm1, %v3663_v36  ;;  %v1861_v38 = vpop.f32.mrf.mxu2 }
  0xd4   : > { %v2021_v39 = vpop.f32.mrf.mxu3  ;;  %v3667_v40 = vpop.eup %3666  ;;  %2620 = vst.msk [vmem:[%s4275_s24 + $0x628] sm:$0xff] %vm2422_vm1, %v3665_v37  ;;  %3670 = vtanh.f32 %v1861_v38 }
  0xd5   : > { %v1543_v41 = vpop.f32.mrf.mxu0  ;;  %v1703_v42 = vpop.f32.mrf.mxu1  ;;  %2429 = vst.msk [vmem:[%s4275_s24 + $0x30] sm:$0xff] %vm2422_vm1, %v3667_v40  ;;  %3672 = vtanh.f32 %v2021_v39 }
  0xd6   : > { %v3669_v43 = vpop.eup %3668  ;;  %3674 = vtanh.f32 %v1543_v41 }
  0xd7   : > { %2493 = vst.msk [vmem:[%s4275_s24 + $0x230] sm:$0xff] %vm2422_vm1, %v3669_v43  ;;  %3676 = vtanh.f32 %v1703_v42 }
  0xda   : > { %v3671_v44 = vpop.eup %3670 }
  0xdb   : > { %v3673_v45 = vpop.eup %3672  ;;  %2557 = vst.msk [vmem:[%s4275_s24 + $0x430] sm:$0xff] %vm2422_vm1, %v3671_v44  ;;  %v1863_v46 = vpop.f32.mrf.mxu2  ;;  %v3465_v44 = vld [vmem:[%s4197_s20 + $0x78] sm:$0xff] }
  0xdc   : > { %v2023_v47 = vpop.f32.mrf.mxu3  ;;  %v3675_v50 = vpop.eup %3674  ;;  %2621 = vst.msk [vmem:[%s4275_s24 + $0x630] sm:$0xff] %vm2422_vm1, %v3673_v45  ;;  %3678 = vtanh.f32 %v1863_v46  ;;  %v3497_v45 = vld [vmem:[%s4197_s20 + $0x178] sm:$0xff] }
  0xdd   : > { %v1546_v51 = vpop.f32.mrf.mxu0  ;;  %v1706_v52 = vpop.f32.mrf.mxu1  ;;  %2430 = vst.msk [vmem:[%s4275_s24 + $0x38] sm:$0xff] %vm2422_vm1, %v3675_v50  ;;  %3680 = vtanh.f32 %v2023_v47  ;;  %v3561_v50 = vld [vmem:[%s4197_s20 + $0x378] sm:$0xff] }
  0xde   : > { %v3677_v55 = vpop.eup %3676  ;;  %3682 = vtanh.f32 %v1546_v51 }
  0xdf   : > { %2494 = vst.msk [vmem:[%s4275_s24 + $0x238] sm:$0xff] %vm2422_vm1, %v3677_v55  ;;  %3684 = vtanh.f32 %v1706_v52  ;;  %3329 = vmatmul.msk.bf16.gmra.mxu0 %vm1132_vm0, %v3462_v48  ;;  %3361 = vmatmul.msk.bf16.gmra.mxu1 %vm1132_vm0, %v3494_v49  ;;  %v3529_v49 = vld [vmem:[%s4197_s20 + $0x278] sm:$0xff] }
  0xe0   : > { %3393 = vmatmul.msk.bf16.gmra.mxu2 %vm1132_vm0, %v3526_v53  ;;  %3425 = vmatmul.msk.bf16.gmra.mxu3 %vm1132_vm0, %v3558_v54 }
  0xe2   : > { %v3679_v56 = vpop.eup %3678 }
  0xe3   : > { %v3681_v57 = vpop.eup %3680  ;;  %2558 = vst.msk [vmem:[%s4275_s24 + $0x438] sm:$0xff] %vm2422_vm1, %v3679_v56  ;;  %v1866_v58 = vpop.f32.mrf.mxu2 }
  0xe4   : > { %v2026_v59 = vpop.f32.mrf.mxu3  ;;  %v3683_v60 = vpop.eup %3682  ;;  %2622 = vst.msk [vmem:[%s4275_s24 + $0x638] sm:$0xff] %vm2422_vm1, %v3681_v57  ;;  %3686 = vtanh.f32 %v1866_v58 }
  0xe5   : > { %v1548_v61 = vpop.f32.mrf.mxu0  ;;  %v1708_v62 = vpop.f32.mrf.mxu1  ;;  %2431 = vst.msk [vmem:[%s4275_s24 + $0x40] sm:$0xff] %vm2422_vm1, %v3683_v60  ;;  %3688 = vtanh.f32 %v2026_v59 }
  0xe6   : > { %v3685_v63 = vpop.eup %3684  ;;  %3690 = vtanh.f32 %v1548_v61 }
  0xe7   : > { %2495 = vst.msk [vmem:[%s4275_s24 + $0x240] sm:$0xff] %vm2422_vm1, %v3685_v63  ;;  %3692 = vtanh.f32 %v1708_v62 }
  0xea   : > { %v3687_v0 = vpop.eup %3686 }
  0xeb   : > { %v3689_v1 = vpop.eup %3688  ;;  %2559 = vst.msk [vmem:[%s4275_s24 + $0x440] sm:$0xff] %vm2422_vm1, %v3687_v0  ;;  %v1868_v2 = vpop.f32.mrf.mxu2  ;;  %v3466_v0 = vld [vmem:[%s4197_s20 + $0x80] sm:$0xff] }
  0xec   : > { %v2028_v3 = vpop.f32.mrf.mxu3  ;;  %v3691_v6 = vpop.eup %3690  ;;  %2623 = vst.msk [vmem:[%s4275_s24 + $0x640] sm:$0xff] %vm2422_vm1, %v3689_v1  ;;  %3694 = vtanh.f32 %v1868_v2  ;;  %v3498_v1 = vld [vmem:[%s4197_s20 + $0x180] sm:$0xff] }
  0xed   : > { %v1551_v7 = vpop.f32.mrf.mxu0  ;;  %v1711_v8 = vpop.f32.mrf.mxu1  ;;  %2432 = vst.msk [vmem:[%s4275_s24 + $0x48] sm:$0xff] %vm2422_vm1, %v3691_v6  ;;  %3696 = vtanh.f32 %v2028_v3  ;;  %v3562_v6 = vld [vmem:[%s4197_s20 + $0x380] sm:$0xff] }
  0xee   : > { %v3693_v11 = vpop.eup %3692  ;;  %3698 = vtanh.f32 %v1551_v7 }
  0xef   : > { %2496 = vst.msk [vmem:[%s4275_s24 + $0x248] sm:$0xff] %vm2422_vm1, %v3693_v11  ;;  %3700 = vtanh.f32 %v1711_v8  ;;  %3330 = vmatmul.msk.bf16.gmra.mxu0 %vm1132_vm0, %v3463_v4  ;;  %3362 = vmatmul.msk.bf16.gmra.mxu1 %vm1132_vm0, %v3495_v5  ;;  %v3530_v5 = vld [vmem:[%s4197_s20 + $0x280] sm:$0xff] }
  0xf0   : > { %3394 = vmatmul.msk.bf16.gmra.mxu2 %vm1132_vm0, %v3527_v9  ;;  %3426 = vmatmul.msk.bf16.gmra.mxu3 %vm1132_vm0, %v3559_v10 }
  0xf2   : > { %v3695_v12 = vpop.eup %3694 }
  0xf3   : > { %v3697_v13 = vpop.eup %3696  ;;  %2560 = vst.msk [vmem:[%s4275_s24 + $0x448] sm:$0xff] %vm2422_vm1, %v3695_v12  ;;  %v1871_v14 = vpop.f32.mrf.mxu2 }
  0xf4   : > { %v2031_v15 = vpop.f32.mrf.mxu3  ;;  %v3699_v16 = vpop.eup %3698  ;;  %2624 = vst.msk [vmem:[%s4275_s24 + $0x648] sm:$0xff] %vm2422_vm1, %v3697_v13  ;;  %3702 = vtanh.f32 %v1871_v14 }
  0xf5   : > { %v1553_v17 = vpop.f32.mrf.mxu0  ;;  %v1713_v18 = vpop.f32.mrf.mxu1  ;;  %2433 = vst.msk [vmem:[%s4275_s24 + $0x50] sm:$0xff] %vm2422_vm1, %v3699_v16  ;;  %3704 = vtanh.f32 %v2031_v15 }
  0xf6   : > { %v3701_v19 = vpop.eup %3700  ;;  %3706 = vtanh.f32 %v1553_v17 }
  0xf7   : > { %2497 = vst.msk [vmem:[%s4275_s24 + $0x250] sm:$0xff] %vm2422_vm1, %v3701_v19  ;;  %3708 = vtanh.f32 %v1713_v18 }
  0xfa   : > { %v3703_v20 = vpop.eup %3702 }
  0xfb   : > { %v3705_v21 = vpop.eup %3704  ;;  %2561 = vst.msk [vmem:[%s4275_s24 + $0x450] sm:$0xff] %vm2422_vm1, %v3703_v20  ;;  %v1873_v22 = vpop.f32.mrf.mxu2  ;;  %v3467_v20 = vld [vmem:[%s4197_s20 + $0x88] sm:$0xff] }
  0xfc   : > { %v2033_v23 = vpop.f32.mrf.mxu3  ;;  %v3707_v26 = vpop.eup %3706  ;;  %2625 = vst.msk [vmem:[%s4275_s24 + $0x650] sm:$0xff] %vm2422_vm1, %v3705_v21  ;;  %3710 = vtanh.f32 %v1873_v22  ;;  %v3499_v21 = vld [vmem:[%s4197_s20 + $0x188] sm:$0xff] }
  0xfd   : > { %v1556_v27 = vpop.f32.mrf.mxu0  ;;  %v1716_v28 = vpop.f32.mrf.mxu1  ;;  %2434 = vst.msk [vmem:[%s4275_s24 + $0x58] sm:$0xff] %vm2422_vm1, %v3707_v26  ;;  %3712 = vtanh.f32 %v2033_v23  ;;  %v3563_v26 = vld [vmem:[%s4197_s20 + $0x388] sm:$0xff] }
  0xfe   : > { %v3709_v31 = vpop.eup %3708  ;;  %3714 = vtanh.f32 %v1556_v27 }
  0xff   : > { %2498 = vst.msk [vmem:[%s4275_s24 + $0x258] sm:$0xff] %vm2422_vm1, %v3709_v31  ;;  %3716 = vtanh.f32 %v1716_v28  ;;  %3331 = vmatmul.msk.bf16.gmra.mxu0 %vm1132_vm0, %v3464_v24  ;;  %3363 = vmatmul.msk.bf16.gmra.mxu1 %vm1132_vm0, %v3496_v25  ;;  %v3531_v25 = vld [vmem:[%s4197_s20 + $0x288] sm:$0xff] }
 0x100   : > { %3395 = vmatmul.msk.bf16.gmra.mxu2 %vm1132_vm0, %v3528_v29  ;;  %3427 = vmatmul.msk.bf16.gmra.mxu3 %vm1132_vm0, %v3560_v30 }
 0x102   : > { %v3711_v32 = vpop.eup %3710 }
 0x103   : > { %v3713_v33 = vpop.eup %3712  ;;  %2562 = vst.msk [vmem:[%s4275_s24 + $0x458] sm:$0xff] %vm2422_vm1, %v3711_v32  ;;  %v1876_v34 = vpop.f32.mrf.mxu2 }
 0x104   : > { %v2036_v35 = vpop.f32.mrf.mxu3  ;;  %v3715_v36 = vpop.eup %3714  ;;  %2626 = vst.msk [vmem:[%s4275_s24 + $0x658] sm:$0xff] %vm2422_vm1, %v3713_v33  ;;  %3718 = vtanh.f32 %v1876_v34 }
 0x105   : > { %v1558_v37 = vpop.f32.mrf.mxu0  ;;  %v1718_v38 = vpop.f32.mrf.mxu1  ;;  %2435 = vst.msk [vmem:[%s4275_s24 + $0x60] sm:$0xff] %vm2422_vm1, %v3715_v36  ;;  %3720 = vtanh.f32 %v2036_v35 }
 0x106   : > { %v3717_v39 = vpop.eup %3716  ;;  %3722 = vtanh.f32 %v1558_v37 }
 0x107   : > { %2499 = vst.msk [vmem:[%s4275_s24 + $0x260] sm:$0xff] %vm2422_vm1, %v3717_v39  ;;  %3724 = vtanh.f32 %v1718_v38 }
 0x10a   : > { %v3719_v40 = vpop.eup %3718 }
 0x10b   : > { %v3721_v41 = vpop.eup %3720  ;;  %2563 = vst.msk [vmem:[%s4275_s24 + $0x460] sm:$0xff] %vm2422_vm1, %v3719_v40  ;;  %v1878_v42 = vpop.f32.mrf.mxu2  ;;  %v3468_v40 = vld [vmem:[%s4197_s20 + $0x90] sm:$0xff] }
 0x10c   : > { %v2038_v43 = vpop.f32.mrf.mxu3  ;;  %v3723_v46 = vpop.eup %3722  ;;  %2627 = vst.msk [vmem:[%s4275_s24 + $0x660] sm:$0xff] %vm2422_vm1, %v3721_v41  ;;  %3726 = vtanh.f32 %v1878_v42  ;;  %v3500_v41 = vld [vmem:[%s4197_s20 + $0x190] sm:$0xff] }
 0x10d   : > { %v1561_v47 = vpop.f32.mrf.mxu0  ;;  %v1721_v48 = vpop.f32.mrf.mxu1  ;;  %2436 = vst.msk [vmem:[%s4275_s24 + $0x68] sm:$0xff] %vm2422_vm1, %v3723_v46  ;;  %3728 = vtanh.f32 %v2038_v43  ;;  %v3564_v46 = vld [vmem:[%s4197_s20 + $0x390] sm:$0xff] }
 0x10e   : > { %v3725_v51 = vpop.eup %3724  ;;  %3730 = vtanh.f32 %v1561_v47 }
 0x10f   : > { %2500 = vst.msk [vmem:[%s4275_s24 + $0x268] sm:$0xff] %vm2422_vm1, %v3725_v51  ;;  %3732 = vtanh.f32 %v1721_v48  ;;  %3332 = vmatmul.msk.bf16.gmra.mxu0 %vm1132_vm0, %v3465_v44  ;;  %3364 = vmatmul.msk.bf16.gmra.mxu1 %vm1132_vm0, %v3497_v45  ;;  %v3532_v45 = vld [vmem:[%s4197_s20 + $0x290] sm:$0xff] }
 0x110   : > { %3396 = vmatmul.msk.bf16.gmra.mxu2 %vm1132_vm0, %v3529_v49  ;;  %3428 = vmatmul.msk.bf16.gmra.mxu3 %vm1132_vm0, %v3561_v50 }
 0x112   : > { %v3727_v52 = vpop.eup %3726 }
 0x113   : > { %v3729_v53 = vpop.eup %3728  ;;  %2564 = vst.msk [vmem:[%s4275_s24 + $0x468] sm:$0xff] %vm2422_vm1, %v3727_v52  ;;  %v1881_v54 = vpop.f32.mrf.mxu2 }
 0x114   : > { %v2041_v55 = vpop.f32.mrf.mxu3  ;;  %v3731_v56 = vpop.eup %3730  ;;  %2628 = vst.msk [vmem:[%s4275_s24 + $0x668] sm:$0xff] %vm2422_vm1, %v3729_v53  ;;  %3734 = vtanh.f32 %v1881_v54 }
 0x115   : > { %v1563_v57 = vpop.f32.mrf.mxu0  ;;  %v1723_v58 = vpop.f32.mrf.mxu1  ;;  %2437 = vst.msk [vmem:[%s4275_s24 + $0x70] sm:$0xff] %vm2422_vm1, %v3731_v56  ;;  %3736 = vtanh.f32 %v2041_v55 }
 0x116   : > { %v3733_v59 = vpop.eup %3732  ;;  %3738 = vtanh.f32 %v1563_v57 }
 0x117   : > { %2501 = vst.msk [vmem:[%s4275_s24 + $0x270] sm:$0xff] %vm2422_vm1, %v3733_v59  ;;  %3740 = vtanh.f32 %v1723_v58 }
 0x11a   : > { %v3735_v60 = vpop.eup %3734 }
 0x11b   : > { %v3737_v61 = vpop.eup %3736  ;;  %2565 = vst.msk [vmem:[%s4275_s24 + $0x470] sm:$0xff] %vm2422_vm1, %v3735_v60  ;;  %v1883_v62 = vpop.f32.mrf.mxu2  ;;  %v3469_v60 = vld [vmem:[%s4197_s20 + $0x98] sm:$0xff] }
 0x11c   : > { %v2043_v63 = vpop.f32.mrf.mxu3  ;;  %v3739_v2 = vpop.eup %3738  ;;  %2629 = vst.msk [vmem:[%s4275_s24 + $0x670] sm:$0xff] %vm2422_vm1, %v3737_v61  ;;  %3742 = vtanh.f32 %v1883_v62  ;;  %v3501_v61 = vld [vmem:[%s4197_s20 + $0x198] sm:$0xff] }
 0x11d   : > { %v1566_v3 = vpop.f32.mrf.mxu0  ;;  %v1726_v4 = vpop.f32.mrf.mxu1  ;;  %2438 = vst.msk [vmem:[%s4275_s24 + $0x78] sm:$0xff] %vm2422_vm1, %v3739_v2  ;;  %3744 = vtanh.f32 %v2043_v63  ;;  %v3565_v2 = vld [vmem:[%s4197_s20 + $0x398] sm:$0xff] }
 0x11e   : > { %v3741_v7 = vpop.eup %3740  ;;  %3746 = vtanh.f32 %v1566_v3 }
 0x11f   : > { %2502 = vst.msk [vmem:[%s4275_s24 + $0x278] sm:$0xff] %vm2422_vm1, %v3741_v7  ;;  %3748 = vtanh.f32 %v1726_v4  ;;  %3333 = vmatmul.msk.bf16.gmra.mxu0 %vm1132_vm0, %v3466_v0  ;;  %3365 = vmatmul.msk.bf16.gmra.mxu1 %vm1132_vm0, %v3498_v1  ;;  %v3533_v1 = vld [vmem:[%s4197_s20 + $0x298] sm:$0xff] }
 0x120   : > { %3397 = vmatmul.msk.bf16.gmra.mxu2 %vm1132_vm0, %v3530_v5  ;;  %3429 = vmatmul.msk.bf16.gmra.mxu3 %vm1132_vm0, %v3562_v6 }
 0x122   : > { %v3743_v8 = vpop.eup %3742 }
 0x123   : > { %v3745_v9 = vpop.eup %3744  ;;  %2566 = vst.msk [vmem:[%s4275_s24 + $0x478] sm:$0xff] %vm2422_vm1, %v3743_v8  ;;  %v1886_v10 = vpop.f32.mrf.mxu2 }
 0x124   : > { %v2046_v11 = vpop.f32.mrf.mxu3  ;;  %v3747_v12 = vpop.eup %3746  ;;  %2630 = vst.msk [vmem:[%s4275_s24 + $0x678] sm:$0xff] %vm2422_vm1, %v3745_v9  ;;  %3750 = vtanh.f32 %v1886_v10 }
 0x125   : > { %v1568_v13 = vpop.f32.mrf.mxu0  ;;  %v1728_v14 = vpop.f32.mrf.mxu1  ;;  %2439 = vst.msk [vmem:[%s4275_s24 + $0x80] sm:$0xff] %vm2422_vm1, %v3747_v12  ;;  %3752 = vtanh.f32 %v2046_v11 }
 0x126   : > { %v3749_v15 = vpop.eup %3748  ;;  %3754 = vtanh.f32 %v1568_v13 }
 0x127   : > { %2503 = vst.msk [vmem:[%s4275_s24 + $0x280] sm:$0xff] %vm2422_vm1, %v3749_v15  ;;  %3756 = vtanh.f32 %v1728_v14 }
 0x12a   : > { %v3751_v16 = vpop.eup %3750 }
 0x12b   : > { %v3753_v17 = vpop.eup %3752  ;;  %2567 = vst.msk [vmem:[%s4275_s24 + $0x480] sm:$0xff] %vm2422_vm1, %v3751_v16  ;;  %v1888_v18 = vpop.f32.mrf.mxu2  ;;  %v3470_v16 = vld [vmem:[%s4197_s20 + $0xa0] sm:$0xff] }
 0x12c   : > { %v2048_v19 = vpop.f32.mrf.mxu3  ;;  %v3755_v22 = vpop.eup %3754  ;;  %2631 = vst.msk [vmem:[%s4275_s24 + $0x680] sm:$0xff] %vm2422_vm1, %v3753_v17  ;;  %3758 = vtanh.f32 %v1888_v18  ;;  %v3502_v17 = vld [vmem:[%s4197_s20 + $0x1a0] sm:$0xff] }
 0x12d   : > { %v1571_v23 = vpop.f32.mrf.mxu0  ;;  %v1731_v24 = vpop.f32.mrf.mxu1  ;;  %2440 = vst.msk [vmem:[%s4275_s24 + $0x88] sm:$0xff] %vm2422_vm1, %v3755_v22  ;;  %3760 = vtanh.f32 %v2048_v19  ;;  %v3566_v22 = vld [vmem:[%s4197_s20 + $0x3a0] sm:$0xff] }
 0x12e   : > { %v3757_v27 = vpop.eup %3756  ;;  %3762 = vtanh.f32 %v1571_v23 }
 0x12f   : > { %2504 = vst.msk [vmem:[%s4275_s24 + $0x288] sm:$0xff] %vm2422_vm1, %v3757_v27  ;;  %3764 = vtanh.f32 %v1731_v24  ;;  %3334 = vmatmul.msk.bf16.gmra.mxu0 %vm1132_vm0, %v3467_v20  ;;  %3366 = vmatmul.msk.bf16.gmra.mxu1 %vm1132_vm0, %v3499_v21  ;;  %v3534_v21 = vld [vmem:[%s4197_s20 + $0x2a0] sm:$0xff] }
 0x130   : > { %3398 = vmatmul.msk.bf16.gmra.mxu2 %vm1132_vm0, %v3531_v25  ;;  %3430 = vmatmul.msk.bf16.gmra.mxu3 %vm1132_vm0, %v3563_v26 }
 0x132   : > { %v3759_v28 = vpop.eup %3758 }
 0x133   : > { %v3761_v29 = vpop.eup %3760  ;;  %2568 = vst.msk [vmem:[%s4275_s24 + $0x488] sm:$0xff] %vm2422_vm1, %v3759_v28  ;;  %v1891_v30 = vpop.f32.mrf.mxu2 }
 0x134   : > { %v2051_v31 = vpop.f32.mrf.mxu3  ;;  %v3763_v32 = vpop.eup %3762  ;;  %2632 = vst.msk [vmem:[%s4275_s24 + $0x688] sm:$0xff] %vm2422_vm1, %v3761_v29  ;;  %3766 = vtanh.f32 %v1891_v30 }
 0x135   : > { %v1573_v33 = vpop.f32.mrf.mxu0  ;;  %v1733_v34 = vpop.f32.mrf.mxu1  ;;  %2441 = vst.msk [vmem:[%s4275_s24 + $0x90] sm:$0xff] %vm2422_vm1, %v3763_v32  ;;  %3768 = vtanh.f32 %v2051_v31 }
 0x136   : > { %v3765_v35 = vpop.eup %3764  ;;  %3770 = vtanh.f32 %v1573_v33 }
 0x137   : > { %2505 = vst.msk [vmem:[%s4275_s24 + $0x290] sm:$0xff] %vm2422_vm1, %v3765_v35  ;;  %3772 = vtanh.f32 %v1733_v34 }
 0x13a   : > { %v3767_v36 = vpop.eup %3766 }
 0x13b   : > { %v3769_v37 = vpop.eup %3768  ;;  %2569 = vst.msk [vmem:[%s4275_s24 + $0x490] sm:$0xff] %vm2422_vm1, %v3767_v36  ;;  %v1893_v38 = vpop.f32.mrf.mxu2  ;;  %v3471_v36 = vld [vmem:[%s4197_s20 + $0xa8] sm:$0xff] }
 0x13c   : > { %v2053_v39 = vpop.f32.mrf.mxu3  ;;  %v3771_v42 = vpop.eup %3770  ;;  %2633 = vst.msk [vmem:[%s4275_s24 + $0x690] sm:$0xff] %vm2422_vm1, %v3769_v37  ;;  %3774 = vtanh.f32 %v1893_v38  ;;  %v3503_v37 = vld [vmem:[%s4197_s20 + $0x1a8] sm:$0xff] }
 0x13d   : > { %v1576_v43 = vpop.f32.mrf.mxu0  ;;  %v1736_v44 = vpop.f32.mrf.mxu1  ;;  %2442 = vst.msk [vmem:[%s4275_s24 + $0x98] sm:$0xff] %vm2422_vm1, %v3771_v42  ;;  %3776 = vtanh.f32 %v2053_v39  ;;  %v3567_v42 = vld [vmem:[%s4197_s20 + $0x3a8] sm:$0xff] }
 0x13e   : > { %v3773_v47 = vpop.eup %3772  ;;  %3778 = vtanh.f32 %v1576_v43 }
 0x13f   : > { %2506 = vst.msk [vmem:[%s4275_s24 + $0x298] sm:$0xff] %vm2422_vm1, %v3773_v47  ;;  %3780 = vtanh.f32 %v1736_v44  ;;  %3335 = vmatmul.msk.bf16.gmra.mxu0 %vm1132_vm0, %v3468_v40  ;;  %3367 = vmatmul.msk.bf16.gmra.mxu1 %vm1132_vm0, %v3500_v41  ;;  %v3535_v41 = vld [vmem:[%s4197_s20 + $0x2a8] sm:$0xff] }
 0x140   : > { %3399 = vmatmul.msk.bf16.gmra.mxu2 %vm1132_vm0, %v3532_v45  ;;  %3431 = vmatmul.msk.bf16.gmra.mxu3 %vm1132_vm0, %v3564_v46 }
 0x142   : > { %v3775_v48 = vpop.eup %3774 }
 0x143   : > { %v3777_v49 = vpop.eup %3776  ;;  %2570 = vst.msk [vmem:[%s4275_s24 + $0x498] sm:$0xff] %vm2422_vm1, %v3775_v48  ;;  %v1896_v50 = vpop.f32.mrf.mxu2 }
 0x144   : > { %v2056_v51 = vpop.f32.mrf.mxu3  ;;  %v3779_v52 = vpop.eup %3778  ;;  %2634 = vst.msk [vmem:[%s4275_s24 + $0x698] sm:$0xff] %vm2422_vm1, %v3777_v49  ;;  %3782 = vtanh.f32 %v1896_v50 }
 0x145   : > { %v1578_v53 = vpop.f32.mrf.mxu0  ;;  %v1738_v54 = vpop.f32.mrf.mxu1  ;;  %2443 = vst.msk [vmem:[%s4275_s24 + $0xa0] sm:$0xff] %vm2422_vm1, %v3779_v52  ;;  %3784 = vtanh.f32 %v2056_v51 }
 0x146   : > { %v3781_v55 = vpop.eup %3780  ;;  %3786 = vtanh.f32 %v1578_v53 }
 0x147   : > { %2507 = vst.msk [vmem:[%s4275_s24 + $0x2a0] sm:$0xff] %vm2422_vm1, %v3781_v55  ;;  %3788 = vtanh.f32 %v1738_v54 }
 0x14a   : > { %v3783_v56 = vpop.eup %3782 }
 0x14b   : > { %v3785_v57 = vpop.eup %3784  ;;  %2571 = vst.msk [vmem:[%s4275_s24 + $0x4a0] sm:$0xff] %vm2422_vm1, %v3783_v56  ;;  %v1898_v58 = vpop.f32.mrf.mxu2  ;;  %v3472_v56 = vld [vmem:[%s4197_s20 + $0xb0] sm:$0xff] }
 0x14c   : > { %v2058_v59 = vpop.f32.mrf.mxu3  ;;  %v3787_v62 = vpop.eup %3786  ;;  %2635 = vst.msk [vmem:[%s4275_s24 + $0x6a0] sm:$0xff] %vm2422_vm1, %v3785_v57  ;;  %3790 = vtanh.f32 %v1898_v58  ;;  %v3504_v57 = vld [vmem:[%s4197_s20 + $0x1b0] sm:$0xff] }
 0x14d   : > { %v1581_v63 = vpop.f32.mrf.mxu0  ;;  %v1741_v0 = vpop.f32.mrf.mxu1  ;;  %2444 = vst.msk [vmem:[%s4275_s24 + $0xa8] sm:$0xff] %vm2422_vm1, %v3787_v62  ;;  %3792 = vtanh.f32 %v2058_v59  ;;  %v3568_v62 = vld [vmem:[%s4197_s20 + $0x3b0] sm:$0xff] }
 0x14e   : > { %v3789_v3 = vpop.eup %3788  ;;  %3794 = vtanh.f32 %v1581_v63 }
 0x14f   : > { %2508 = vst.msk [vmem:[%s4275_s24 + $0x2a8] sm:$0xff] %vm2422_vm1, %v3789_v3  ;;  %3796 = vtanh.f32 %v1741_v0  ;;  %3336 = vmatmul.msk.bf16.gmra.mxu0 %vm1132_vm0, %v3469_v60  ;;  %3368 = vmatmul.msk.bf16.gmra.mxu1 %vm1132_vm0, %v3501_v61  ;;  %v3536_v61 = vld [vmem:[%s4197_s20 + $0x2b0] sm:$0xff] }
 0x150   : > { %3400 = vmatmul.msk.bf16.gmra.mxu2 %vm1132_vm0, %v3533_v1  ;;  %3432 = vmatmul.msk.bf16.gmra.mxu3 %vm1132_vm0, %v3565_v2 }
 0x152   : > { %v3791_v4 = vpop.eup %3790 }
 0x153   : > { %v3793_v5 = vpop.eup %3792  ;;  %2572 = vst.msk [vmem:[%s4275_s24 + $0x4a8] sm:$0xff] %vm2422_vm1, %v3791_v4  ;;  %v1901_v6 = vpop.f32.mrf.mxu2 }
 0x154   : > { %v2061_v7 = vpop.f32.mrf.mxu3  ;;  %v3795_v8 = vpop.eup %3794  ;;  %2636 = vst.msk [vmem:[%s4275_s24 + $0x6a8] sm:$0xff] %vm2422_vm1, %v3793_v5  ;;  %3798 = vtanh.f32 %v1901_v6 }
 0x155   : > { %v1583_v9 = vpop.f32.mrf.mxu0  ;;  %v1743_v10 = vpop.f32.mrf.mxu1  ;;  %2445 = vst.msk [vmem:[%s4275_s24 + $0xb0] sm:$0xff] %vm2422_vm1, %v3795_v8  ;;  %3800 = vtanh.f32 %v2061_v7 }
 0x156   : > { %v3797_v11 = vpop.eup %3796  ;;  %3802 = vtanh.f32 %v1583_v9 }
 0x157   : > { %2509 = vst.msk [vmem:[%s4275_s24 + $0x2b0] sm:$0xff] %vm2422_vm1, %v3797_v11  ;;  %3804 = vtanh.f32 %v1743_v10 }
 0x15a   : > { %v3799_v12 = vpop.eup %3798 }
 0x15b   : > { %v3801_v13 = vpop.eup %3800  ;;  %2573 = vst.msk [vmem:[%s4275_s24 + $0x4b0] sm:$0xff] %vm2422_vm1, %v3799_v12  ;;  %v1903_v14 = vpop.f32.mrf.mxu2  ;;  %v3473_v12 = vld [vmem:[%s4197_s20 + $0xb8] sm:$0xff] }
 0x15c   : > { %v2063_v15 = vpop.f32.mrf.mxu3  ;;  %v3803_v18 = vpop.eup %3802  ;;  %2637 = vst.msk [vmem:[%s4275_s24 + $0x6b0] sm:$0xff] %vm2422_vm1, %v3801_v13  ;;  %3806 = vtanh.f32 %v1903_v14  ;;  %v3505_v13 = vld [vmem:[%s4197_s20 + $0x1b8] sm:$0xff] }
 0x15d   : > { %v1586_v19 = vpop.f32.mrf.mxu0  ;;  %v1746_v20 = vpop.f32.mrf.mxu1  ;;  %2446 = vst.msk [vmem:[%s4275_s24 + $0xb8] sm:$0xff] %vm2422_vm1, %v3803_v18  ;;  %3808 = vtanh.f32 %v2063_v15  ;;  %v3569_v18 = vld [vmem:[%s4197_s20 + $0x3b8] sm:$0xff] }
 0x15e   : > { %v3805_v23 = vpop.eup %3804  ;;  %3810 = vtanh.f32 %v1586_v19 }
 0x15f   : > { %2510 = vst.msk [vmem:[%s4275_s24 + $0x2b8] sm:$0xff] %vm2422_vm1, %v3805_v23  ;;  %3812 = vtanh.f32 %v1746_v20  ;;  %3337 = vmatmul.msk.bf16.gmra.mxu0 %vm1132_vm0, %v3470_v16  ;;  %3369 = vmatmul.msk.bf16.gmra.mxu1 %vm1132_vm0, %v3502_v17  ;;  %v3537_v17 = vld [vmem:[%s4197_s20 + $0x2b8] sm:$0xff] }
 0x160   : > { %3401 = vmatmul.msk.bf16.gmra.mxu2 %vm1132_vm0, %v3534_v21  ;;  %3433 = vmatmul.msk.bf16.gmra.mxu3 %vm1132_vm0, %v3566_v22 }
 0x162   : > { %v3807_v24 = vpop.eup %3806 }
 0x163   : > { %v3809_v25 = vpop.eup %3808  ;;  %2574 = vst.msk [vmem:[%s4275_s24 + $0x4b8] sm:$0xff] %vm2422_vm1, %v3807_v24  ;;  %v1906_v26 = vpop.f32.mrf.mxu2 }
 0x164   : > { %v2066_v27 = vpop.f32.mrf.mxu3  ;;  %v3811_v28 = vpop.eup %3810  ;;  %2638 = vst.msk [vmem:[%s4275_s24 + $0x6b8] sm:$0xff] %vm2422_vm1, %v3809_v25  ;;  %3814 = vtanh.f32 %v1906_v26 }
 0x165   : > { %v1588_v29 = vpop.f32.mrf.mxu0  ;;  %v1748_v30 = vpop.f32.mrf.mxu1  ;;  %2447 = vst.msk [vmem:[%s4275_s24 + $0xc0] sm:$0xff] %vm2422_vm1, %v3811_v28  ;;  %3816 = vtanh.f32 %v2066_v27 }
 0x166   : > { %v3813_v31 = vpop.eup %3812  ;;  %3818 = vtanh.f32 %v1588_v29 }
 0x167   : > { %2511 = vst.msk [vmem:[%s4275_s24 + $0x2c0] sm:$0xff] %vm2422_vm1, %v3813_v31  ;;  %3820 = vtanh.f32 %v1748_v30 }
 0x16a   : > { %v3815_v32 = vpop.eup %3814 }
 0x16b   : > { %v3817_v33 = vpop.eup %3816  ;;  %2575 = vst.msk [vmem:[%s4275_s24 + $0x4c0] sm:$0xff] %vm2422_vm1, %v3815_v32  ;;  %v1908_v34 = vpop.f32.mrf.mxu2  ;;  %v3474_v32 = vld [vmem:[%s4197_s20 + $0xc0] sm:$0xff] }
 0x16c   : > { %v2068_v35 = vpop.f32.mrf.mxu3  ;;  %v3819_v38 = vpop.eup %3818  ;;  %2639 = vst.msk [vmem:[%s4275_s24 + $0x6c0] sm:$0xff] %vm2422_vm1, %v3817_v33  ;;  %3822 = vtanh.f32 %v1908_v34  ;;  %v3506_v33 = vld [vmem:[%s4197_s20 + $0x1c0] sm:$0xff] }
 0x16d   : > { %v1591_v39 = vpop.f32.mrf.mxu0  ;;  %v1751_v40 = vpop.f32.mrf.mxu1  ;;  %2448 = vst.msk [vmem:[%s4275_s24 + $0xc8] sm:$0xff] %vm2422_vm1, %v3819_v38  ;;  %3824 = vtanh.f32 %v2068_v35  ;;  %v3570_v38 = vld [vmem:[%s4197_s20 + $0x3c0] sm:$0xff] }
 0x16e   : > { %v3821_v43 = vpop.eup %3820  ;;  %3826 = vtanh.f32 %v1591_v39 }
 0x16f   : > { %2512 = vst.msk [vmem:[%s4275_s24 + $0x2c8] sm:$0xff] %vm2422_vm1, %v3821_v43  ;;  %3828 = vtanh.f32 %v1751_v40  ;;  %3338 = vmatmul.msk.bf16.gmra.mxu0 %vm1132_vm0, %v3471_v36  ;;  %3370 = vmatmul.msk.bf16.gmra.mxu1 %vm1132_vm0, %v3503_v37  ;;  %v3538_v37 = vld [vmem:[%s4197_s20 + $0x2c0] sm:$0xff] }
 0x170   : > { %3402 = vmatmul.msk.bf16.gmra.mxu2 %vm1132_vm0, %v3535_v41  ;;  %3434 = vmatmul.msk.bf16.gmra.mxu3 %vm1132_vm0, %v3567_v42 }
 0x172   : > { %v3823_v44 = vpop.eup %3822 }
 0x173   : > { %v3825_v45 = vpop.eup %3824  ;;  %2576 = vst.msk [vmem:[%s4275_s24 + $0x4c8] sm:$0xff] %vm2422_vm1, %v3823_v44  ;;  %v1911_v46 = vpop.f32.mrf.mxu2 }
 0x174   : > { %v2071_v47 = vpop.f32.mrf.mxu3  ;;  %v3827_v48 = vpop.eup %3826  ;;  %2640 = vst.msk [vmem:[%s4275_s24 + $0x6c8] sm:$0xff] %vm2422_vm1, %v3825_v45  ;;  %3830 = vtanh.f32 %v1911_v46 }
 0x175   : > { %v1593_v49 = vpop.f32.mrf.mxu0  ;;  %v1753_v50 = vpop.f32.mrf.mxu1  ;;  %2449 = vst.msk [vmem:[%s4275_s24 + $0xd0] sm:$0xff] %vm2422_vm1, %v3827_v48  ;;  %3832 = vtanh.f32 %v2071_v47 }
 0x176   : > { %v3829_v51 = vpop.eup %3828  ;;  %3834 = vtanh.f32 %v1593_v49 }
 0x177   : > { %2513 = vst.msk [vmem:[%s4275_s24 + $0x2d0] sm:$0xff] %vm2422_vm1, %v3829_v51  ;;  %3836 = vtanh.f32 %v1753_v50 }
 0x17a   : > { %v3831_v52 = vpop.eup %3830 }
 0x17b   : > { %v3833_v53 = vpop.eup %3832  ;;  %2577 = vst.msk [vmem:[%s4275_s24 + $0x4d0] sm:$0xff] %vm2422_vm1, %v3831_v52  ;;  %v1913_v54 = vpop.f32.mrf.mxu2  ;;  %v3475_v52 = vld [vmem:[%s4197_s20 + $0xc8] sm:$0xff] }
 0x17c   : > { %v2073_v55 = vpop.f32.mrf.mxu3  ;;  %v3835_v58 = vpop.eup %3834  ;;  %2641 = vst.msk [vmem:[%s4275_s24 + $0x6d0] sm:$0xff] %vm2422_vm1, %v3833_v53  ;;  %3838 = vtanh.f32 %v1913_v54  ;;  %v3507_v53 = vld [vmem:[%s4197_s20 + $0x1c8] sm:$0xff] }
 0x17d   : > { %v1596_v59 = vpop.f32.mrf.mxu0  ;;  %v1756_v60 = vpop.f32.mrf.mxu1  ;;  %2450 = vst.msk [vmem:[%s4275_s24 + $0xd8] sm:$0xff] %vm2422_vm1, %v3835_v58  ;;  %3840 = vtanh.f32 %v2073_v55  ;;  %v3571_v58 = vld [vmem:[%s4197_s20 + $0x3c8] sm:$0xff] }
 0x17e   : > { %v3837_v63 = vpop.eup %3836  ;;  %3842 = vtanh.f32 %v1596_v59 }
 0x17f   : > { %2514 = vst.msk [vmem:[%s4275_s24 + $0x2d8] sm:$0xff] %vm2422_vm1, %v3837_v63  ;;  %3844 = vtanh.f32 %v1756_v60  ;;  %3339 = vmatmul.msk.bf16.gmra.mxu0 %vm1132_vm0, %v3472_v56  ;;  %3371 = vmatmul.msk.bf16.gmra.mxu1 %vm1132_vm0, %v3504_v57  ;;  %v3539_v57 = vld [vmem:[%s4197_s20 + $0x2c8] sm:$0xff] }
 0x180   : > { %3403 = vmatmul.msk.bf16.gmra.mxu2 %vm1132_vm0, %v3536_v61  ;;  %3435 = vmatmul.msk.bf16.gmra.mxu3 %vm1132_vm0, %v3568_v62 }
 0x182   : > { %v3839_v0 = vpop.eup %3838 }
 0x183   : > { %v3841_v1 = vpop.eup %3840  ;;  %2578 = vst.msk [vmem:[%s4275_s24 + $0x4d8] sm:$0xff] %vm2422_vm1, %v3839_v0  ;;  %v1916_v2 = vpop.f32.mrf.mxu2 }
 0x184   : > { %v2076_v3 = vpop.f32.mrf.mxu3  ;;  %v3843_v4 = vpop.eup %3842  ;;  %2642 = vst.msk [vmem:[%s4275_s24 + $0x6d8] sm:$0xff] %vm2422_vm1, %v3841_v1  ;;  %3846 = vtanh.f32 %v1916_v2 }
 0x185   : > { %v1598_v5 = vpop.f32.mrf.mxu0  ;;  %v1758_v6 = vpop.f32.mrf.mxu1  ;;  %2451 = vst.msk [vmem:[%s4275_s24 + $0xe0] sm:$0xff] %vm2422_vm1, %v3843_v4  ;;  %3848 = vtanh.f32 %v2076_v3 }
 0x186   : > { %v3845_v7 = vpop.eup %3844  ;;  %3850 = vtanh.f32 %v1598_v5 }
 0x187   : > { %2515 = vst.msk [vmem:[%s4275_s24 + $0x2e0] sm:$0xff] %vm2422_vm1, %v3845_v7  ;;  %3852 = vtanh.f32 %v1758_v6 }
 0x18a   : > { %v3847_v8 = vpop.eup %3846 }
 0x18b   : > { %v3849_v9 = vpop.eup %3848  ;;  %2579 = vst.msk [vmem:[%s4275_s24 + $0x4e0] sm:$0xff] %vm2422_vm1, %v3847_v8  ;;  %v1918_v10 = vpop.f32.mrf.mxu2  ;;  %v3476_v8 = vld [vmem:[%s4197_s20 + $0xd0] sm:$0xff] }
 0x18c   : > { %v2078_v11 = vpop.f32.mrf.mxu3  ;;  %v3851_v14 = vpop.eup %3850  ;;  %2643 = vst.msk [vmem:[%s4275_s24 + $0x6e0] sm:$0xff] %vm2422_vm1, %v3849_v9  ;;  %3854 = vtanh.f32 %v1918_v10  ;;  %v3508_v9 = vld [vmem:[%s4197_s20 + $0x1d0] sm:$0xff] }
 0x18d   : > { %v1601_v15 = vpop.f32.mrf.mxu0  ;;  %v1761_v16 = vpop.f32.mrf.mxu1  ;;  %2452 = vst.msk [vmem:[%s4275_s24 + $0xe8] sm:$0xff] %vm2422_vm1, %v3851_v14  ;;  %3856 = vtanh.f32 %v2078_v11  ;;  %v3572_v14 = vld [vmem:[%s4197_s20 + $0x3d0] sm:$0xff] }
 0x18e   : > { %v3853_v19 = vpop.eup %3852  ;;  %3858 = vtanh.f32 %v1601_v15 }
 0x18f   : > { %2516 = vst.msk [vmem:[%s4275_s24 + $0x2e8] sm:$0xff] %vm2422_vm1, %v3853_v19  ;;  %3860 = vtanh.f32 %v1761_v16  ;;  %3340 = vmatmul.msk.bf16.gmra.mxu0 %vm1132_vm0, %v3473_v12  ;;  %3372 = vmatmul.msk.bf16.gmra.mxu1 %vm1132_vm0, %v3505_v13  ;;  %v3540_v13 = vld [vmem:[%s4197_s20 + $0x2d0] sm:$0xff] }
 0x190   : > { %3404 = vmatmul.msk.bf16.gmra.mxu2 %vm1132_vm0, %v3537_v17  ;;  %3436 = vmatmul.msk.bf16.gmra.mxu3 %vm1132_vm0, %v3569_v18 }
 0x192   : > { %v3855_v20 = vpop.eup %3854 }
 0x193   : > { %v3857_v21 = vpop.eup %3856  ;;  %2580 = vst.msk [vmem:[%s4275_s24 + $0x4e8] sm:$0xff] %vm2422_vm1, %v3855_v20  ;;  %v1921_v22 = vpop.f32.mrf.mxu2 }
 0x194   : > { %v2081_v23 = vpop.f32.mrf.mxu3  ;;  %v3859_v24 = vpop.eup %3858  ;;  %2644 = vst.msk [vmem:[%s4275_s24 + $0x6e8] sm:$0xff] %vm2422_vm1, %v3857_v21  ;;  %3862 = vtanh.f32 %v1921_v22 }
 0x195   : > { %v1603_v25 = vpop.f32.mrf.mxu0  ;;  %v1763_v26 = vpop.f32.mrf.mxu1  ;;  %2453 = vst.msk [vmem:[%s4275_s24 + $0xf0] sm:$0xff] %vm2422_vm1, %v3859_v24  ;;  %3864 = vtanh.f32 %v2081_v23 }
 0x196   : > { %v3861_v27 = vpop.eup %3860  ;;  %3866 = vtanh.f32 %v1603_v25 }
 0x197   : > { %2517 = vst.msk [vmem:[%s4275_s24 + $0x2f0] sm:$0xff] %vm2422_vm1, %v3861_v27  ;;  %3868 = vtanh.f32 %v1763_v26 }
 0x19a   : > { %v3863_v28 = vpop.eup %3862 }
 0x19b   : > { %v3865_v29 = vpop.eup %3864  ;;  %2581 = vst.msk [vmem:[%s4275_s24 + $0x4f0] sm:$0xff] %vm2422_vm1, %v3863_v28  ;;  %v1923_v30 = vpop.f32.mrf.mxu2  ;;  %v3477_v28 = vld [vmem:[%s4197_s20 + $0xd8] sm:$0xff] }
 0x19c   : > { %v2083_v31 = vpop.f32.mrf.mxu3  ;;  %v3867_v34 = vpop.eup %3866  ;;  %2645 = vst.msk [vmem:[%s4275_s24 + $0x6f0] sm:$0xff] %vm2422_vm1, %v3865_v29  ;;  %3870 = vtanh.f32 %v1923_v30  ;;  %v3509_v29 = vld [vmem:[%s4197_s20 + $0x1d8] sm:$0xff] }
 0x19d   : > { %v1606_v35 = vpop.f32.mrf.mxu0  ;;  %v1766_v36 = vpop.f32.mrf.mxu1  ;;  %2454 = vst.msk [vmem:[%s4275_s24 + $0xf8] sm:$0xff] %vm2422_vm1, %v3867_v34  ;;  %3872 = vtanh.f32 %v2083_v31  ;;  %v3573_v34 = vld [vmem:[%s4197_s20 + $0x3d8] sm:$0xff] }
 0x19e   : > { %v3869_v39 = vpop.eup %3868  ;;  %3874 = vtanh.f32 %v1606_v35 }
 0x19f   : > { %2518 = vst.msk [vmem:[%s4275_s24 + $0x2f8] sm:$0xff] %vm2422_vm1, %v3869_v39  ;;  %3876 = vtanh.f32 %v1766_v36  ;;  %3341 = vmatmul.msk.bf16.gmra.mxu0 %vm1132_vm0, %v3474_v32  ;;  %3373 = vmatmul.msk.bf16.gmra.mxu1 %vm1132_vm0, %v3506_v33  ;;  %v3541_v33 = vld [vmem:[%s4197_s20 + $0x2d8] sm:$0xff] }
 0x1a0   : > { %3405 = vmatmul.msk.bf16.gmra.mxu2 %vm1132_vm0, %v3538_v37  ;;  %3437 = vmatmul.msk.bf16.gmra.mxu3 %vm1132_vm0, %v3570_v38 }
 0x1a2   : > { %v3871_v40 = vpop.eup %3870 }
 0x1a3   : > { %v3873_v41 = vpop.eup %3872  ;;  %2582 = vst.msk [vmem:[%s4275_s24 + $0x4f8] sm:$0xff] %vm2422_vm1, %v3871_v40  ;;  %v1926_v42 = vpop.f32.mrf.mxu2 }
 0x1a4   : > { %v2086_v43 = vpop.f32.mrf.mxu3  ;;  %v3875_v44 = vpop.eup %3874  ;;  %2646 = vst.msk [vmem:[%s4275_s24 + $0x6f8] sm:$0xff] %vm2422_vm1, %v3873_v41  ;;  %3878 = vtanh.f32 %v1926_v42 }
 0x1a5   : > { %v1608_v45 = vpop.f32.mrf.mxu0  ;;  %v1768_v46 = vpop.f32.mrf.mxu1  ;;  %2455 = vst.msk [vmem:[%s4275_s24 + $0x100] sm:$0xff] %vm2422_vm1, %v3875_v44  ;;  %3880 = vtanh.f32 %v2086_v43 }
 0x1a6   : > { %v3877_v47 = vpop.eup %3876  ;;  %3882 = vtanh.f32 %v1608_v45 }
 0x1a7   : > { %2519 = vst.msk [vmem:[%s4275_s24 + $0x300] sm:$0xff] %vm2422_vm1, %v3877_v47  ;;  %3884 = vtanh.f32 %v1768_v46 }
 0x1aa   : > { %v3879_v48 = vpop.eup %3878 }
 0x1ab   : > { %v3881_v49 = vpop.eup %3880  ;;  %2583 = vst.msk [vmem:[%s4275_s24 + $0x500] sm:$0xff] %vm2422_vm1, %v3879_v48  ;;  %v1928_v50 = vpop.f32.mrf.mxu2  ;;  %v3478_v48 = vld [vmem:[%s4197_s20 + $0xe0] sm:$0xff] }
 0x1ac   : > { %v2088_v51 = vpop.f32.mrf.mxu3  ;;  %v3883_v54 = vpop.eup %3882  ;;  %2647 = vst.msk [vmem:[%s4275_s24 + $0x700] sm:$0xff] %vm2422_vm1, %v3881_v49  ;;  %3886 = vtanh.f32 %v1928_v50  ;;  %v3510_v49 = vld [vmem:[%s4197_s20 + $0x1e0] sm:$0xff] }
 0x1ad   : > { %v1611_v55 = vpop.f32.mrf.mxu0  ;;  %v1771_v56 = vpop.f32.mrf.mxu1  ;;  %2456 = vst.msk [vmem:[%s4275_s24 + $0x108] sm:$0xff] %vm2422_vm1, %v3883_v54  ;;  %3888 = vtanh.f32 %v2088_v51  ;;  %v3574_v54 = vld [vmem:[%s4197_s20 + $0x3e0] sm:$0xff] }
 0x1ae   : > { %v3885_v59 = vpop.eup %3884  ;;  %3890 = vtanh.f32 %v1611_v55 }
 0x1af   : > { %2520 = vst.msk [vmem:[%s4275_s24 + $0x308] sm:$0xff] %vm2422_vm1, %v3885_v59  ;;  %3892 = vtanh.f32 %v1771_v56  ;;  %3342 = vmatmul.msk.bf16.gmra.mxu0 %vm1132_vm0, %v3475_v52  ;;  %3374 = vmatmul.msk.bf16.gmra.mxu1 %vm1132_vm0, %v3507_v53  ;;  %v3542_v53 = vld [vmem:[%s4197_s20 + $0x2e0] sm:$0xff] }
 0x1b0   : > { %3406 = vmatmul.msk.bf16.gmra.mxu2 %vm1132_vm0, %v3539_v57  ;;  %3438 = vmatmul.msk.bf16.gmra.mxu3 %vm1132_vm0, %v3571_v58 }
 0x1b2   : > { %v3887_v60 = vpop.eup %3886 }
 0x1b3   : > { %v3889_v61 = vpop.eup %3888  ;;  %2584 = vst.msk [vmem:[%s4275_s24 + $0x508] sm:$0xff] %vm2422_vm1, %v3887_v60  ;;  %v1931_v62 = vpop.f32.mrf.mxu2 }
 0x1b4   : > { %v2091_v63 = vpop.f32.mrf.mxu3  ;;  %v3891_v0 = vpop.eup %3890  ;;  %2648 = vst.msk [vmem:[%s4275_s24 + $0x708] sm:$0xff] %vm2422_vm1, %v3889_v61  ;;  %3894 = vtanh.f32 %v1931_v62 }
 0x1b5   : > { %v1613_v1 = vpop.f32.mrf.mxu0  ;;  %v1773_v2 = vpop.f32.mrf.mxu1  ;;  %2457 = vst.msk [vmem:[%s4275_s24 + $0x110] sm:$0xff] %vm2422_vm1, %v3891_v0  ;;  %3896 = vtanh.f32 %v2091_v63 }
 0x1b6   : > { %v3893_v3 = vpop.eup %3892  ;;  %3898 = vtanh.f32 %v1613_v1 }
 0x1b7   : > { %2521 = vst.msk [vmem:[%s4275_s24 + $0x310] sm:$0xff] %vm2422_vm1, %v3893_v3  ;;  %3900 = vtanh.f32 %v1773_v2 }
 0x1ba   : > { %v3895_v4 = vpop.eup %3894 }
 0x1bb   : > { %v3897_v5 = vpop.eup %3896  ;;  %2585 = vst.msk [vmem:[%s4275_s24 + $0x510] sm:$0xff] %vm2422_vm1, %v3895_v4  ;;  %v1933_v6 = vpop.f32.mrf.mxu2  ;;  %v3479_v4 = vld [vmem:[%s4197_s20 + $0xe8] sm:$0xff] }
 0x1bc   : > { %v2093_v7 = vpop.f32.mrf.mxu3  ;;  %v3899_v10 = vpop.eup %3898  ;;  %2649 = vst.msk [vmem:[%s4275_s24 + $0x710] sm:$0xff] %vm2422_vm1, %v3897_v5  ;;  %3902 = vtanh.f32 %v1933_v6  ;;  %v3511_v5 = vld [vmem:[%s4197_s20 + $0x1e8] sm:$0xff] }
 0x1bd   : > { %v1616_v11 = vpop.f32.mrf.mxu0  ;;  %v1776_v12 = vpop.f32.mrf.mxu1  ;;  %2458 = vst.msk [vmem:[%s4275_s24 + $0x118] sm:$0xff] %vm2422_vm1, %v3899_v10  ;;  %3904 = vtanh.f32 %v2093_v7  ;;  %v3575_v10 = vld [vmem:[%s4197_s20 + $0x3e8] sm:$0xff] }
 0x1be   : > { %v3901_v15 = vpop.eup %3900  ;;  %3906 = vtanh.f32 %v1616_v11 }
 0x1bf   : > { %2522 = vst.msk [vmem:[%s4275_s24 + $0x318] sm:$0xff] %vm2422_vm1, %v3901_v15  ;;  %3908 = vtanh.f32 %v1776_v12  ;;  %3343 = vmatmul.msk.bf16.gmra.mxu0 %vm1132_vm0, %v3476_v8  ;;  %3375 = vmatmul.msk.bf16.gmra.mxu1 %vm1132_vm0, %v3508_v9  ;;  %v3543_v9 = vld [vmem:[%s4197_s20 + $0x2e8] sm:$0xff] }
 0x1c0   : > { %3407 = vmatmul.msk.bf16.gmra.mxu2 %vm1132_vm0, %v3540_v13  ;;  %3439 = vmatmul.msk.bf16.gmra.mxu3 %vm1132_vm0, %v3572_v14 }
 0x1c2   : > { %v3903_v16 = vpop.eup %3902 }
 0x1c3   : > { %v3905_v17 = vpop.eup %3904  ;;  %2586 = vst.msk [vmem:[%s4275_s24 + $0x518] sm:$0xff] %vm2422_vm1, %v3903_v16  ;;  %v1936_v18 = vpop.f32.mrf.mxu2 }
 0x1c4   : > { %v2096_v19 = vpop.f32.mrf.mxu3  ;;  %v3907_v20 = vpop.eup %3906  ;;  %2650 = vst.msk [vmem:[%s4275_s24 + $0x718] sm:$0xff] %vm2422_vm1, %v3905_v17  ;;  %3910 = vtanh.f32 %v1936_v18 }
 0x1c5   : > { %v1618_v21 = vpop.f32.mrf.mxu0  ;;  %v1778_v22 = vpop.f32.mrf.mxu1  ;;  %2459 = vst.msk [vmem:[%s4275_s24 + $0x120] sm:$0xff] %vm2422_vm1, %v3907_v20  ;;  %3912 = vtanh.f32 %v2096_v19 }
 0x1c6   : > { %v3909_v23 = vpop.eup %3908  ;;  %3914 = vtanh.f32 %v1618_v21 }
 0x1c7   : > { %2523 = vst.msk [vmem:[%s4275_s24 + $0x320] sm:$0xff] %vm2422_vm1, %v3909_v23  ;;  %3916 = vtanh.f32 %v1778_v22 }
 0x1ca   : > { %v3911_v24 = vpop.eup %3910 }
 0x1cb   : > { %v3913_v25 = vpop.eup %3912  ;;  %2587 = vst.msk [vmem:[%s4275_s24 + $0x520] sm:$0xff] %vm2422_vm1, %v3911_v24  ;;  %v1938_v26 = vpop.f32.mrf.mxu2  ;;  %v3480_v24 = vld [vmem:[%s4197_s20 + $0xf0] sm:$0xff] }
 0x1cc   : > { %v2098_v27 = vpop.f32.mrf.mxu3  ;;  %v3915_v30 = vpop.eup %3914  ;;  %2651 = vst.msk [vmem:[%s4275_s24 + $0x720] sm:$0xff] %vm2422_vm1, %v3913_v25  ;;  %3918 = vtanh.f32 %v1938_v26  ;;  %v3512_v25 = vld [vmem:[%s4197_s20 + $0x1f0] sm:$0xff] }
 0x1cd   : > { %v1621_v31 = vpop.f32.mrf.mxu0  ;;  %v1781_v32 = vpop.f32.mrf.mxu1  ;;  %2460 = vst.msk [vmem:[%s4275_s24 + $0x128] sm:$0xff] %vm2422_vm1, %v3915_v30  ;;  %3920 = vtanh.f32 %v2098_v27  ;;  %v3576_v30 = vld [vmem:[%s4197_s20 + $0x3f0] sm:$0xff] }
 0x1ce   : > { %v3917_v35 = vpop.eup %3916  ;;  %3922 = vtanh.f32 %v1621_v31 }
 0x1cf   : > { %2524 = vst.msk [vmem:[%s4275_s24 + $0x328] sm:$0xff] %vm2422_vm1, %v3917_v35  ;;  %3924 = vtanh.f32 %v1781_v32  ;;  %3344 = vmatmul.msk.bf16.gmra.mxu0 %vm1132_vm0, %v3477_v28  ;;  %3376 = vmatmul.msk.bf16.gmra.mxu1 %vm1132_vm0, %v3509_v29  ;;  %v3544_v29 = vld [vmem:[%s4197_s20 + $0x2f0] sm:$0xff] }
 0x1d0   : > { %3408 = vmatmul.msk.bf16.gmra.mxu2 %vm1132_vm0, %v3541_v33  ;;  %3440 = vmatmul.msk.bf16.gmra.mxu3 %vm1132_vm0, %v3573_v34 }
 0x1d2   : > { %v3919_v36 = vpop.eup %3918 }
 0x1d3   : > { %v3921_v37 = vpop.eup %3920  ;;  %2588 = vst.msk [vmem:[%s4275_s24 + $0x528] sm:$0xff] %vm2422_vm1, %v3919_v36  ;;  %v1941_v38 = vpop.f32.mrf.mxu2 }
 0x1d4   : > { %v2101_v39 = vpop.f32.mrf.mxu3  ;;  %v3923_v40 = vpop.eup %3922  ;;  %2652 = vst.msk [vmem:[%s4275_s24 + $0x728] sm:$0xff] %vm2422_vm1, %v3921_v37  ;;  %3926 = vtanh.f32 %v1941_v38 }
 0x1d5   : > { %v1623_v41 = vpop.f32.mrf.mxu0  ;;  %v1783_v42 = vpop.f32.mrf.mxu1  ;;  %2461 = vst.msk [vmem:[%s4275_s24 + $0x130] sm:$0xff] %vm2422_vm1, %v3923_v40  ;;  %3928 = vtanh.f32 %v2101_v39 }
 0x1d6   : > { %v3925_v43 = vpop.eup %3924  ;;  %3930 = vtanh.f32 %v1623_v41 }
 0x1d7   : > { %2525 = vst.msk [vmem:[%s4275_s24 + $0x330] sm:$0xff] %vm2422_vm1, %v3925_v43  ;;  %3932 = vtanh.f32 %v1783_v42 }
 0x1da   : > { %v3927_v44 = vpop.eup %3926 }
 0x1db   : > { %v3929_v45 = vpop.eup %3928  ;;  %2589 = vst.msk [vmem:[%s4275_s24 + $0x530] sm:$0xff] %vm2422_vm1, %v3927_v44  ;;  %v1943_v46 = vpop.f32.mrf.mxu2  ;;  %v3481_v44 = vld [vmem:[%s4197_s20 + $0xf8] sm:$0xff] }
 0x1dc   : > { %v2103_v47 = vpop.f32.mrf.mxu3  ;;  %v3931_v50 = vpop.eup %3930  ;;  %2653 = vst.msk [vmem:[%s4275_s24 + $0x730] sm:$0xff] %vm2422_vm1, %v3929_v45  ;;  %3934 = vtanh.f32 %v1943_v46  ;;  %v3513_v45 = vld [vmem:[%s4197_s20 + $0x1f8] sm:$0xff] }
 0x1dd   : > { %v1626_v51 = vpop.f32.mrf.mxu0  ;;  %v1786_v52 = vpop.f32.mrf.mxu1  ;;  %2462 = vst.msk [vmem:[%s4275_s24 + $0x138] sm:$0xff] %vm2422_vm1, %v3931_v50  ;;  %3936 = vtanh.f32 %v2103_v47  ;;  %v3577_v50 = vld [vmem:[%s4197_s20 + $0x3f8] sm:$0xff] }
 0x1de   : > { %v3933_v55 = vpop.eup %3932  ;;  %3938 = vtanh.f32 %v1626_v51 }
 0x1df   : > { %2526 = vst.msk [vmem:[%s4275_s24 + $0x338] sm:$0xff] %vm2422_vm1, %v3933_v55  ;;  %3940 = vtanh.f32 %v1786_v52  ;;  %3345 = vmatmul.msk.bf16.gmra.mxu0 %vm1132_vm0, %v3478_v48  ;;  %3377 = vmatmul.msk.bf16.gmra.mxu1 %vm1132_vm0, %v3510_v49  ;;  %v3545_v49 = vld [vmem:[%s4197_s20 + $0x2f8] sm:$0xff] }
 0x1e0   : > { %3409 = vmatmul.msk.bf16.gmra.mxu2 %vm1132_vm0, %v3542_v53  ;;  %3441 = vmatmul.msk.bf16.gmra.mxu3 %vm1132_vm0, %v3574_v54 }
 0x1e2   : > { %v3935_v56 = vpop.eup %3934 }
 0x1e3   : > { %v3937_v57 = vpop.eup %3936  ;;  %2590 = vst.msk [vmem:[%s4275_s24 + $0x538] sm:$0xff] %vm2422_vm1, %v3935_v56  ;;  %v1946_v58 = vpop.f32.mrf.mxu2 }
 0x1e4   : > { %v2106_v59 = vpop.f32.mrf.mxu3  ;;  %v3939_v60 = vpop.eup %3938  ;;  %2654 = vst.msk [vmem:[%s4275_s24 + $0x738] sm:$0xff] %vm2422_vm1, %v3937_v57  ;;  %3942 = vtanh.f32 %v1946_v58 }
 0x1e5   : > { %v1628_v61 = vpop.f32.mrf.mxu0  ;;  %v1788_v62 = vpop.f32.mrf.mxu1  ;;  %2463 = vst.msk [vmem:[%s4275_s24 + $0x140] sm:$0xff] %vm2422_vm1, %v3939_v60  ;;  %3944 = vtanh.f32 %v2106_v59 }
 0x1e6   : > { %v3941_v63 = vpop.eup %3940  ;;  %3946 = vtanh.f32 %v1628_v61 }
 0x1e7   : > { %2527 = vst.msk [vmem:[%s4275_s24 + $0x340] sm:$0xff] %vm2422_vm1, %v3941_v63  ;;  %3948 = vtanh.f32 %v1788_v62 }
 0x1ea   : > { %v3943_v0 = vpop.eup %3942 }
 0x1eb   : > { %v3945_v1 = vpop.eup %3944  ;;  %2591 = vst.msk [vmem:[%s4275_s24 + $0x540] sm:$0xff] %vm2422_vm1, %v3943_v0  ;;  %v1948_v2 = vpop.f32.mrf.mxu2 }
 0x1ec   : > { %v2108_v3 = vpop.f32.mrf.mxu3  ;;  %v3947_v6 = vpop.eup %3946  ;;  %2655 = vst.msk [vmem:[%s4275_s24 + $0x740] sm:$0xff] %vm2422_vm1, %v3945_v1  ;;  %3950 = vtanh.f32 %v1948_v2 }
 0x1ed   : > { %v1631_v7 = vpop.f32.mrf.mxu0  ;;  %v1791_v8 = vpop.f32.mrf.mxu1  ;;  %2464 = vst.msk [vmem:[%s4275_s24 + $0x148] sm:$0xff] %vm2422_vm1, %v3947_v6  ;;  %3952 = vtanh.f32 %v2108_v3 }
 0x1ee   : > { %v3949_v11 = vpop.eup %3948  ;;  %3954 = vtanh.f32 %v1631_v7 }
 0x1ef   : > { %2528 = vst.msk [vmem:[%s4275_s24 + $0x348] sm:$0xff] %vm2422_vm1, %v3949_v11  ;;  %3956 = vtanh.f32 %v1791_v8  ;;  %3346 = vmatmul.msk.bf16.gmra.mxu0 %vm1132_vm0, %v3479_v4  ;;  %3378 = vmatmul.msk.bf16.gmra.mxu1 %vm1132_vm0, %v3511_v5 }
 0x1f0   : > { %3410 = vmatmul.msk.bf16.gmra.mxu2 %vm1132_vm0, %v3543_v9  ;;  %3442 = vmatmul.msk.bf16.gmra.mxu3 %vm1132_vm0, %v3575_v10 }
 0x1f2   : > { %v3951_v12 = vpop.eup %3950 }
 0x1f3   : > { %v3953_v13 = vpop.eup %3952  ;;  %2592 = vst.msk [vmem:[%s4275_s24 + $0x548] sm:$0xff] %vm2422_vm1, %v3951_v12  ;;  %v1951_v14 = vpop.f32.mrf.mxu2 }
 0x1f4   : > { %v2111_v15 = vpop.f32.mrf.mxu3  ;;  %v3955_v16 = vpop.eup %3954  ;;  %2656 = vst.msk [vmem:[%s4275_s24 + $0x748] sm:$0xff] %vm2422_vm1, %v3953_v13  ;;  %3958 = vtanh.f32 %v1951_v14 }
 0x1f5   : > { %v1633_v17 = vpop.f32.mrf.mxu0  ;;  %v1793_v18 = vpop.f32.mrf.mxu1  ;;  %2465 = vst.msk [vmem:[%s4275_s24 + $0x150] sm:$0xff] %vm2422_vm1, %v3955_v16  ;;  %3960 = vtanh.f32 %v2111_v15 }
 0x1f6   : > { %v3957_v19 = vpop.eup %3956  ;;  %3962 = vtanh.f32 %v1633_v17 }
 0x1f7   : > { %2529 = vst.msk [vmem:[%s4275_s24 + $0x350] sm:$0xff] %vm2422_vm1, %v3957_v19  ;;  %3964 = vtanh.f32 %v1793_v18 }
 0x1fa   : > { %v3959_v20 = vpop.eup %3958 }
 0x1fb   : > { %v3961_v21 = vpop.eup %3960  ;;  %2593 = vst.msk [vmem:[%s4275_s24 + $0x550] sm:$0xff] %vm2422_vm1, %v3959_v20  ;;  %v1953_v22 = vpop.f32.mrf.mxu2 }
 0x1fc   : > { %v2113_v23 = vpop.f32.mrf.mxu3  ;;  %v3963_v26 = vpop.eup %3962  ;;  %2657 = vst.msk [vmem:[%s4275_s24 + $0x750] sm:$0xff] %vm2422_vm1, %v3961_v21  ;;  %3966 = vtanh.f32 %v1953_v22 }
 0x1fd   : > { %v1636_v27 = vpop.f32.mrf.mxu0  ;;  %v1796_v28 = vpop.f32.mrf.mxu1  ;;  %2466 = vst.msk [vmem:[%s4275_s24 + $0x158] sm:$0xff] %vm2422_vm1, %v3963_v26  ;;  %3968 = vtanh.f32 %v2113_v23 }
 0x1fe   : > { %v3965_v31 = vpop.eup %3964  ;;  %3970 = vtanh.f32 %v1636_v27 }
 0x1ff   : > { %2530 = vst.msk [vmem:[%s4275_s24 + $0x358] sm:$0xff] %vm2422_vm1, %v3965_v31  ;;  %3972 = vtanh.f32 %v1796_v28  ;;  %3347 = vmatmul.msk.bf16.gmra.mxu0 %vm1132_vm0, %v3480_v24  ;;  %3379 = vmatmul.msk.bf16.gmra.mxu1 %vm1132_vm0, %v3512_v25 }
 0x200   : > { %3411 = vmatmul.msk.bf16.gmra.mxu2 %vm1132_vm0, %v3544_v29  ;;  %3443 = vmatmul.msk.bf16.gmra.mxu3 %vm1132_vm0, %v3576_v30 }
 0x202   : > { %v3967_v32 = vpop.eup %3966 }
 0x203   : > { %v3969_v33 = vpop.eup %3968  ;;  %2594 = vst.msk [vmem:[%s4275_s24 + $0x558] sm:$0xff] %vm2422_vm1, %v3967_v32  ;;  %v1956_v34 = vpop.f32.mrf.mxu2 }
 0x204   : > { %v2116_v35 = vpop.f32.mrf.mxu3  ;;  %v3971_v36 = vpop.eup %3970  ;;  %2658 = vst.msk [vmem:[%s4275_s24 + $0x758] sm:$0xff] %vm2422_vm1, %v3969_v33  ;;  %3974 = vtanh.f32 %v1956_v34 }
 0x205   : > { %v1638_v37 = vpop.f32.mrf.mxu0  ;;  %v1798_v38 = vpop.f32.mrf.mxu1  ;;  %2467 = vst.msk [vmem:[%s4275_s24 + $0x160] sm:$0xff] %vm2422_vm1, %v3971_v36  ;;  %3976 = vtanh.f32 %v2116_v35 }
 0x206   : > { %v3973_v39 = vpop.eup %3972  ;;  %3978 = vtanh.f32 %v1638_v37 }
 0x207   : > { %2531 = vst.msk [vmem:[%s4275_s24 + $0x360] sm:$0xff] %vm2422_vm1, %v3973_v39  ;;  %3980 = vtanh.f32 %v1798_v38 }
 0x20a   : > { %v3975_v40 = vpop.eup %3974 }
 0x20b   : > { %v3977_v41 = vpop.eup %3976  ;;  %2595 = vst.msk [vmem:[%s4275_s24 + $0x560] sm:$0xff] %vm2422_vm1, %v3975_v40  ;;  %v1958_v42 = vpop.f32.mrf.mxu2 }
 0x20c   : > { %v2118_v43 = vpop.f32.mrf.mxu3  ;;  %v3979_v46 = vpop.eup %3978  ;;  %2659 = vst.msk [vmem:[%s4275_s24 + $0x760] sm:$0xff] %vm2422_vm1, %v3977_v41  ;;  %3982 = vtanh.f32 %v1958_v42 }
 0x20d   : > { %v1641_v47 = vpop.f32.mrf.mxu0  ;;  %v1801_v48 = vpop.f32.mrf.mxu1  ;;  %2468 = vst.msk [vmem:[%s4275_s24 + $0x168] sm:$0xff] %vm2422_vm1, %v3979_v46  ;;  %3984 = vtanh.f32 %v2118_v43 }
 0x20e   : > { %v3981_v51 = vpop.eup %3980  ;;  %3986 = vtanh.f32 %v1641_v47 }
 0x20f   : > { %2532 = vst.msk [vmem:[%s4275_s24 + $0x368] sm:$0xff] %vm2422_vm1, %v3981_v51  ;;  %3988 = vtanh.f32 %v1801_v48  ;;  %3348 = vmatmul.msk.bf16.gmra.mxu0 %vm1132_vm0, %v3481_v44  ;;  %3380 = vmatmul.msk.bf16.gmra.mxu1 %vm1132_vm0, %v3513_v45 }
 0x210   : > { %3412 = vmatmul.msk.bf16.gmra.mxu2 %vm1132_vm0, %v3545_v49  ;;  %3444 = vmatmul.msk.bf16.gmra.mxu3 %vm1132_vm0, %v3577_v50 }
 0x212   : > { %v3983_v52 = vpop.eup %3982 }
 0x213   : > { %v3985_v53 = vpop.eup %3984  ;;  %2596 = vst.msk [vmem:[%s4275_s24 + $0x568] sm:$0xff] %vm2422_vm1, %v3983_v52  ;;  %v1961_v54 = vpop.f32.mrf.mxu2 }
 0x214   : > { %v2121_v55 = vpop.f32.mrf.mxu3  ;;  %v3987_v56 = vpop.eup %3986  ;;  %2660 = vst.msk [vmem:[%s4275_s24 + $0x768] sm:$0xff] %vm2422_vm1, %v3985_v53  ;;  %3990 = vtanh.f32 %v1961_v54 }
 0x215   : > { %v1643_v57 = vpop.f32.mrf.mxu0  ;;  %v1803_v58 = vpop.f32.mrf.mxu1  ;;  %2469 = vst.msk [vmem:[%s4275_s24 + $0x170] sm:$0xff] %vm2422_vm1, %v3987_v56  ;;  %3992 = vtanh.f32 %v2121_v55 }
 0x216   : > { %v3989_v59 = vpop.eup %3988  ;;  %3994 = vtanh.f32 %v1643_v57 }
 0x217   : > { %2533 = vst.msk [vmem:[%s4275_s24 + $0x370] sm:$0xff] %vm2422_vm1, %v3989_v59  ;;  %3996 = vtanh.f32 %v1803_v58 }
 0x21a   : > { %v3991_v60 = vpop.eup %3990 }
 0x21b   : > { %v3993_v61 = vpop.eup %3992  ;;  %2597 = vst.msk [vmem:[%s4275_s24 + $0x570] sm:$0xff] %vm2422_vm1, %v3991_v60  ;;  %v1963_v62 = vpop.f32.mrf.mxu2 }
 0x21c   : > { %v2123_v63 = vpop.f32.mrf.mxu3  ;;  %v3995_v0 = vpop.eup %3994  ;;  %2661 = vst.msk [vmem:[%s4275_s24 + $0x770] sm:$0xff] %vm2422_vm1, %v3993_v61  ;;  %3998 = vtanh.f32 %v1963_v62 }
 0x21d   : > { %v1646_v1 = vpop.f32.mrf.mxu0  ;;  %v1806_v2 = vpop.f32.mrf.mxu1  ;;  %2470 = vst.msk [vmem:[%s4275_s24 + $0x178] sm:$0xff] %vm2422_vm1, %v3995_v0  ;;  %4000 = vtanh.f32 %v2123_v63 }
 0x21e   : > { %v3997_v3 = vpop.eup %3996  ;;  %4002 = vtanh.f32 %v1646_v1 }
 0x21f   : > { %2534 = vst.msk [vmem:[%s4275_s24 + $0x378] sm:$0xff] %vm2422_vm1, %v3997_v3  ;;  %4004 = vtanh.f32 %v1806_v2 }
 0x222   : > { %v3999_v4 = vpop.eup %3998 }
 0x223   : > { %v4001_v5 = vpop.eup %4000  ;;  %2598 = vst.msk [vmem:[%s4275_s24 + $0x578] sm:$0xff] %vm2422_vm1, %v3999_v4  ;;  %v1966_v6 = vpop.f32.mrf.mxu2 }
 0x224   : > { %v2126_v7 = vpop.f32.mrf.mxu3  ;;  %v4003_v8 = vpop.eup %4002  ;;  %2662 = vst.msk [vmem:[%s4275_s24 + $0x778] sm:$0xff] %vm2422_vm1, %v4001_v5  ;;  %4006 = vtanh.f32 %v1966_v6 }
 0x225   : > { %v1648_v9 = vpop.f32.mrf.mxu0  ;;  %v1808_v10 = vpop.f32.mrf.mxu1  ;;  %2471 = vst.msk [vmem:[%s4275_s24 + $0x180] sm:$0xff] %vm2422_vm1, %v4003_v8  ;;  %4008 = vtanh.f32 %v2126_v7 }
 0x226   : > { %v4005_v11 = vpop.eup %4004  ;;  %4010 = vtanh.f32 %v1648_v9 }
 0x227   : > { %2535 = vst.msk [vmem:[%s4275_s24 + $0x380] sm:$0xff] %vm2422_vm1, %v4005_v11  ;;  %4012 = vtanh.f32 %v1808_v10 }
 0x22a   : > { %v4007_v12 = vpop.eup %4006 }
 0x22b   : > { %v4009_v13 = vpop.eup %4008  ;;  %2599 = vst.msk [vmem:[%s4275_s24 + $0x580] sm:$0xff] %vm2422_vm1, %v4007_v12  ;;  %v1968_v14 = vpop.f32.mrf.mxu2 }
 0x22c   : > { %v2128_v15 = vpop.f32.mrf.mxu3  ;;  %v4011_v16 = vpop.eup %4010  ;;  %2663 = vst.msk [vmem:[%s4275_s24 + $0x780] sm:$0xff] %vm2422_vm1, %v4009_v13  ;;  %4014 = vtanh.f32 %v1968_v14 }
 0x22d   : > { %v1651_v17 = vpop.f32.mrf.mxu0  ;;  %v1811_v18 = vpop.f32.mrf.mxu1  ;;  %2472 = vst.msk [vmem:[%s4275_s24 + $0x188] sm:$0xff] %vm2422_vm1, %v4011_v16  ;;  %4016 = vtanh.f32 %v2128_v15 }
 0x22e   : > { %v4013_v19 = vpop.eup %4012  ;;  %4018 = vtanh.f32 %v1651_v17 }
 0x22f   : > { %2536 = vst.msk [vmem:[%s4275_s24 + $0x388] sm:$0xff] %vm2422_vm1, %v4013_v19  ;;  %4020 = vtanh.f32 %v1811_v18 }
 0x232   : > { %v4015_v20 = vpop.eup %4014 }
 0x233   : > { %v4017_v21 = vpop.eup %4016  ;;  %2600 = vst.msk [vmem:[%s4275_s24 + $0x588] sm:$0xff] %vm2422_vm1, %v4015_v20  ;;  %v1971_v22 = vpop.f32.mrf.mxu2 }
 0x234   : > { %v2131_v23 = vpop.f32.mrf.mxu3  ;;  %v4019_v24 = vpop.eup %4018  ;;  %2664 = vst.msk [vmem:[%s4275_s24 + $0x788] sm:$0xff] %vm2422_vm1, %v4017_v21  ;;  %4022 = vtanh.f32 %v1971_v22 }
 0x235   : > { %v1653_v25 = vpop.f32.mrf.mxu0  ;;  %v1813_v26 = vpop.f32.mrf.mxu1  ;;  %2473 = vst.msk [vmem:[%s4275_s24 + $0x190] sm:$0xff] %vm2422_vm1, %v4019_v24  ;;  %4024 = vtanh.f32 %v2131_v23 }
 0x236   : > { %v4021_v27 = vpop.eup %4020  ;;  %4026 = vtanh.f32 %v1653_v25 }
 0x237   : > { %2537 = vst.msk [vmem:[%s4275_s24 + $0x390] sm:$0xff] %vm2422_vm1, %v4021_v27  ;;  %4028 = vtanh.f32 %v1813_v26 }
 0x23a   : > { %v4023_v28 = vpop.eup %4022 }
 0x23b   : > { %v4025_v29 = vpop.eup %4024  ;;  %2601 = vst.msk [vmem:[%s4275_s24 + $0x590] sm:$0xff] %vm2422_vm1, %v4023_v28  ;;  %v1973_v30 = vpop.f32.mrf.mxu2 }
 0x23c   : > { %v2133_v31 = vpop.f32.mrf.mxu3  ;;  %v4027_v32 = vpop.eup %4026  ;;  %2665 = vst.msk [vmem:[%s4275_s24 + $0x790] sm:$0xff] %vm2422_vm1, %v4025_v29  ;;  %4030 = vtanh.f32 %v1973_v30 }
 0x23d   : > { %v1656_v33 = vpop.f32.mrf.mxu0  ;;  %v1816_v34 = vpop.f32.mrf.mxu1  ;;  %2474 = vst.msk [vmem:[%s4275_s24 + $0x198] sm:$0xff] %vm2422_vm1, %v4027_v32  ;;  %4032 = vtanh.f32 %v2133_v31 }
 0x23e   : > { %v4029_v35 = vpop.eup %4028  ;;  %4034 = vtanh.f32 %v1656_v33 }
 0x23f   : > { %2538 = vst.msk [vmem:[%s4275_s24 + $0x398] sm:$0xff] %vm2422_vm1, %v4029_v35  ;;  %4036 = vtanh.f32 %v1816_v34 }
 0x242   : > { %v4031_v36 = vpop.eup %4030 }
 0x243   : > { %v4033_v37 = vpop.eup %4032  ;;  %2602 = vst.msk [vmem:[%s4275_s24 + $0x598] sm:$0xff] %vm2422_vm1, %v4031_v36  ;;  %v1976_v38 = vpop.f32.mrf.mxu2 }
 0x244   : > { %v2136_v39 = vpop.f32.mrf.mxu3  ;;  %v4035_v40 = vpop.eup %4034  ;;  %2666 = vst.msk [vmem:[%s4275_s24 + $0x798] sm:$0xff] %vm2422_vm1, %v4033_v37  ;;  %4038 = vtanh.f32 %v1976_v38 }
 0x245   : > { %v1658_v41 = vpop.f32.mrf.mxu0  ;;  %v1818_v42 = vpop.f32.mrf.mxu1  ;;  %2475 = vst.msk [vmem:[%s4275_s24 + $0x1a0] sm:$0xff] %vm2422_vm1, %v4035_v40  ;;  %4040 = vtanh.f32 %v2136_v39 }
 0x246   : > { %v4037_v43 = vpop.eup %4036  ;;  %4042 = vtanh.f32 %v1658_v41 }
 0x247   : > { %2539 = vst.msk [vmem:[%s4275_s24 + $0x3a0] sm:$0xff] %vm2422_vm1, %v4037_v43  ;;  %4044 = vtanh.f32 %v1818_v42 }
 0x24a   : > { %v4039_v44 = vpop.eup %4038 }
 0x24b   : > { %v4041_v45 = vpop.eup %4040  ;;  %2603 = vst.msk [vmem:[%s4275_s24 + $0x5a0] sm:$0xff] %vm2422_vm1, %v4039_v44  ;;  %v1978_v46 = vpop.f32.mrf.mxu2 }
 0x24c   : > { %v2138_v47 = vpop.f32.mrf.mxu3  ;;  %v4043_v48 = vpop.eup %4042  ;;  %2667 = vst.msk [vmem:[%s4275_s24 + $0x7a0] sm:$0xff] %vm2422_vm1, %v4041_v45  ;;  %4046 = vtanh.f32 %v1978_v46 }
 0x24d   : > { %v1661_v49 = vpop.f32.mrf.mxu0  ;;  %v1821_v50 = vpop.f32.mrf.mxu1  ;;  %2476 = vst.msk [vmem:[%s4275_s24 + $0x1a8] sm:$0xff] %vm2422_vm1, %v4043_v48  ;;  %4048 = vtanh.f32 %v2138_v47 }
 0x24e   : > { %v4045_v51 = vpop.eup %4044  ;;  %4050 = vtanh.f32 %v1661_v49 }
 0x24f   : > { %2540 = vst.msk [vmem:[%s4275_s24 + $0x3a8] sm:$0xff] %vm2422_vm1, %v4045_v51  ;;  %4052 = vtanh.f32 %v1821_v50 }
 0x252   : > { %v4047_v52 = vpop.eup %4046 }
 0x253   : > { %v4049_v53 = vpop.eup %4048  ;;  %2604 = vst.msk [vmem:[%s4275_s24 + $0x5a8] sm:$0xff] %vm2422_vm1, %v4047_v52  ;;  %v1981_v54 = vpop.f32.mrf.mxu2 }
 0x254   : > { %v2141_v55 = vpop.f32.mrf.mxu3  ;;  %v4051_v56 = vpop.eup %4050  ;;  %2668 = vst.msk [vmem:[%s4275_s24 + $0x7a8] sm:$0xff] %vm2422_vm1, %v4049_v53  ;;  %4054 = vtanh.f32 %v1981_v54 }
 0x255   : > { %v1663_v57 = vpop.f32.mrf.mxu0  ;;  %v1823_v58 = vpop.f32.mrf.mxu1  ;;  %2477 = vst.msk [vmem:[%s4275_s24 + $0x1b0] sm:$0xff] %vm2422_vm1, %v4051_v56  ;;  %4056 = vtanh.f32 %v2141_v55 }
 0x256   : > { %v4053_v59 = vpop.eup %4052  ;;  %4058 = vtanh.f32 %v1663_v57 }
 0x257   : > { %2541 = vst.msk [vmem:[%s4275_s24 + $0x3b0] sm:$0xff] %vm2422_vm1, %v4053_v59  ;;  %4060 = vtanh.f32 %v1823_v58 }
 0x25a   : > { %v4055_v60 = vpop.eup %4054 }
 0x25b   : > { %v4057_v61 = vpop.eup %4056  ;;  %2605 = vst.msk [vmem:[%s4275_s24 + $0x5b0] sm:$0xff] %vm2422_vm1, %v4055_v60  ;;  %v1983_v62 = vpop.f32.mrf.mxu2 }
 0x25c   : > { %v2143_v63 = vpop.f32.mrf.mxu3  ;;  %v4059_v0 = vpop.eup %4058  ;;  %2669 = vst.msk [vmem:[%s4275_s24 + $0x7b0] sm:$0xff] %vm2422_vm1, %v4057_v61  ;;  %4062 = vtanh.f32 %v1983_v62 }
 0x25d   : > { %v1666_v1 = vpop.f32.mrf.mxu0  ;;  %v1826_v2 = vpop.f32.mrf.mxu1  ;;  %2478 = vst.msk [vmem:[%s4275_s24 + $0x1b8] sm:$0xff] %vm2422_vm1, %v4059_v0  ;;  %4064 = vtanh.f32 %v2143_v63 }
 0x25e   : > { %v4061_v3 = vpop.eup %4060  ;;  %4066 = vtanh.f32 %v1666_v1 }
 0x25f   : > { %2542 = vst.msk [vmem:[%s4275_s24 + $0x3b8] sm:$0xff] %vm2422_vm1, %v4061_v3  ;;  %4068 = vtanh.f32 %v1826_v2 }
 0x262   : > { %v4063_v4 = vpop.eup %4062 }
 0x263   : > { %v4065_v5 = vpop.eup %4064  ;;  %2606 = vst.msk [vmem:[%s4275_s24 + $0x5b8] sm:$0xff] %vm2422_vm1, %v4063_v4  ;;  %v1986_v6 = vpop.f32.mrf.mxu2 }
 0x264   : > { %v2146_v7 = vpop.f32.mrf.mxu3  ;;  %v4067_v8 = vpop.eup %4066  ;;  %2670 = vst.msk [vmem:[%s4275_s24 + $0x7b8] sm:$0xff] %vm2422_vm1, %v4065_v5  ;;  %4070 = vtanh.f32 %v1986_v6 }
 0x265   : > { %v1668_v9 = vpop.f32.mrf.mxu0  ;;  %v1828_v10 = vpop.f32.mrf.mxu1  ;;  %2479 = vst.msk [vmem:[%s4275_s24 + $0x1c0] sm:$0xff] %vm2422_vm1, %v4067_v8  ;;  %4072 = vtanh.f32 %v2146_v7 }
 0x266   : > { %v4069_v11 = vpop.eup %4068  ;;  %4074 = vtanh.f32 %v1668_v9 }
 0x267   : > { %2543 = vst.msk [vmem:[%s4275_s24 + $0x3c0] sm:$0xff] %vm2422_vm1, %v4069_v11  ;;  %4076 = vtanh.f32 %v1828_v10 }
 0x26a   : > { %v4071_v12 = vpop.eup %4070 }
 0x26b   : > { %v4073_v13 = vpop.eup %4072  ;;  %2607 = vst.msk [vmem:[%s4275_s24 + $0x5c0] sm:$0xff] %vm2422_vm1, %v4071_v12  ;;  %v1988_v14 = vpop.f32.mrf.mxu2 }
 0x26c   : > { %v2148_v15 = vpop.f32.mrf.mxu3  ;;  %v4075_v16 = vpop.eup %4074  ;;  %2671 = vst.msk [vmem:[%s4275_s24 + $0x7c0] sm:$0xff] %vm2422_vm1, %v4073_v13  ;;  %4078 = vtanh.f32 %v1988_v14 }
 0x26d   : > { %v1671_v17 = vpop.f32.mrf.mxu0  ;;  %v1831_v18 = vpop.f32.mrf.mxu1  ;;  %2480 = vst.msk [vmem:[%s4275_s24 + $0x1c8] sm:$0xff] %vm2422_vm1, %v4075_v16  ;;  %4080 = vtanh.f32 %v2148_v15 }
 0x26e   : > { %v4077_v19 = vpop.eup %4076  ;;  %4082 = vtanh.f32 %v1671_v17 }
 0x26f   : > { %2544 = vst.msk [vmem:[%s4275_s24 + $0x3c8] sm:$0xff] %vm2422_vm1, %v4077_v19  ;;  %4084 = vtanh.f32 %v1831_v18 }
 0x272   : > { %v4079_v20 = vpop.eup %4078 }
 0x273   : > { %v4081_v21 = vpop.eup %4080  ;;  %2608 = vst.msk [vmem:[%s4275_s24 + $0x5c8] sm:$0xff] %vm2422_vm1, %v4079_v20  ;;  %v1991_v22 = vpop.f32.mrf.mxu2 }
 0x274   : > { %v2151_v23 = vpop.f32.mrf.mxu3  ;;  %v4083_v24 = vpop.eup %4082  ;;  %2672 = vst.msk [vmem:[%s4275_s24 + $0x7c8] sm:$0xff] %vm2422_vm1, %v4081_v21  ;;  %4086 = vtanh.f32 %v1991_v22 }
 0x275   : > { %v1673_v25 = vpop.f32.mrf.mxu0  ;;  %v1833_v26 = vpop.f32.mrf.mxu1  ;;  %2481 = vst.msk [vmem:[%s4275_s24 + $0x1d0] sm:$0xff] %vm2422_vm1, %v4083_v24  ;;  %4088 = vtanh.f32 %v2151_v23 }
 0x276   : > { %v4085_v27 = vpop.eup %4084  ;;  %4090 = vtanh.f32 %v1673_v25 }
 0x277   : > { %2545 = vst.msk [vmem:[%s4275_s24 + $0x3d0] sm:$0xff] %vm2422_vm1, %v4085_v27  ;;  %4092 = vtanh.f32 %v1833_v26 }
 0x27a   : > { %v4087_v28 = vpop.eup %4086 }
 0x27b   : > { %v4089_v29 = vpop.eup %4088  ;;  %2609 = vst.msk [vmem:[%s4275_s24 + $0x5d0] sm:$0xff] %vm2422_vm1, %v4087_v28  ;;  %v1993_v30 = vpop.f32.mrf.mxu2 }
 0x27c   : > { %v2153_v31 = vpop.f32.mrf.mxu3  ;;  %v4091_v32 = vpop.eup %4090  ;;  %2673 = vst.msk [vmem:[%s4275_s24 + $0x7d0] sm:$0xff] %vm2422_vm1, %v4089_v29  ;;  %4094 = vtanh.f32 %v1993_v30 }
 0x27d   : > { %v1676_v33 = vpop.f32.mrf.mxu0  ;;  %v1836_v34 = vpop.f32.mrf.mxu1  ;;  %2482 = vst.msk [vmem:[%s4275_s24 + $0x1d8] sm:$0xff] %vm2422_vm1, %v4091_v32  ;;  %4096 = vtanh.f32 %v2153_v31 }
 0x27e   : > { %v4093_v35 = vpop.eup %4092  ;;  %4098 = vtanh.f32 %v1676_v33 }
 0x27f   : > { %2546 = vst.msk [vmem:[%s4275_s24 + $0x3d8] sm:$0xff] %vm2422_vm1, %v4093_v35  ;;  %4100 = vtanh.f32 %v1836_v34 }
 0x282   : > { %v4095_v36 = vpop.eup %4094 }
 0x283   : > { %v4097_v37 = vpop.eup %4096  ;;  %2610 = vst.msk [vmem:[%s4275_s24 + $0x5d8] sm:$0xff] %vm2422_vm1, %v4095_v36  ;;  %v1996_v38 = vpop.f32.mrf.mxu2 }
 0x284   : > { %v2156_v39 = vpop.f32.mrf.mxu3  ;;  %v4099_v40 = vpop.eup %4098  ;;  %2674 = vst.msk [vmem:[%s4275_s24 + $0x7d8] sm:$0xff] %vm2422_vm1, %v4097_v37  ;;  %4102 = vtanh.f32 %v1996_v38 }
 0x285   : > { %v1678_v41 = vpop.f32.mrf.mxu0  ;;  %v1838_v42 = vpop.f32.mrf.mxu1  ;;  %2483 = vst.msk [vmem:[%s4275_s24 + $0x1e0] sm:$0xff] %vm2422_vm1, %v4099_v40  ;;  %4104 = vtanh.f32 %v2156_v39 }
 0x286   : > { %v4101_v43 = vpop.eup %4100  ;;  %4106 = vtanh.f32 %v1678_v41 }
 0x287   : > { %2547 = vst.msk [vmem:[%s4275_s24 + $0x3e0] sm:$0xff] %vm2422_vm1, %v4101_v43  ;;  %4108 = vtanh.f32 %v1838_v42 }
 0x28a   : > { %v4103_v44 = vpop.eup %4102 }
 0x28b   : > { %v4105_v45 = vpop.eup %4104  ;;  %2611 = vst.msk [vmem:[%s4275_s24 + $0x5e0] sm:$0xff] %vm2422_vm1, %v4103_v44  ;;  %v1998_v46 = vpop.f32.mrf.mxu2 }
 0x28c   : > { %v2158_v47 = vpop.f32.mrf.mxu3  ;;  %v4107_v48 = vpop.eup %4106  ;;  %2675 = vst.msk [vmem:[%s4275_s24 + $0x7e0] sm:$0xff] %vm2422_vm1, %v4105_v45  ;;  %4110 = vtanh.f32 %v1998_v46 }
 0x28d   : > { %v1681_v49 = vpop.f32.mrf.mxu0  ;;  %v1841_v50 = vpop.f32.mrf.mxu1  ;;  %2484 = vst.msk [vmem:[%s4275_s24 + $0x1e8] sm:$0xff] %vm2422_vm1, %v4107_v48  ;;  %4112 = vtanh.f32 %v2158_v47 }
 0x28e   : > { %v4109_v51 = vpop.eup %4108  ;;  %4114 = vtanh.f32 %v1681_v49 }
 0x28f   : > { %2548 = vst.msk [vmem:[%s4275_s24 + $0x3e8] sm:$0xff] %vm2422_vm1, %v4109_v51  ;;  %4116 = vtanh.f32 %v1841_v50 }
 0x292   : > { %v4111_v52 = vpop.eup %4110 }
 0x293   : > { %v4113_v53 = vpop.eup %4112  ;;  %2612 = vst.msk [vmem:[%s4275_s24 + $0x5e8] sm:$0xff] %vm2422_vm1, %v4111_v52  ;;  %v2001_v54 = vpop.f32.mrf.mxu2 }
 0x294   : > { %v2161_v55 = vpop.f32.mrf.mxu3  ;;  %v4115_v56 = vpop.eup %4114  ;;  %2676 = vst.msk [vmem:[%s4275_s24 + $0x7e8] sm:$0xff] %vm2422_vm1, %v4113_v53  ;;  %4118 = vtanh.f32 %v2001_v54 }
 0x295   : > { %v1683_v57 = vpop.f32.mrf.mxu0  ;;  %v1843_v58 = vpop.f32.mrf.mxu1  ;;  %2485 = vst.msk [vmem:[%s4275_s24 + $0x1f0] sm:$0xff] %vm2422_vm1, %v4115_v56  ;;  %4120 = vtanh.f32 %v2161_v55 }
 0x296   : > { %v4117_v59 = vpop.eup %4116  ;;  %4122 = vtanh.f32 %v1683_v57 }
 0x297   : > { %2549 = vst.msk [vmem:[%s4275_s24 + $0x3f0] sm:$0xff] %vm2422_vm1, %v4117_v59  ;;  %4124 = vtanh.f32 %v1843_v58 }
 0x29a   : > { %v4119_v60 = vpop.eup %4118 }
 0x29b   : > { %v4121_v61 = vpop.eup %4120  ;;  %2613 = vst.msk [vmem:[%s4275_s24 + $0x5f0] sm:$0xff] %vm2422_vm1, %v4119_v60  ;;  %v2003_v62 = vpop.f32.mrf.mxu2 }
 0x29c   : > { %v2163_v63 = vpop.f32.mrf.mxu3  ;;  %v4123_v0 = vpop.eup %4122  ;;  %2677 = vst.msk [vmem:[%s4275_s24 + $0x7f0] sm:$0xff] %vm2422_vm1, %v4121_v61  ;;  %4126 = vtanh.f32 %v2003_v62 }
 0x29d   : > { %v4125_v1 = vpop.eup %4124  ;;  %2486 = vst.msk [vmem:[%s4275_s24 + $0x1f8] sm:$0xff] %vm2422_vm1, %v4123_v0  ;;  %4128 = vtanh.f32 %v2163_v63 }
 0x29e   : > { %2550 = vst.msk [vmem:[%s4275_s24 + $0x3f8] sm:$0xff] %vm2422_vm1, %v4125_v1 }
 0x2a2   : > { %v4127_v2 = vpop.eup %4126 }
 0x2a3   : > { %v4129_v3 = vpop.eup %4128  ;;  %2614 = vst.msk [vmem:[%s4275_s24 + $0x5f8] sm:$0xff] %vm2422_vm1, %v4127_v2 }
 0x2a4   : > { %2678 = vst.msk [vmem:[%s4275_s24 + $0x7f8] sm:$0xff] %vm2422_vm1, %v4129_v3 }
 0x2a5 PF: > { %s12_s11 = sadd.s32 1, %s4152_s11   ;;  %s4985_s9 = smov %s4148_s10 }
 0x2a6   : > { %p9_p5 = scmp.ge.s32.totalorder %s12_s11, 6   ;;  %s4986_s10 = smov %s4988_s12 }
 0x2a8   :  { %11 = sbr.rel (!%p9_p5) target bundleno = 2 (0x2), region = 61 }

</bundles_post_ra>
